<compile_context>
chip_gen: v6e
topology: v6e:2x2x1
jax: 0.10.0
libtpu: 0.0.40
codegen_flags: <defaults>
</compile_context>

<pallas_src>
import jax
import jax.numpy as jnp
from jax import lax
from jax.experimental import pallas as pl
from jax.experimental.pallas import tpu as pltpu

N_EMBED = 384
N_HEAD = 6
HEAD_SIZE = N_EMBED // N_HEAD   # 64
HIDDEN = 4 * N_EMBED            # 1536
LN_EPS = 1e-5


def _layernorm(x, gamma, beta):
    mu = jnp.mean(x, axis=-1, keepdims=True)
    var = jnp.mean((x - mu) ** 2, axis=-1, keepdims=True)
    return (x - mu) * lax.rsqrt(var + LN_EPS) * gamma + beta


def block_kernel(x_ref,
                 ln1g_ref, ln1b_ref,
                 wqkv_ref, wp_ref, bp_ref,
                 ln2g_ref, ln2b_ref,
                 w1_ref, b1_ref, w2_ref, b2_ref,
                 o_ref):
    Bblk, T, C = x_ref.shape
    R = Bblk * T

    x = x_ref[...]                                  # (Bblk, T, C) f32
    xf = x.reshape(R, C)                            # fold batch into rows

    # ---- ln1 + multi-head causal self-attention ------------------------------
    h = _layernorm(xf, ln1g_ref[0], ln1b_ref[0])    # (R, C) f32

    # fused QKV: one bf16 MXU dot with N = 3C (scale already folded into Wq)
    qkv = jnp.dot(h.astype(jnp.bfloat16), wqkv_ref[...],
                  preferred_element_type=jnp.float32)          # (R, 3C) f32

    q = qkv[:, :C].reshape(Bblk, T, C).astype(jnp.bfloat16)
    k = qkv[:, C:2 * C].reshape(Bblk, T, C).astype(jnp.bfloat16)
    v = qkv[:, 2 * C:].reshape(Bblk, T, C).astype(jnp.bfloat16)

    row = lax.broadcasted_iota(jnp.int32, (T, T), 0)
    col = lax.broadcasted_iota(jnp.int32, (T, T), 1)
    causal = row >= col                             # (T, T) lower-triangular

    # accumulate the output projection per head (no concat / relayout)
    proj = jnp.zeros((R, C), jnp.float32)
    for hd in range(N_HEAD):                        # static unroll over 6 heads
        lo = hd * HEAD_SIZE
        hi = lo + HEAD_SIZE
        qh = q[:, :, lo:hi]                         # (Bblk, T, hs) bf16
        kh = k[:, :, lo:hi]
        vh = v[:, :, lo:hi]
        s = jnp.einsum("bqd,bkd->bqk", qh, kh,
                       preferred_element_type=jnp.float32)     # (Bblk, T, T)
        s = jnp.where(causal, s, -1e30)             # finite mask: NaN-safe
        s = s - jnp.max(s, axis=-1, keepdims=True)
        p = jnp.exp(s)
        p = p * pl.reciprocal(jnp.sum(p, axis=-1, keepdims=True), approx=True)
        ho = jnp.einsum("bqk,bkd->bqd", p.astype(jnp.bfloat16), vh,
                        preferred_element_type=jnp.float32)    # (Bblk, T, hs)
        proj += jnp.dot(ho.reshape(R, HEAD_SIZE).astype(jnp.bfloat16),
                        wp_ref[lo:hi, :],
                        preferred_element_type=jnp.float32)    # (R, C)

    x1 = xf + proj + bp_ref[0]                      # residual 1

    # ---- ln2 + feed-forward ---------------------------------------------------
    h2 = _layernorm(x1, ln2g_ref[0], ln2b_ref[0])
    ff = jnp.dot(h2.astype(jnp.bfloat16), w1_ref[...],
                 preferred_element_type=jnp.float32) + b1_ref[0]
    ff = jnp.maximum(ff, 0.0)                       # ReLU
    ff = jnp.dot(ff.astype(jnp.bfloat16), w2_ref[...],
                 preferred_element_type=jnp.float32) + b2_ref[0]

    o_ref[...] = (x1 + ff).reshape(Bblk, T, C)      # residual 2


def block_forward(x, params, block_b=None):
    B, T, C = x.shape
    assert C == N_EMBED

    ln1g, ln1b, wq, wk, wv, wp, bp, ln2g, ln2b, w1, b1, w2, b2 = params

    # Fold the attention scale into Wq (compile-time constant), then cast the
    # fused QKV weight (and the other matmul weights) to bf16: native MXU
    # path, half the DMA / VMEM footprint.
    scale = HEAD_SIZE ** -0.5
    wqkv = jnp.concatenate([wq * scale, wk, wv], axis=1).astype(jnp.bfloat16)
    wp_b = wp.astype(jnp.bfloat16)
    w1_b = w1.astype(jnp.bfloat16)
    w2_b = w2.astype(jnp.bfloat16)

    # Fold enough batch elements into one grid step to target >=256 MXU rows.
    if block_b is None:
        block_b = max(1, min(B, pl.cdiv(256, T)))
    while B % block_b != 0:
        block_b -= 1

    full = lambda shape: pl.BlockSpec(shape, lambda b: (0,) * len(shape))
    in_specs = [
        pl.BlockSpec((block_b, T, C), lambda b: (b, 0, 0)),  # x
        full((1, C)), full((1, C)),                          # ln1 gamma / beta
        full((C, 3 * C)),                                    # Wqkv (fused, scaled)
        full((C, C)), full((1, C)),                          # Wproj, bproj
        full((1, C)), full((1, C)),                          # ln2 gamma / beta
        full((C, HIDDEN)), full((1, HIDDEN)),                # W1, b1
        full((HIDDEN, C)), full((1, C)),                     # W2, b2
    ]
    out_spec = pl.BlockSpec((block_b, T, C), lambda b: (b, 0, 0))

    return pl.pallas_call(
        block_kernel,
        out_shape=jax.ShapeDtypeStruct((B, T, C), jnp.float32),
        grid=(B // block_b,),
        in_specs=in_specs,
        out_specs=out_spec,
        compiler_params=pltpu.CompilerParams(
            dimension_semantics=("parallel",)),
    )(x, ln1g, ln1b, wqkv, wp_b, bp, ln2g, ln2b, w1_b, b1, w2_b, b2)


def init_params(key):
    ks = jax.random.split(key, 8)
    scale = 0.02
    wq = jax.random.normal(ks[0], (N_EMBED, N_EMBED), jnp.float32) * scale
    wk = jax.random.normal(ks[1], (N_EMBED, N_EMBED), jnp.float32) * scale
    wv = jax.random.normal(ks[2], (N_EMBED, N_EMBED), jnp.float32) * scale
    wp = jax.random.normal(ks[3], (N_EMBED, N_EMBED), jnp.float32) * scale
    bp = jax.random.normal(ks[4], (1, N_EMBED), jnp.float32) * scale
    w1 = jax.random.normal(ks[5], (N_EMBED, HIDDEN), jnp.float32) * scale
    b1 = jax.random.normal(ks[6], (1, HIDDEN), jnp.float32) * scale
    w2 = jax.random.normal(ks[7], (HIDDEN, N_EMBED), jnp.float32) * scale
    b2 = jnp.zeros((1, N_EMBED), jnp.float32)
    ln1g = jnp.ones((1, N_EMBED), jnp.float32)
    ln1b = jnp.zeros((1, N_EMBED), jnp.float32)
    ln2g = jnp.ones((1, N_EMBED), jnp.float32)
    ln2b = jnp.zeros((1, N_EMBED), jnp.float32)
    return (ln1g, ln1b, wq, wk, wv, wp, bp, ln2g, ln2b, w1, b1, w2, b2)


def block_reference(x, params):
    """Pure-JAX f32 reference reproducing the PyTorch forward (dropout=eval)."""
    ln1g, ln1b, wq, wk, wv, wp, bp, ln2g, ln2b, w1, b1, w2, b2 = params
    B, T, C = x.shape

    def ln(z, g, b):
        mu = jnp.mean(z, -1, keepdims=True)
        var = jnp.mean((z - mu) ** 2, -1, keepdims=True)
        return (z - mu) / jnp.sqrt(var + LN_EPS) * g + b

    h = ln(x, ln1g[0], ln1b[0])
    q = h @ wq
    k = h @ wk
    v = h @ wv
    qh = q.reshape(B, T, N_HEAD, HEAD_SIZE).transpose(0, 2, 1, 3)
    kh = k.reshape(B, T, N_HEAD, HEAD_SIZE).transpose(0, 2, 1, 3)
    vh = v.reshape(B, T, N_HEAD, HEAD_SIZE).transpose(0, 2, 1, 3)
    s = jnp.einsum("bhqd,bhkd->bhqk", qh, kh) * HEAD_SIZE ** -0.5
    mask = jnp.tril(jnp.ones((T, T), bool))
    s = jnp.where(mask, s, -jnp.inf)
    p = jax.nn.softmax(s, -1)
    att = jnp.einsum("bhqk,bhkd->bhqd", p, vh).transpose(0, 2, 1, 3).reshape(B, T, C)
    x1 = x + att @ wp + bp[0]
    h2 = ln(x1, ln2g[0], ln2b[0])
    ff = jnp.maximum(h2 @ w1 + b1[0], 0.0) @ w2 + b2[0]
    return x1 + ff


if __name__ == "__main__":
    key = jax.random.PRNGKey(0)
    k_x, k_p = jax.random.split(key)

    B, T = 2, 8          # small seq; n_embed stays 384 as the module implies
    x = jax.random.normal(k_x, (B, T, N_EMBED), jnp.float32)
    params = init_params(k_p)

    out = block_forward(x, params)
    out = jax.block_until_ready(out)

    ref = block_reference(x, params)
    assert out.shape == (B, T, N_EMBED)
    # bf16 MXU operands (f32 accumulation) -> loosened tolerance vs f32 reference
    assert jnp.allclose(out, ref, atol=5e-2, rtol=5e-2), "mismatch vs reference"

    print("KERNEL_OK")
</pallas_src>

<mosaic_0001>
module attributes {stable_mosaic.version = 11 : i64} {
  func.func @block_kernel(%arg0: i32, %arg1: memref<2x8x384xf32, #tpu.memory_space<vmem>>, %arg2: memref<1x384xf32, #tpu.memory_space<vmem>>, %arg3: memref<1x384xf32, #tpu.memory_space<vmem>>, %arg4: memref<384x1152xbf16, #tpu.memory_space<vmem>>, %arg5: memref<384x384xbf16, #tpu.memory_space<vmem>>, %arg6: memref<1x384xf32, #tpu.memory_space<vmem>>, %arg7: memref<1x384xf32, #tpu.memory_space<vmem>>, %arg8: memref<1x384xf32, #tpu.memory_space<vmem>>, %arg9: memref<384x1536xbf16, #tpu.memory_space<vmem>>, %arg10: memref<1x1536xf32, #tpu.memory_space<vmem>>, %arg11: memref<1536x384xbf16, #tpu.memory_space<vmem>>, %arg12: memref<1x384xf32, #tpu.memory_space<vmem>>, %arg13: memref<2x8x384xf32, #tpu.memory_space<vmem>>) attributes {dimension_semantics = [#tpu.dimension_semantics<parallel>], iteration_bounds = array<i64: 1>, scalar_prefetch = 0 : i64, scratch_operands = 0 : i64, tpu.core_type = #tpu.core_type<tc>, window_params = [{transform_indices = @transform_0, window_bounds = array<i64: 2, 8, 384>}, {pipeline_mode = #tpu.pipeline_mode<synchronous>, transform_indices = @transform_1, window_bounds = array<i64: 1, 384>}, {pipeline_mode = #tpu.pipeline_mode<synchronous>, transform_indices = @transform_2, window_bounds = array<i64: 1, 384>}, {pipeline_mode = #tpu.pipeline_mode<synchronous>, transform_indices = @transform_3, window_bounds = array<i64: 384, 1152>}, {pipeline_mode = #tpu.pipeline_mode<synchronous>, transform_indices = @transform_4, window_bounds = array<i64: 384, 384>}, {pipeline_mode = #tpu.pipeline_mode<synchronous>, transform_indices = @transform_5, window_bounds = array<i64: 1, 384>}, {pipeline_mode = #tpu.pipeline_mode<synchronous>, transform_indices = @transform_6, window_bounds = array<i64: 1, 384>}, {pipeline_mode = #tpu.pipeline_mode<synchronous>, transform_indices = @transform_7, window_bounds = array<i64: 1, 384>}, {pipeline_mode = #tpu.pipeline_mode<synchronous>, transform_indices = @transform_8, window_bounds = array<i64: 384, 1536>}, {pipeline_mode = #tpu.pipeline_mode<synchronous>, transform_indices = @transform_9, window_bounds = array<i64: 1, 1536>}, {pipeline_mode = #tpu.pipeline_mode<synchronous>, transform_indices = @transform_10, window_bounds = array<i64: 1536, 384>}, {pipeline_mode = #tpu.pipeline_mode<synchronous>, transform_indices = @transform_11, window_bounds = array<i64: 1, 384>}, {transform_indices = @transform_12, window_bounds = array<i64: 2, 8, 384>}]} {
    %c0 = arith.constant 0 : index
    %c0_0 = arith.constant 0 : index
    %c0_1 = arith.constant 0 : index
    %0 = vector.load %arg1[%c0, %c0_0, %c0_1] : memref<2x8x384xf32, #tpu.memory_space<vmem>>, vector<2x8x384xf32>
    %1 = vector.shape_cast %0 : vector<2x8x384xf32> to vector<16x384xf32>
    %c0_2 = arith.constant 0 : index
    %c0_3 = arith.constant 0 : index
    %2 = vector.load %arg2[%c0_2, %c0_3] : memref<1x384xf32, #tpu.memory_space<vmem>>, vector<1x384xf32>
    %3 = vector.shape_cast %2 : vector<1x384xf32> to vector<384xf32>
    %c0_4 = arith.constant 0 : index
    %c0_5 = arith.constant 0 : index
    %4 = vector.load %arg3[%c0_4, %c0_5] : memref<1x384xf32, #tpu.memory_space<vmem>>, vector<1x384xf32>
    %5 = vector.shape_cast %4 : vector<1x384xf32> to vector<384xf32>
    %cst = arith.constant dense<0.000000e+00> : vector<16xf32>
    %6 = vector.multi_reduction <add>, %1, %cst [1] : vector<16x384xf32> to vector<16xf32>
    %7 = vector.shape_cast %6 : vector<16xf32> to vector<16x1xf32>
    %cst_6 = arith.constant 3.840000e+02 : f32
    %8 = vector.broadcast %cst_6 : f32 to vector<16x1xf32>
    %9 = arith.divf %7, %8 : vector<16x1xf32>
    %10 = vector.broadcast %9 : vector<16x1xf32> to vector<16x384xf32>
    %11 = arith.subf %1, %10 : vector<16x384xf32>
    %12 = arith.mulf %11, %11 : vector<16x384xf32>
    %cst_7 = arith.constant dense<0.000000e+00> : vector<16xf32>
    %13 = vector.multi_reduction <add>, %12, %cst_7 [1] : vector<16x384xf32> to vector<16xf32>
    %14 = vector.shape_cast %13 : vector<16xf32> to vector<16x1xf32>
    %cst_8 = arith.constant 3.840000e+02 : f32
    %15 = vector.broadcast %cst_8 : f32 to vector<16x1xf32>
    %16 = arith.divf %14, %15 : vector<16x1xf32>
    %17 = vector.broadcast %9 : vector<16x1xf32> to vector<16x384xf32>
    %18 = arith.subf %1, %17 : vector<16x384xf32>
    %cst_9 = arith.constant 9.99999974E-6 : f32
    %19 = vector.broadcast %cst_9 : f32 to vector<16x1xf32>
    %20 = arith.addf %16, %19 : vector<16x1xf32>
    %21 = math.rsqrt %20 : vector<16x1xf32>
    %22 = vector.broadcast %21 : vector<16x1xf32> to vector<16x384xf32>
    %23 = arith.mulf %18, %22 : vector<16x384xf32>
    %24 = vector.shape_cast %3 : vector<384xf32> to vector<1x384xf32>
    %25 = vector.broadcast %24 : vector<1x384xf32> to vector<16x384xf32>
    %26 = arith.mulf %23, %25 : vector<16x384xf32>
    %27 = vector.shape_cast %5 : vector<384xf32> to vector<1x384xf32>
    %28 = vector.broadcast %27 : vector<1x384xf32> to vector<16x384xf32>
    %29 = arith.addf %26, %28 : vector<16x384xf32>
    %30 = arith.truncf %29 : vector<16x384xf32> to vector<16x384xbf16>
    %c0_10 = arith.constant 0 : index
    %c0_11 = arith.constant 0 : index
    %31 = vector.load %arg4[%c0_10, %c0_11] : memref<384x1152xbf16, #tpu.memory_space<vmem>>, vector<384x1152xbf16>
    %cst_12 = arith.constant dense<0.000000e+00> : vector<16x1152xf32>
    %32 = tpu.matmul %30, %31, %cst_12 {dimension_numbers = #tpu.dot_dimension_numbers<[1], [0], [0], [1], [0, 0, 1, 1], [], []>} : vector<16x384xbf16>, vector<384x1152xbf16>, vector<16x1152xf32> -> vector<16x1152xf32>
    %33 = vector.extract_strided_slice %32 {offsets = [0, 0], sizes = [16, 384], strides = [1, 1]} : vector<16x1152xf32> to vector<16x384xf32>
    %34 = vector.shape_cast %33 : vector<16x384xf32> to vector<2x8x384xf32>
    %35 = arith.truncf %34 : vector<2x8x384xf32> to vector<2x8x384xbf16>
    %36 = vector.extract_strided_slice %32 {offsets = [0, 384], sizes = [16, 384], strides = [1, 1]} : vector<16x1152xf32> to vector<16x384xf32>
    %37 = vector.shape_cast %36 : vector<16x384xf32> to vector<2x8x384xf32>
    %38 = arith.truncf %37 : vector<2x8x384xf32> to vector<2x8x384xbf16>
    %39 = vector.extract_strided_slice %32 {offsets = [0, 768], sizes = [16, 384], strides = [1, 1]} : vector<16x1152xf32> to vector<16x384xf32>
    %40 = vector.shape_cast %39 : vector<16x384xf32> to vector<2x8x384xf32>
    %41 = arith.truncf %40 : vector<2x8x384xf32> to vector<2x8x384xbf16>
    %42 = tpu.iota {dimensions = array<i32: 0>} : vector<8x8xi32>
    %43 = tpu.iota {dimensions = array<i32: 1>} : vector<8x8xi32>
    %44 = arith.cmpi sge, %42, %43 : vector<8x8xi32>
    %cst_13 = arith.constant 0.000000e+00 : f32
    %45 = vector.broadcast %cst_13 : f32 to vector<16x384xf32>
    %46 = vector.extract_strided_slice %35 {offsets = [0, 0, 0], sizes = [2, 8, 64], strides = [1, 1, 1]} : vector<2x8x384xbf16> to vector<2x8x64xbf16>
    %47 = vector.extract_strided_slice %38 {offsets = [0, 0, 0], sizes = [2, 8, 64], strides = [1, 1, 1]} : vector<2x8x384xbf16> to vector<2x8x64xbf16>
    %48 = vector.extract_strided_slice %41 {offsets = [0, 0, 0], sizes = [2, 8, 64], strides = [1, 1, 1]} : vector<2x8x384xbf16> to vector<2x8x64xbf16>
    "tpu.trace_start"() <{level = 10 : i32, message = "bqd,bkd->bqk"}> : () -> ()
    %cst_14 = arith.constant dense<0.000000e+00> : vector<2x8x8xf32>
    %49 = tpu.matmul %46, %47, %cst_14 {dimension_numbers = #tpu.dot_dimension_numbers<[2], [2], [1], [1], [0, 0, 0, 1, 1, 1], [0], [0]>} : vector<2x8x64xbf16>, vector<2x8x64xbf16>, vector<2x8x8xf32> -> vector<2x8x8xf32>
    %cst_15 = arith.constant -1.000000e+30 : f32
    "tpu.trace_stop"() : () -> ()
    %50 = vector.shape_cast %44 : vector<8x8xi1> to vector<1x8x8xi1>
    %51 = vector.broadcast %50 : vector<1x8x8xi1> to vector<2x8x8xi1>
    %52 = vector.broadcast %cst_15 : f32 to vector<2x8x8xf32>
    %53 = arith.select %51, %49, %52 : vector<2x8x8xi1>, vector<2x8x8xf32>
    %cst_16 = arith.constant dense<0xFF800000> : vector<2x8xf32>
    %54 = vector.multi_reduction <maximumf>, %53, %cst_16 [2] : vector<2x8x8xf32> to vector<2x8xf32>
    %55 = vector.shape_cast %54 : vector<2x8xf32> to vector<2x8x1xf32>
    %56 = vector.broadcast %55 : vector<2x8x1xf32> to vector<2x8x8xf32>
    %57 = arith.subf %53, %56 : vector<2x8x8xf32>
    %58 = math.exp %57 : vector<2x8x8xf32>
    %cst_17 = arith.constant dense<0.000000e+00> : vector<2x8xf32>
    %59 = vector.multi_reduction <add>, %58, %cst_17 [2] : vector<2x8x8xf32> to vector<2x8xf32>
    %60 = vector.shape_cast %59 : vector<2x8xf32> to vector<2x8x1xf32>
    %61 = tpu.reciprocal %60 {approx = true} : vector<2x8x1xf32> -> vector<2x8x1xf32>
    %62 = vector.broadcast %61 : vector<2x8x1xf32> to vector<2x8x8xf32>
    %63 = arith.mulf %58, %62 : vector<2x8x8xf32>
    %64 = arith.truncf %63 : vector<2x8x8xf32> to vector<2x8x8xbf16>
    "tpu.trace_start"() <{level = 10 : i32, message = "bqk,bkd->bqd"}> : () -> ()
    %cst_18 = arith.constant dense<0.000000e+00> : vector<2x8x64xf32>
    %65 = tpu.matmul %64, %48, %cst_18 {dimension_numbers = #tpu.dot_dimension_numbers<[2], [1], [1], [2], [0, 0, 0, 1, 1, 2], [0], [0]>} : vector<2x8x8xbf16>, vector<2x8x64xbf16>, vector<2x8x64xf32> -> vector<2x8x64xf32>
    "tpu.trace_stop"() : () -> ()
    %66 = vector.shape_cast %65 : vector<2x8x64xf32> to vector<16x64xf32>
    %67 = arith.truncf %66 : vector<16x64xf32> to vector<16x64xbf16>
    %c0_19 = arith.constant 0 : index
    %c0_20 = arith.constant 0 : index
    %68 = vector.load %arg5[%c0_19, %c0_20] : memref<384x384xbf16, #tpu.memory_space<vmem>>, vector<64x384xbf16>
    %cst_21 = arith.constant dense<0.000000e+00> : vector<16x384xf32>
    %69 = tpu.matmul %67, %68, %cst_21 {dimension_numbers = #tpu.dot_dimension_numbers<[1], [0], [0], [1], [0, 0, 1, 1], [], []>} : vector<16x64xbf16>, vector<64x384xbf16>, vector<16x384xf32> -> vector<16x384xf32>
    %70 = arith.addf %45, %69 : vector<16x384xf32>
    %71 = vector.extract_strided_slice %35 {offsets = [0, 0, 64], sizes = [2, 8, 64], strides = [1, 1, 1]} : vector<2x8x384xbf16> to vector<2x8x64xbf16>
    %72 = vector.extract_strided_slice %38 {offsets = [0, 0, 64], sizes = [2, 8, 64], strides = [1, 1, 1]} : vector<2x8x384xbf16> to vector<2x8x64xbf16>
    %73 = vector.extract_strided_slice %41 {offsets = [0, 0, 64], sizes = [2, 8, 64], strides = [1, 1, 1]} : vector<2x8x384xbf16> to vector<2x8x64xbf16>
    "tpu.trace_start"() <{level = 10 : i32, message = "bqd,bkd->bqk"}> : () -> ()
    %cst_22 = arith.constant dense<0.000000e+00> : vector<2x8x8xf32>
    %74 = tpu.matmul %71, %72, %cst_22 {dimension_numbers = #tpu.dot_dimension_numbers<[2], [2], [1], [1], [0, 0, 0, 1, 1, 1], [0], [0]>} : vector<2x8x64xbf16>, vector<2x8x64xbf16>, vector<2x8x8xf32> -> vector<2x8x8xf32>
    %cst_23 = arith.constant -1.000000e+30 : f32
    "tpu.trace_stop"() : () -> ()
    %75 = vector.shape_cast %44 : vector<8x8xi1> to vector<1x8x8xi1>
    %76 = vector.broadcast %75 : vector<1x8x8xi1> to vector<2x8x8xi1>
    %77 = vector.broadcast %cst_23 : f32 to vector<2x8x8xf32>
    %78 = arith.select %76, %74, %77 : vector<2x8x8xi1>, vector<2x8x8xf32>
    %cst_24 = arith.constant dense<0xFF800000> : vector<2x8xf32>
    %79 = vector.multi_reduction <maximumf>, %78, %cst_24 [2] : vector<2x8x8xf32> to vector<2x8xf32>
    %80 = vector.shape_cast %79 : vector<2x8xf32> to vector<2x8x1xf32>
    %81 = vector.broadcast %80 : vector<2x8x1xf32> to vector<2x8x8xf32>
    %82 = arith.subf %78, %81 : vector<2x8x8xf32>
    %83 = math.exp %82 : vector<2x8x8xf32>
    %cst_25 = arith.constant dense<0.000000e+00> : vector<2x8xf32>
    %84 = vector.multi_reduction <add>, %83, %cst_25 [2] : vector<2x8x8xf32> to vector<2x8xf32>
    %85 = vector.shape_cast %84 : vector<2x8xf32> to vector<2x8x1xf32>
    %86 = tpu.reciprocal %85 {approx = true} : vector<2x8x1xf32> -> vector<2x8x1xf32>
    %87 = vector.broadcast %86 : vector<2x8x1xf32> to vector<2x8x8xf32>
    %88 = arith.mulf %83, %87 : vector<2x8x8xf32>
    %89 = arith.truncf %88 : vector<2x8x8xf32> to vector<2x8x8xbf16>
    "tpu.trace_start"() <{level = 10 : i32, message = "bqk,bkd->bqd"}> : () -> ()
    %cst_26 = arith.constant dense<0.000000e+00> : vector<2x8x64xf32>
    %90 = tpu.matmul %89, %73, %cst_26 {dimension_numbers = #tpu.dot_dimension_numbers<[2], [1], [1], [2], [0, 0, 0, 1, 1, 2], [0], [0]>} : vector<2x8x8xbf16>, vector<2x8x64xbf16>, vector<2x8x64xf32> -> vector<2x8x64xf32>
    "tpu.trace_stop"() : () -> ()
    %91 = vector.shape_cast %90 : vector<2x8x64xf32> to vector<16x64xf32>
    %92 = arith.truncf %91 : vector<16x64xf32> to vector<16x64xbf16>
    %c64 = arith.constant 64 : index
    %c0_27 = arith.constant 0 : index
    %93 = vector.load %arg5[%c64, %c0_27] : memref<384x384xbf16, #tpu.memory_space<vmem>>, vector<64x384xbf16>
    %cst_28 = arith.constant dense<0.000000e+00> : vector<16x384xf32>
    %94 = tpu.matmul %92, %93, %cst_28 {dimension_numbers = #tpu.dot_dimension_numbers<[1], [0], [0], [1], [0, 0, 1, 1], [], []>} : vector<16x64xbf16>, vector<64x384xbf16>, vector<16x384xf32> -> vector<16x384xf32>
    %95 = arith.addf %70, %94 : vector<16x384xf32>
    %96 = vector.extract_strided_slice %35 {offsets = [0, 0, 128], sizes = [2, 8, 64], strides = [1, 1, 1]} : vector<2x8x384xbf16> to vector<2x8x64xbf16>
    %97 = vector.extract_strided_slice %38 {offsets = [0, 0, 128], sizes = [2, 8, 64], strides = [1, 1, 1]} : vector<2x8x384xbf16> to vector<2x8x64xbf16>
    %98 = vector.extract_strided_slice %41 {offsets = [0, 0, 128], sizes = [2, 8, 64], strides = [1, 1, 1]} : vector<2x8x384xbf16> to vector<2x8x64xbf16>
    "tpu.trace_start"() <{level = 10 : i32, message = "bqd,bkd->bqk"}> : () -> ()
    %cst_29 = arith.constant dense<0.000000e+00> : vector<2x8x8xf32>
    %99 = tpu.matmul %96, %97, %cst_29 {dimension_numbers = #tpu.dot_dimension_numbers<[2], [2], [1], [1], [0, 0, 0, 1, 1, 1], [0], [0]>} : vector<2x8x64xbf16>, vector<2x8x64xbf16>, vector<2x8x8xf32> -> vector<2x8x8xf32>
    %cst_30 = arith.constant -1.000000e+30 : f32
    "tpu.trace_stop"() : () -> ()
    %100 = vector.shape_cast %44 : vector<8x8xi1> to vector<1x8x8xi1>
    %101 = vector.broadcast %100 : vector<1x8x8xi1> to vector<2x8x8xi1>
    %102 = vector.broadcast %cst_30 : f32 to vector<2x8x8xf32>
    %103 = arith.select %101, %99, %102 : vector<2x8x8xi1>, vector<2x8x8xf32>
    %cst_31 = arith.constant dense<0xFF800000> : vector<2x8xf32>
    %104 = vector.multi_reduction <maximumf>, %103, %cst_31 [2] : vector<2x8x8xf32> to vector<2x8xf32>
    %105 = vector.shape_cast %104 : vector<2x8xf32> to vector<2x8x1xf32>
    %106 = vector.broadcast %105 : vector<2x8x1xf32> to vector<2x8x8xf32>
    %107 = arith.subf %103, %106 : vector<2x8x8xf32>
    %108 = math.exp %107 : vector<2x8x8xf32>
    %cst_32 = arith.constant dense<0.000000e+00> : vector<2x8xf32>
    %109 = vector.multi_reduction <add>, %108, %cst_32 [2] : vector<2x8x8xf32> to vector<2x8xf32>
    %110 = vector.shape_cast %109 : vector<2x8xf32> to vector<2x8x1xf32>
    %111 = tpu.reciprocal %110 {approx = true} : vector<2x8x1xf32> -> vector<2x8x1xf32>
    %112 = vector.broadcast %111 : vector<2x8x1xf32> to vector<2x8x8xf32>
    %113 = arith.mulf %108, %112 : vector<2x8x8xf32>
    %114 = arith.truncf %113 : vector<2x8x8xf32> to vector<2x8x8xbf16>
    "tpu.trace_start"() <{level = 10 : i32, message = "bqk,bkd->bqd"}> : () -> ()
    %cst_33 = arith.constant dense<0.000000e+00> : vector<2x8x64xf32>
    %115 = tpu.matmul %114, %98, %cst_33 {dimension_numbers = #tpu.dot_dimension_numbers<[2], [1], [1], [2], [0, 0, 0, 1, 1, 2], [0], [0]>} : vector<2x8x8xbf16>, vector<2x8x64xbf16>, vector<2x8x64xf32> -> vector<2x8x64xf32>
    "tpu.trace_stop"() : () -> ()
    %116 = vector.shape_cast %115 : vector<2x8x64xf32> to vector<16x64xf32>
    %117 = arith.truncf %116 : vector<16x64xf32> to vector<16x64xbf16>
    %c128 = arith.constant 128 : index
    %c0_34 = arith.constant 0 : index
    %118 = vector.load %arg5[%c128, %c0_34] : memref<384x384xbf16, #tpu.memory_space<vmem>>, vector<64x384xbf16>
    %cst_35 = arith.constant dense<0.000000e+00> : vector<16x384xf32>
    %119 = tpu.matmul %117, %118, %cst_35 {dimension_numbers = #tpu.dot_dimension_numbers<[1], [0], [0], [1], [0, 0, 1, 1], [], []>} : vector<16x64xbf16>, vector<64x384xbf16>, vector<16x384xf32> -> vector<16x384xf32>
    %120 = arith.addf %95, %119 : vector<16x384xf32>
    %121 = vector.extract_strided_slice %35 {offsets = [0, 0, 192], sizes = [2, 8, 64], strides = [1, 1, 1]} : vector<2x8x384xbf16> to vector<2x8x64xbf16>
    %122 = vector.extract_strided_slice %38 {offsets = [0, 0, 192], sizes = [2, 8, 64], strides = [1, 1, 1]} : vector<2x8x384xbf16> to vector<2x8x64xbf16>
    %123 = vector.extract_strided_slice %41 {offsets = [0, 0, 192], sizes = [2, 8, 64], strides = [1, 1, 1]} : vector<2x8x384xbf16> to vector<2x8x64xbf16>
    "tpu.trace_start"() <{level = 10 : i32, message = "bqd,bkd->bqk"}> : () -> ()
    %cst_36 = arith.constant dense<0.000000e+00> : vector<2x8x8xf32>
    %124 = tpu.matmul %121, %122, %cst_36 {dimension_numbers = #tpu.dot_dimension_numbers<[2], [2], [1], [1], [0, 0, 0, 1, 1, 1], [0], [0]>} : vector<2x8x64xbf16>, vector<2x8x64xbf16>, vector<2x8x8xf32> -> vector<2x8x8xf32>
    %cst_37 = arith.constant -1.000000e+30 : f32
    "tpu.trace_stop"() : () -> ()
    %125 = vector.shape_cast %44 : vector<8x8xi1> to vector<1x8x8xi1>
    %126 = vector.broadcast %125 : vector<1x8x8xi1> to vector<2x8x8xi1>
    %127 = vector.broadcast %cst_37 : f32 to vector<2x8x8xf32>
    %128 = arith.select %126, %124, %127 : vector<2x8x8xi1>, vector<2x8x8xf32>
    %cst_38 = arith.constant dense<0xFF800000> : vector<2x8xf32>
    %129 = vector.multi_reduction <maximumf>, %128, %cst_38 [2] : vector<2x8x8xf32> to vector<2x8xf32>
    %130 = vector.shape_cast %129 : vector<2x8xf32> to vector<2x8x1xf32>
    %131 = vector.broadcast %130 : vector<2x8x1xf32> to vector<2x8x8xf32>
    %132 = arith.subf %128, %131 : vector<2x8x8xf32>
    %133 = math.exp %132 : vector<2x8x8xf32>
    %cst_39 = arith.constant dense<0.000000e+00> : vector<2x8xf32>
    %134 = vector.multi_reduction <add>, %133, %cst_39 [2] : vector<2x8x8xf32> to vector<2x8xf32>
    %135 = vector.shape_cast %134 : vector<2x8xf32> to vector<2x8x1xf32>
    %136 = tpu.reciprocal %135 {approx = true} : vector<2x8x1xf32> -> vector<2x8x1xf32>
    %137 = vector.broadcast %136 : vector<2x8x1xf32> to vector<2x8x8xf32>
    %138 = arith.mulf %133, %137 : vector<2x8x8xf32>
    %139 = arith.truncf %138 : vector<2x8x8xf32> to vector<2x8x8xbf16>
    "tpu.trace_start"() <{level = 10 : i32, message = "bqk,bkd->bqd"}> : () -> ()
    %cst_40 = arith.constant dense<0.000000e+00> : vector<2x8x64xf32>
    %140 = tpu.matmul %139, %123, %cst_40 {dimension_numbers = #tpu.dot_dimension_numbers<[2], [1], [1], [2], [0, 0, 0, 1, 1, 2], [0], [0]>} : vector<2x8x8xbf16>, vector<2x8x64xbf16>, vector<2x8x64xf32> -> vector<2x8x64xf32>
    "tpu.trace_stop"() : () -> ()
    %141 = vector.shape_cast %140 : vector<2x8x64xf32> to vector<16x64xf32>
    %142 = arith.truncf %141 : vector<16x64xf32> to vector<16x64xbf16>
    %c192 = arith.constant 192 : index
    %c0_41 = arith.constant 0 : index
    %143 = vector.load %arg5[%c192, %c0_41] : memref<384x384xbf16, #tpu.memory_space<vmem>>, vector<64x384xbf16>
    %cst_42 = arith.constant dense<0.000000e+00> : vector<16x384xf32>
    %144 = tpu.matmul %142, %143, %cst_42 {dimension_numbers = #tpu.dot_dimension_numbers<[1], [0], [0], [1], [0, 0, 1, 1], [], []>} : vector<16x64xbf16>, vector<64x384xbf16>, vector<16x384xf32> -> vector<16x384xf32>
    %145 = arith.addf %120, %144 : vector<16x384xf32>
    %146 = vector.extract_strided_slice %35 {offsets = [0, 0, 256], sizes = [2, 8, 64], strides = [1, 1, 1]} : vector<2x8x384xbf16> to vector<2x8x64xbf16>
    %147 = vector.extract_strided_slice %38 {offsets = [0, 0, 256], sizes = [2, 8, 64], strides = [1, 1, 1]} : vector<2x8x384xbf16> to vector<2x8x64xbf16>
    %148 = vector.extract_strided_slice %41 {offsets = [0, 0, 256], sizes = [2, 8, 64], strides = [1, 1, 1]} : vector<2x8x384xbf16> to vector<2x8x64xbf16>
    "tpu.trace_start"() <{level = 10 : i32, message = "bqd,bkd->bqk"}> : () -> ()
    %cst_43 = arith.constant dense<0.000000e+00> : vector<2x8x8xf32>
    %149 = tpu.matmul %146, %147, %cst_43 {dimension_numbers = #tpu.dot_dimension_numbers<[2], [2], [1], [1], [0, 0, 0, 1, 1, 1], [0], [0]>} : vector<2x8x64xbf16>, vector<2x8x64xbf16>, vector<2x8x8xf32> -> vector<2x8x8xf32>
    %cst_44 = arith.constant -1.000000e+30 : f32
    "tpu.trace_stop"() : () -> ()
    %150 = vector.shape_cast %44 : vector<8x8xi1> to vector<1x8x8xi1>
    %151 = vector.broadcast %150 : vector<1x8x8xi1> to vector<2x8x8xi1>
    %152 = vector.broadcast %cst_44 : f32 to vector<2x8x8xf32>
    %153 = arith.select %151, %149, %152 : vector<2x8x8xi1>, vector<2x8x8xf32>
    %cst_45 = arith.constant dense<0xFF800000> : vector<2x8xf32>
    %154 = vector.multi_reduction <maximumf>, %153, %cst_45 [2] : vector<2x8x8xf32> to vector<2x8xf32>
    %155 = vector.shape_cast %154 : vector<2x8xf32> to vector<2x8x1xf32>
    %156 = vector.broadcast %155 : vector<2x8x1xf32> to vector<2x8x8xf32>
    %157 = arith.subf %153, %156 : vector<2x8x8xf32>
    %158 = math.exp %157 : vector<2x8x8xf32>
    %cst_46 = arith.constant dense<0.000000e+00> : vector<2x8xf32>
    %159 = vector.multi_reduction <add>, %158, %cst_46 [2] : vector<2x8x8xf32> to vector<2x8xf32>
    %160 = vector.shape_cast %159 : vector<2x8xf32> to vector<2x8x1xf32>
    %161 = tpu.reciprocal %160 {approx = true} : vector<2x8x1xf32> -> vector<2x8x1xf32>
    %162 = vector.broadcast %161 : vector<2x8x1xf32> to vector<2x8x8xf32>
    %163 = arith.mulf %158, %162 : vector<2x8x8xf32>
    %164 = arith.truncf %163 : vector<2x8x8xf32> to vector<2x8x8xbf16>
    "tpu.trace_start"() <{level = 10 : i32, message = "bqk,bkd->bqd"}> : () -> ()
    %cst_47 = arith.constant dense<0.000000e+00> : vector<2x8x64xf32>
    %165 = tpu.matmul %164, %148, %cst_47 {dimension_numbers = #tpu.dot_dimension_numbers<[2], [1], [1], [2], [0, 0, 0, 1, 1, 2], [0], [0]>} : vector<2x8x8xbf16>, vector<2x8x64xbf16>, vector<2x8x64xf32> -> vector<2x8x64xf32>
    "tpu.trace_stop"() : () -> ()
    %166 = vector.shape_cast %165 : vector<2x8x64xf32> to vector<16x64xf32>
    %167 = arith.truncf %166 : vector<16x64xf32> to vector<16x64xbf16>
    %c256 = arith.constant 256 : index
    %c0_48 = arith.constant 0 : index
    %168 = vector.load %arg5[%c256, %c0_48] : memref<384x384xbf16, #tpu.memory_space<vmem>>, vector<64x384xbf16>
    %cst_49 = arith.constant dense<0.000000e+00> : vector<16x384xf32>
    %169 = tpu.matmul %167, %168, %cst_49 {dimension_numbers = #tpu.dot_dimension_numbers<[1], [0], [0], [1], [0, 0, 1, 1], [], []>} : vector<16x64xbf16>, vector<64x384xbf16>, vector<16x384xf32> -> vector<16x384xf32>
    %170 = arith.addf %145, %169 : vector<16x384xf32>
    %171 = vector.extract_strided_slice %35 {offsets = [0, 0, 320], sizes = [2, 8, 64], strides = [1, 1, 1]} : vector<2x8x384xbf16> to vector<2x8x64xbf16>
    %172 = vector.extract_strided_slice %38 {offsets = [0, 0, 320], sizes = [2, 8, 64], strides = [1, 1, 1]} : vector<2x8x384xbf16> to vector<2x8x64xbf16>
    %173 = vector.extract_strided_slice %41 {offsets = [0, 0, 320], sizes = [2, 8, 64], strides = [1, 1, 1]} : vector<2x8x384xbf16> to vector<2x8x64xbf16>
    "tpu.trace_start"() <{level = 10 : i32, message = "bqd,bkd->bqk"}> : () -> ()
    %cst_50 = arith.constant dense<0.000000e+00> : vector<2x8x8xf32>
    %174 = tpu.matmul %171, %172, %cst_50 {dimension_numbers = #tpu.dot_dimension_numbers<[2], [2], [1], [1], [0, 0, 0, 1, 1, 1], [0], [0]>} : vector<2x8x64xbf16>, vector<2x8x64xbf16>, vector<2x8x8xf32> -> vector<2x8x8xf32>
    %cst_51 = arith.constant -1.000000e+30 : f32
    "tpu.trace_stop"() : () -> ()
    %175 = vector.shape_cast %44 : vector<8x8xi1> to vector<1x8x8xi1>
    %176 = vector.broadcast %175 : vector<1x8x8xi1> to vector<2x8x8xi1>
    %177 = vector.broadcast %cst_51 : f32 to vector<2x8x8xf32>
    %178 = arith.select %176, %174, %177 : vector<2x8x8xi1>, vector<2x8x8xf32>
    %cst_52 = arith.constant dense<0xFF800000> : vector<2x8xf32>
    %179 = vector.multi_reduction <maximumf>, %178, %cst_52 [2] : vector<2x8x8xf32> to vector<2x8xf32>
    %180 = vector.shape_cast %179 : vector<2x8xf32> to vector<2x8x1xf32>
    %181 = vector.broadcast %180 : vector<2x8x1xf32> to vector<2x8x8xf32>
    %182 = arith.subf %178, %181 : vector<2x8x8xf32>
    %183 = math.exp %182 : vector<2x8x8xf32>
    %cst_53 = arith.constant dense<0.000000e+00> : vector<2x8xf32>
    %184 = vector.multi_reduction <add>, %183, %cst_53 [2] : vector<2x8x8xf32> to vector<2x8xf32>
    %185 = vector.shape_cast %184 : vector<2x8xf32> to vector<2x8x1xf32>
    %186 = tpu.reciprocal %185 {approx = true} : vector<2x8x1xf32> -> vector<2x8x1xf32>
    %187 = vector.broadcast %186 : vector<2x8x1xf32> to vector<2x8x8xf32>
    %188 = arith.mulf %183, %187 : vector<2x8x8xf32>
    %189 = arith.truncf %188 : vector<2x8x8xf32> to vector<2x8x8xbf16>
    "tpu.trace_start"() <{level = 10 : i32, message = "bqk,bkd->bqd"}> : () -> ()
    %cst_54 = arith.constant dense<0.000000e+00> : vector<2x8x64xf32>
    %190 = tpu.matmul %189, %173, %cst_54 {dimension_numbers = #tpu.dot_dimension_numbers<[2], [1], [1], [2], [0, 0, 0, 1, 1, 2], [0], [0]>} : vector<2x8x8xbf16>, vector<2x8x64xbf16>, vector<2x8x64xf32> -> vector<2x8x64xf32>
    "tpu.trace_stop"() : () -> ()
    %191 = vector.shape_cast %190 : vector<2x8x64xf32> to vector<16x64xf32>
    %192 = arith.truncf %191 : vector<16x64xf32> to vector<16x64xbf16>
    %c320 = arith.constant 320 : index
    %c0_55 = arith.constant 0 : index
    %193 = vector.load %arg5[%c320, %c0_55] : memref<384x384xbf16, #tpu.memory_space<vmem>>, vector<64x384xbf16>
    %cst_56 = arith.constant dense<0.000000e+00> : vector<16x384xf32>
    %194 = tpu.matmul %192, %193, %cst_56 {dimension_numbers = #tpu.dot_dimension_numbers<[1], [0], [0], [1], [0, 0, 1, 1], [], []>} : vector<16x64xbf16>, vector<64x384xbf16>, vector<16x384xf32> -> vector<16x384xf32>
    %195 = arith.addf %170, %194 : vector<16x384xf32>
    %196 = arith.addf %1, %195 : vector<16x384xf32>
    %c0_57 = arith.constant 0 : index
    %c0_58 = arith.constant 0 : index
    %197 = vector.load %arg6[%c0_57, %c0_58] : memref<1x384xf32, #tpu.memory_space<vmem>>, vector<1x384xf32>
    %198 = vector.shape_cast %197 : vector<1x384xf32> to vector<384xf32>
    %199 = vector.shape_cast %198 : vector<384xf32> to vector<1x384xf32>
    %200 = vector.broadcast %199 : vector<1x384xf32> to vector<16x384xf32>
    %201 = arith.addf %196, %200 : vector<16x384xf32>
    %c0_59 = arith.constant 0 : index
    %c0_60 = arith.constant 0 : index
    %202 = vector.load %arg7[%c0_59, %c0_60] : memref<1x384xf32, #tpu.memory_space<vmem>>, vector<1x384xf32>
    %203 = vector.shape_cast %202 : vector<1x384xf32> to vector<384xf32>
    %c0_61 = arith.constant 0 : index
    %c0_62 = arith.constant 0 : index
    %204 = vector.load %arg8[%c0_61, %c0_62] : memref<1x384xf32, #tpu.memory_space<vmem>>, vector<1x384xf32>
    %205 = vector.shape_cast %204 : vector<1x384xf32> to vector<384xf32>
    %cst_63 = arith.constant dense<0.000000e+00> : vector<16xf32>
    %206 = vector.multi_reduction <add>, %201, %cst_63 [1] : vector<16x384xf32> to vector<16xf32>
    %207 = vector.shape_cast %206 : vector<16xf32> to vector<16x1xf32>
    %cst_64 = arith.constant 3.840000e+02 : f32
    %208 = vector.broadcast %cst_64 : f32 to vector<16x1xf32>
    %209 = arith.divf %207, %208 : vector<16x1xf32>
    %210 = vector.broadcast %209 : vector<16x1xf32> to vector<16x384xf32>
    %211 = arith.subf %201, %210 : vector<16x384xf32>
    %212 = arith.mulf %211, %211 : vector<16x384xf32>
    %cst_65 = arith.constant dense<0.000000e+00> : vector<16xf32>
    %213 = vector.multi_reduction <add>, %212, %cst_65 [1] : vector<16x384xf32> to vector<16xf32>
    %214 = vector.shape_cast %213 : vector<16xf32> to vector<16x1xf32>
    %cst_66 = arith.constant 3.840000e+02 : f32
    %215 = vector.broadcast %cst_66 : f32 to vector<16x1xf32>
    %216 = arith.divf %214, %215 : vector<16x1xf32>
    %217 = vector.broadcast %209 : vector<16x1xf32> to vector<16x384xf32>
    %218 = arith.subf %201, %217 : vector<16x384xf32>
    %cst_67 = arith.constant 9.99999974E-6 : f32
    %219 = vector.broadcast %cst_67 : f32 to vector<16x1xf32>
    %220 = arith.addf %216, %219 : vector<16x1xf32>
    %221 = math.rsqrt %220 : vector<16x1xf32>
    %222 = vector.broadcast %221 : vector<16x1xf32> to vector<16x384xf32>
    %223 = arith.mulf %218, %222 : vector<16x384xf32>
    %224 = vector.shape_cast %203 : vector<384xf32> to vector<1x384xf32>
    %225 = vector.broadcast %224 : vector<1x384xf32> to vector<16x384xf32>
    %226 = arith.mulf %223, %225 : vector<16x384xf32>
    %227 = vector.shape_cast %205 : vector<384xf32> to vector<1x384xf32>
    %228 = vector.broadcast %227 : vector<1x384xf32> to vector<16x384xf32>
    %229 = arith.addf %226, %228 : vector<16x384xf32>
    %230 = arith.truncf %229 : vector<16x384xf32> to vector<16x384xbf16>
    %c0_68 = arith.constant 0 : index
    %c0_69 = arith.constant 0 : index
    %231 = vector.load %arg9[%c0_68, %c0_69] : memref<384x1536xbf16, #tpu.memory_space<vmem>>, vector<384x1536xbf16>
    %cst_70 = arith.constant dense<0.000000e+00> : vector<16x1536xf32>
    %232 = tpu.matmul %230, %231, %cst_70 {dimension_numbers = #tpu.dot_dimension_numbers<[1], [0], [0], [1], [0, 0, 1, 1], [], []>} : vector<16x384xbf16>, vector<384x1536xbf16>, vector<16x1536xf32> -> vector<16x1536xf32>
    %c0_71 = arith.constant 0 : index
    %c0_72 = arith.constant 0 : index
    %233 = vector.load %arg10[%c0_71, %c0_72] : memref<1x1536xf32, #tpu.memory_space<vmem>>, vector<1x1536xf32>
    %234 = vector.shape_cast %233 : vector<1x1536xf32> to vector<1536xf32>
    %235 = vector.shape_cast %234 : vector<1536xf32> to vector<1x1536xf32>
    %236 = vector.broadcast %235 : vector<1x1536xf32> to vector<16x1536xf32>
    %237 = arith.addf %232, %236 : vector<16x1536xf32>
    %cst_73 = arith.constant 0.000000e+00 : f32
    %238 = vector.broadcast %cst_73 : f32 to vector<16x1536xf32>
    %239 = arith.maximumf %237, %238 : vector<16x1536xf32>
    %240 = arith.truncf %239 : vector<16x1536xf32> to vector<16x1536xbf16>
    %c0_74 = arith.constant 0 : index
    %c0_75 = arith.constant 0 : index
    %241 = vector.load %arg11[%c0_74, %c0_75] : memref<1536x384xbf16, #tpu.memory_space<vmem>>, vector<1536x384xbf16>
    %cst_76 = arith.constant dense<0.000000e+00> : vector<16x384xf32>
    %242 = tpu.matmul %240, %241, %cst_76 {dimension_numbers = #tpu.dot_dimension_numbers<[1], [0], [0], [1], [0, 0, 1, 1], [], []>} : vector<16x1536xbf16>, vector<1536x384xbf16>, vector<16x384xf32> -> vector<16x384xf32>
    %c0_77 = arith.constant 0 : index
    %c0_78 = arith.constant 0 : index
    %243 = vector.load %arg12[%c0_77, %c0_78] : memref<1x384xf32, #tpu.memory_space<vmem>>, vector<1x384xf32>
    %244 = vector.shape_cast %243 : vector<1x384xf32> to vector<384xf32>
    %245 = vector.shape_cast %244 : vector<384xf32> to vector<1x384xf32>
    %246 = vector.broadcast %245 : vector<1x384xf32> to vector<16x384xf32>
    %247 = arith.addf %242, %246 : vector<16x384xf32>
    %248 = arith.addf %201, %247 : vector<16x384xf32>
    %249 = vector.shape_cast %248 : vector<16x384xf32> to vector<2x8x384xf32>
    %c0_79 = arith.constant 0 : index
    %c0_80 = arith.constant 0 : index
    %c0_81 = arith.constant 0 : index
    %250 = vector.load %arg13[%c0_79, %c0_80, %c0_81] : memref<2x8x384xf32, #tpu.memory_space<vmem>>, vector<2x8x384xf32>
    tpu.vector_store %arg13[%c0_79, %c0_80, %c0_81], %249 {strides = array<i32>} : memref<2x8x384xf32, #tpu.memory_space<vmem>>, vector<2x8x384xf32>,
    return
  }
  func.func @transform_0(%arg0: i32) -> (i32, i32, i32) {
    %c0_i32 = arith.constant 0 : i32
    %c0_i32_0 = arith.constant 0 : i32
    %c0_i32_1 = arith.constant 0 : i32
    return %arg0, %c0_i32, %c0_i32_0 : i32, i32, i32
  }
  func.func @transform_1(%arg0: i32) -> (i32, i32) {
    %c0_i32 = arith.constant 0 : i32
    %c0_i32_0 = arith.constant 0 : i32
    %c0_i32_1 = arith.constant 0 : i32
    return %c0_i32, %c0_i32_0 : i32, i32
  }
  func.func @transform_2(%arg0: i32) -> (i32, i32) {
    %c0_i32 = arith.constant 0 : i32
    %c0_i32_0 = arith.constant 0 : i32
    %c0_i32_1 = arith.constant 0 : i32
    return %c0_i32, %c0_i32_0 : i32, i32
  }
  func.func @transform_3(%arg0: i32) -> (i32, i32) {
    %c0_i32 = arith.constant 0 : i32
    %c0_i32_0 = arith.constant 0 : i32
    %c0_i32_1 = arith.constant 0 : i32
    return %c0_i32, %c0_i32_0 : i32, i32
  }
  func.func @transform_4(%arg0: i32) -> (i32, i32) {
    %c0_i32 = arith.constant 0 : i32
    %c0_i32_0 = arith.constant 0 : i32
    %c0_i32_1 = arith.constant 0 : i32
    return %c0_i32, %c0_i32_0 : i32, i32
  }
  func.func @transform_5(%arg0: i32) -> (i32, i32) {
    %c0_i32 = arith.constant 0 : i32
    %c0_i32_0 = arith.constant 0 : i32
    %c0_i32_1 = arith.constant 0 : i32
    return %c0_i32, %c0_i32_0 : i32, i32
  }
  func.func @transform_6(%arg0: i32) -> (i32, i32) {
    %c0_i32 = arith.constant 0 : i32
    %c0_i32_0 = arith.constant 0 : i32
    %c0_i32_1 = arith.constant 0 : i32
    return %c0_i32, %c0_i32_0 : i32, i32
  }
  func.func @transform_7(%arg0: i32) -> (i32, i32) {
    %c0_i32 = arith.constant 0 : i32
    %c0_i32_0 = arith.constant 0 : i32
    %c0_i32_1 = arith.constant 0 : i32
    return %c0_i32, %c0_i32_0 : i32, i32
  }
  func.func @transform_8(%arg0: i32) -> (i32, i32) {
    %c0_i32 = arith.constant 0 : i32
    %c0_i32_0 = arith.constant 0 : i32
    %c0_i32_1 = arith.constant 0 : i32
    return %c0_i32, %c0_i32_0 : i32, i32
  }
  func.func @transform_9(%arg0: i32) -> (i32, i32) {
    %c0_i32 = arith.constant 0 : i32
    %c0_i32_0 = arith.constant 0 : i32
    %c0_i32_1 = arith.constant 0 : i32
    return %c0_i32, %c0_i32_0 : i32, i32
  }
  func.func @transform_10(%arg0: i32) -> (i32, i32) {
    %c0_i32 = arith.constant 0 : i32
    %c0_i32_0 = arith.constant 0 : i32
    %c0_i32_1 = arith.constant 0 : i32
    return %c0_i32, %c0_i32_0 : i32, i32
  }
  func.func @transform_11(%arg0: i32) -> (i32, i32) {
    %c0_i32 = arith.constant 0 : i32
    %c0_i32_0 = arith.constant 0 : i32
    %c0_i32_1 = arith.constant 0 : i32
    return %c0_i32, %c0_i32_0 : i32, i32
  }
  func.func @transform_12(%arg0: i32) -> (i32, i32, i32) {
    %c0_i32 = arith.constant 0 : i32
    %c0_i32_0 = arith.constant 0 : i32
    %c0_i32_1 = arith.constant 0 : i32
    return %arg0, %c0_i32, %c0_i32_0 : i32, i32, i32
  }
}

</mosaic_0001>

<bundles_post_ra>
// kernel: tpu_custom_call.1
= control target key start
LH: loop header
LB: loop body
LE: loop exit
PB: predicated region body
PF: predicated region fallthrough
CT: control target
= control target key end

     0   :  { %17 = vsyncpa [#allocation3], 0  ;;  %s13205_s0 = inlined_call_operand.hbm [shape: f32[2,8,384], index: 0, kind: input, shape index: {}]   ;;  %s13206_s1 = inlined_call_operand.hbm [shape: f32[1,384], index: 1, kind: input, shape index: {}]   ;;  %s13207_s2 = inlined_call_operand.hbm [shape: f32[1,384], index: 2, kind: input, shape index: {}]   ;;  %s13208_s3 = inlined_call_operand.hbm [shape: bf16[384,1152], index: 3, kind: input, shape index: {}]   ;;  %s13209_s4 = inlined_call_operand.hbm [shape: bf16[384,384], index: 4, kind: input, shape index: {}]   ;;  %s13210_s5 = inlined_call_operand.hbm [shape: f32[1,384], index: 5, kind: input, shape index: {}]   ;;  %s13211_s6 = inlined_call_operand.hbm [shape: f32[1,384], index: 6, kind: input, shape index: {}]   ;;  %s13212_s7 = inlined_call_operand.hbm [shape: f32[1,384], index: 7, kind: input, shape index: {}]   ;;  %s13213_s8 = inlined_call_operand.hbm [shape: bf16[384,1536], index: 8, kind: input, shape index: {}]   ;;  %s13214_s9 = inlined_call_operand.hbm [shape: f32[1,1536], index: 9, kind: input, shape index: {}]   ;;  %s13215_s10 = inlined_call_operand.hbm [shape: bf16[1536,384], index: 10, kind: input, shape index: {}]   ;;  %s13216_s11 = inlined_call_operand.hbm [shape: f32[1,384], index: 11, kind: input, shape index: {}]   ;;  %s13217_s12 = inlined_call_operand.hbm [shape: f32[2,8,384], index: 12, kind: output, shape index: {}]  }
   0x1   :  { %18 = vsyncpa [#allocation6], 0 }
   0x2   :  { %19 = vsyncpa [#allocation9], 0 }
   0x3   :  { %20 = vsyncpa [#allocation12], 0 }
   0x4   :  { %21 = vsyncpa [#allocation15], 0 }
   0x5   :  { %22 = vsyncpa [#allocation18], 0 }
   0x6   :  { %23 = vsyncpa [#allocation21], 0 }
   0x7   :  { %24 = vsyncpa [#allocation4], 0  ;;  %s12338_s21 = smov [#allocation5]   ;;  %s12339_s23 = smov [#allocation8]  }
   0x8   :  { %s43_s22 = sshll.u32 %s12338_s21, 4  ;;  %s62_s24 = sshll.u32 %s12339_s23, 4  ;;  %s44_s22 = int_to_ptr.vmem [resolvable:$true] %s43_s22  ;;  %s63_s24 = int_to_ptr.vmem [resolvable:$true] %s62_s24 }
   0x9   :  { %s12070_s25 = scalar_lea.vmem %s44_s22, 48  ;;  %s12074_s26 = scalar_lea.vmem %s44_s22, 64 }
   0xa   :  { %p12071_p0 = scmp.ne.s32.totalorder %s44_s22, %s12070_s25  ;;  %p12075_p1 = scmp.lt.s32.totalorder %s44_s22, %s44_s22 }
   0xb   :  { %p12076_p2 = scmp.lt.s32.totalorder %s12074_s26, %s12070_s25 }
   0xd   :  { %p12077_p3 = por %p12076_p2, %p12075_p1 }
   0xf   :  { %p12078_p4 = pnand %p12077_p3, %p12071_p0 }
  0x11   :  { %12081 = shalt.err (!%p12078_p4)
}
  0x12   :  { %46 = dma.hbm_to_vmem [thread:$0]  %s13206_s1, 48, %s44_s22, [#allocation6]  }
  0x13   :  { %s12090_s29 = scalar_lea.vmem %s63_s24, 27648  ;;  %p12095_p6 = scmp.lt.s32.totalorder %s63_s24, %s63_s24 }
  0x14   :  { %p12091_p5 = scmp.ne.s32.totalorder %s63_s24, %s12090_s29  ;;  %p12096_p7 = scmp.lt.s32.totalorder %s12090_s29, %s12090_s29 }
  0x16   :  { %p12097_p8 = por %p12096_p7, %p12095_p6 }
  0x18   :  { %p12098_p9 = pnand %p12097_p8, %p12091_p5 }
  0x1a   :  { %12101 = shalt.err (!%p12098_p9)
}
  0x1b   :  { %s12340_s30 = smov 576   ;;  %s12341_s13 = smov 36  }
  0x1c   :  { %68 = dma.hbm_to_vmem [thread:$0]  %s13208_s3, 27648, %s63_s24, [#allocation9], %s12340_s30, %s12340_s30, %s12341_s13  }
  0x1d   :  { %s12342_s16 = smov [#allocation11]   ;;  %s12343_s18 = smov [#allocation14]  }
  0x1e   :  { %s87_s17 = sshll.u32 %s12342_s16, 4  ;;  %s107_s19 = sshll.u32 %s12343_s18, 4  ;;  %s88_s17 = int_to_ptr.vmem [resolvable:$true] %s87_s17  ;;  %s108_s19 = int_to_ptr.vmem [resolvable:$true] %s107_s19 }
  0x1f   :  { %s12110_s1 = scalar_lea.vmem %s88_s17, 48  ;;  %s12114_s20 = scalar_lea.vmem %s88_s17, 64 }
  0x20   :  { %p12111_p10 = scmp.ne.s32.totalorder %s88_s17, %s12110_s1  ;;  %p12115_p11 = scmp.lt.s32.totalorder %s88_s17, %s88_s17 }
  0x21   :  { %p12116_p12 = scmp.lt.s32.totalorder %s12114_s20, %s12110_s1 }
  0x23   :  { %p12117_p13 = por %p12116_p12, %p12115_p11 }
  0x25   :  { %p12118_p0 = pnand %p12117_p13, %p12111_p10 }
  0x27   :  { %12121 = shalt.err (!%p12118_p0)
}
  0x28   :  { %90 = dma.hbm_to_vmem [thread:$0]  %s13210_s5, 48, %s88_s17, [#allocation12]  }
  0x29   :  { %s12130_s23 = scalar_lea.vmem %s108_s19, 48  ;;  %s12134_s3 = scalar_lea.vmem %s108_s19, 64 }
  0x2a   :  { %p12131_p1 = scmp.ne.s32.totalorder %s108_s19, %s12130_s23  ;;  %p12135_p2 = scmp.lt.s32.totalorder %s108_s19, %s108_s19 }
  0x2b   :  { %p12136_p3 = scmp.lt.s32.totalorder %s12134_s3, %s12130_s23 }
  0x2d   :  { %p12137_p4 = por %p12136_p3, %p12135_p2 }
  0x2f   :  { %p12138_p5 = pnand %p12137_p4, %p12131_p1 }
  0x31   :  { %12141 = shalt.err (!%p12138_p5)
}
  0x32   :  { %110 = dma.hbm_to_vmem [thread:$0]  %s13212_s7, 48, %s108_s19, [#allocation15]  }
  0x33   :  { %s12344_s26 = smov [#allocation17]   ;;  %s12345_s28 = smov [#allocation2]  }
  0x34   :  { %s129_s27 = sshll.u32 %s12344_s26, 4  ;;  %s30_s29 = sshll.u32 %s12345_s28, 4  ;;  %s130_s27 = int_to_ptr.vmem [resolvable:$true] %s129_s27  ;;  %s31_s29 = int_to_ptr.vmem [resolvable:$true] %s30_s29 }
  0x35   :  { %s12150_s30 = scalar_lea.vmem %s130_s27, 192  ;;  %p12155_p7 = scmp.lt.s32.totalorder %s130_s27, %s130_s27 }
  0x36   :  { %p12151_p6 = scmp.ne.s32.totalorder %s130_s27, %s12150_s30  ;;  %p12156_p8 = scmp.lt.s32.totalorder %s12150_s30, %s12150_s30 }
  0x38   :  { %p12157_p9 = por %p12156_p8, %p12155_p7 }
  0x3a   :  { %p12158_p10 = pnand %p12157_p9, %p12151_p6 }
  0x3c   :  { %12161 = shalt.err (!%p12158_p10)
}
  0x3d   :  { %132 = dma.hbm_to_vmem [thread:$0]  %s13214_s9, 192, %s130_s27, [#allocation18]  }
  0x3e   :  { %s12170_s14 = scalar_lea.vmem %s31_s29, 768  ;;  %p12175_p12 = scmp.lt.s32.totalorder %s31_s29, %s31_s29 }
  0x3f   :  { %p12171_p11 = scmp.ne.s32.totalorder %s31_s29, %s12170_s14  ;;  %p12176_p13 = scmp.lt.s32.totalorder %s12170_s14, %s12170_s14 }
  0x41   :  { %p12177_p0 = por %p12176_p13, %p12175_p12 }
  0x43   :  { %p12178_p1 = pnand %p12177_p0, %p12171_p11 }
  0x45   :  { %12181 = shalt.err (!%p12178_p1)
}
  0x46   :  { %s12346_s7 = smov 384   ;;  %s12347_s15 = smov 24  }
  0x47   :  { %36 = dma.hbm_to_vmem [thread:$0]  %s13205_s0, 768, %s31_s29, [#allocation3], %s12346_s7, %s12346_s7, %s12347_s15  }
  0x48   :  { %s12348_s18 = smov [#allocation7]   ;;  %s12349_s1 = smov [#allocation10]  }
  0x49   :  { %s53_s19 = sshll.u32 %s12348_s18, 4  ;;  %s74_s9 = sshll.u32 %s12349_s1, 4  ;;  %s54_s19 = int_to_ptr.vmem [resolvable:$true] %s53_s19  ;;  %s75_s9 = int_to_ptr.vmem [resolvable:$true] %s74_s9 }
  0x4a   :  { %s12190_s20 = scalar_lea.vmem %s54_s19, 48  ;;  %s12194_s21 = scalar_lea.vmem %s54_s19, 64 }
  0x4b   :  { %p12191_p2 = scmp.ne.s32.totalorder %s54_s19, %s12190_s20  ;;  %p12195_p3 = scmp.lt.s32.totalorder %s54_s19, %s54_s19 }
  0x4c   :  { %p12196_p4 = scmp.lt.s32.totalorder %s12194_s21, %s12190_s20 }
  0x4e   :  { %p12197_p5 = por %p12196_p4, %p12195_p3 }
  0x50   :  { %p12198_p6 = pnand %p12197_p5, %p12191_p2 }
  0x52   :  { %12201 = shalt.err (!%p12198_p6)
}
  0x53   :  { %56 = dma.hbm_to_vmem [thread:$0]  %s13207_s2, 48, %s54_s19, [#allocation6]  }
  0x54   :  { %s12210_s3 = scalar_lea.vmem %s75_s9, 9216  ;;  %p12215_p8 = scmp.lt.s32.totalorder %s75_s9, %s75_s9 }
  0x55   :  { %p12211_p7 = scmp.ne.s32.totalorder %s75_s9, %s12210_s3  ;;  %p12216_p9 = scmp.lt.s32.totalorder %s12210_s3, %s12210_s3 }
  0x57   :  { %p12217_p10 = por %p12216_p9, %p12215_p8 }
  0x59   :  { %p12218_p11 = pnand %p12217_p10, %p12211_p7 }
  0x5b   :  { %12221 = shalt.err (!%p12218_p11)
}
  0x5c   :  { %s12350_s0 = smov 192   ;;  %s12351_s24 = smov 12  }
  0x5d   :  { %80 = dma.hbm_to_vmem [thread:$0]  %s13209_s4, 9216, %s75_s9, [#allocation9], %s12350_s0, %s12350_s0, %s12351_s24  }
  0x5e   :  { %s12352_s27 = smov [#allocation13]   ;;  %s12353_s29 = smov [#allocation16]  }
  0x5f   :  { %s97_s28 = sshll.u32 %s12352_s27, 4  ;;  %s116_s2 = sshll.u32 %s12353_s29, 4  ;;  %s98_s28 = int_to_ptr.vmem [resolvable:$true] %s97_s28  ;;  %s117_s2 = int_to_ptr.vmem [resolvable:$true] %s116_s2 }
  0x60   :  { %s12230_s30 = scalar_lea.vmem %s98_s28, 48  ;;  %s12234_s5 = scalar_lea.vmem %s98_s28, 64 }
  0x61   :  { %p12231_p12 = scmp.ne.s32.totalorder %s98_s28, %s12230_s30  ;;  %p12235_p13 = scmp.lt.s32.totalorder %s98_s28, %s98_s28 }
  0x62   :  { %p12236_p0 = scmp.lt.s32.totalorder %s12234_s5, %s12230_s30 }
  0x64   :  { %p12237_p1 = por %p12236_p0, %p12235_p13 }
  0x66   :  { %p12238_p2 = pnand %p12237_p1, %p12231_p12 }
  0x68   :  { %12241 = shalt.err (!%p12238_p2)
}
  0x69   :  { %100 = dma.hbm_to_vmem [thread:$0]  %s13211_s6, 48, %s98_s28, [#allocation12]  }
  0x6a   :  { %s12250_s16 = scalar_lea.vmem %s117_s2, 36864  ;;  %p12255_p4 = scmp.lt.s32.totalorder %s117_s2, %s117_s2 }
  0x6b   :  { %p12251_p3 = scmp.ne.s32.totalorder %s117_s2, %s12250_s16  ;;  %p12256_p5 = scmp.lt.s32.totalorder %s12250_s16, %s12250_s16 }
  0x6d   :  { %p12257_p6 = por %p12256_p5, %p12255_p4 }
  0x6f   :  { %p12258_p7 = pnand %p12257_p6, %p12251_p3 }
  0x71   :  { %12261 = shalt.err (!%p12258_p7)
}
  0x72   :  { %s12354_s4 = smov 768   ;;  %s12355_s17 = smov 48  }
  0x73   :  { %122 = dma.hbm_to_vmem [thread:$0]  %s13213_s8, 36864, %s117_s2, [#allocation15], %s12354_s4, %s12354_s4, %s12355_s17  }
  0x74   :  { %s12356_s1 = smov [#allocation19]   ;;  %s12357_s20 = smov [#allocation20]  }
  0x75   :  { %s138_s9 = sshll.u32 %s12356_s1, 4  ;;  %s151_s21 = sshll.u32 %s12357_s20, 4  ;;  %s139_s9 = int_to_ptr.vmem [resolvable:$true] %s138_s9  ;;  %s152_s21 = int_to_ptr.vmem [resolvable:$true] %s151_s21 }
  0x76   :  { %s12270_s6 = scalar_lea.vmem %s139_s9, 36864  ;;  %p12275_p9 = scmp.lt.s32.totalorder %s139_s9, %s139_s9 }
  0x77   :  { %p12271_p8 = scmp.ne.s32.totalorder %s139_s9, %s12270_s6  ;;  %p12276_p10 = scmp.lt.s32.totalorder %s12270_s6, %s12270_s6 }
  0x79   :  { %p12277_p11 = por %p12276_p10, %p12275_p9 }
  0x7b   :  { %p12278_p12 = pnand %p12277_p11, %p12271_p8 }
  0x7d   :  { %12281 = shalt.err (!%p12278_p12)
}
  0x7e   :  { %144 = dma.hbm_to_vmem [thread:$0]  %s13215_s10, 36864, %s139_s9, [#allocation18], %s12350_s0, %s12350_s0, %s12351_s24  }
  0x7f   :  { %s12290_s8 = scalar_lea.vmem %s152_s21, 48  ;;  %s12294_s3 = scalar_lea.vmem %s152_s21, 64 }
  0x80   :  { %p12291_p13 = scmp.ne.s32.totalorder %s152_s21, %s12290_s8  ;;  %p12295_p0 = scmp.lt.s32.totalorder %s152_s21, %s152_s21 }
  0x81   :  { %p12296_p1 = scmp.lt.s32.totalorder %s12294_s3, %s12290_s8 }
  0x83   :  { %p12297_p2 = por %p12296_p1, %p12295_p0 }
  0x85   :  { %p12298_p3 = pnand %p12297_p2, %p12291_p13 }
  0x87   :  { %12301 = shalt.err (!%p12298_p3)
}
  0x88   :  { %154 = dma.hbm_to_vmem [thread:$0]  %s13216_s11, 48, %s152_s21, [#allocation21]  }
  0x89   :  { %12322 = dma.done.wait [#allocation3], 768  }
  0x8a   :  { %12323 = vsyncadd [#allocation3], 4294966528 }
  0x8b   :  { %12324 = dma.done.wait [#allocation6], 96  }
  0x8c   :  { %12325 = vsyncadd [#allocation6], 4294967200 }
  0x8d   :  { %12326 = dma.done.wait [#allocation9], 36864  }
  0x8e   :  { %12327 = vsyncadd [#allocation9], 4294930432 }
  0x8f   :  { %12328 = dma.done.wait [#allocation12], 96  }
  0x90   :  { %12329 = vsyncadd [#allocation12], 4294967200 }
  0x91   :  { %12330 = dma.done.wait [#allocation15], 36912  }
  0x92   :  { %12331 = vsyncadd [#allocation15], 4294930384 }
  0x93   :  { %12332 = dma.done.wait [#allocation18], 37056  }
  0x94   :  { %12333 = vsyncadd [#allocation18], 4294930240 }
  0x95   :  { %12334 = dma.done.wait [#allocation21], 48  }
  0x96   :  { %12335 = vsyncadd [#allocation21], 4294967248  ;;  %v192_v0 = vld [vmem:[#allocation2] sm:$0xff]  ;;  %v193_v1 = vld [vmem:[#allocation2 + $0x8] sm:$0xff]  ;;  %vm12360_vm0 = vmmov 0   ;;  %vm2083_vm1 = vcmask 523264  }
  0x97   :  { %v194_v2 = vld [vmem:[#allocation2 + $0x10] sm:$0xff]  ;;  %v200_v3 = vadd.f32 %v193_v1, %v192_v0  ;;  %v195_v4 = vld [vmem:[#allocation2 + $0x18] sm:$0xff]  ;;  %v196_v5 = vld [vmem:[#allocation2 + $0x20] sm:$0xff]  ;;  %vm2208_vm2 = vcmask 1043456   ;;  %vm2180_vm4 = vcmask 64512   ;;  %s12361_s10 = smov 64  }
  0x98   :  { %v197_v6 = vld [vmem:[#allocation2 + $0x28] sm:$0xff]  ;;  %v204_v7 = vadd.f32 %v196_v5, %v195_v4  ;;  %v10776_v10 = vld [vmem:[#allocation8 + $0x1fc] ss:$36 sps:$4 sm:$0xff]   ;;  %v10784_v15 = vld [vmem:[#allocation8 + $0x168] ss:$36 sps:$4 sm:$0xff]   ;;  %s12362_s11 = smov [#allocation22]  }
  0x99   :  { %v201_v8 = vadd.f32 %v200_v3, %v194_v2  ;;  %v10778_v11 = vld [vmem:[#allocation8 + $0x1f8] ss:$36 sps:$4 sm:$0xff]   ;;  %1634 = vmatprep.subr.bf16.mxu0 %v10776_v10  ;;  %v10781_v13 = vld [vmem:[#allocation8 + $0x1b0] ss:$36 sps:$4 sm:$0xff]   ;;  %v10785_v17 = vld [vmem:[#allocation8 + $0x124] ss:$36 sps:$4 sm:$0xff]  }
  0x9a   :  { %v205_v9 = vadd.f32 %v204_v7, %v197_v6  ;;  %v10779_v12 = vld [vmem:[#allocation8 + $0x1b4] ss:$36 sps:$4 sm:$0xff]   ;;  %1635 = vmatpush1.bf16.msra.mxu0 %v10778_v11  ;;  %v10782_v14 = vld [vmem:[#allocation8 + $0x16c] ss:$36 sps:$4 sm:$0xff]   ;;  %v10800_v16 = vld [vmem:[#allocation8 + $0x67c] ss:$36 sps:$4 sm:$0xff]  }
  0x9b   :  { %202 = vadd.xlane.f32.xlu0 %v201_v8  ;;  %1636 = vmatprep.subr.bf16.mxu0 %v10779_v12  ;;  %v10804_v18 = vld [vmem:[#allocation8 + $0x678] ss:$36 sps:$4 sm:$0xff]   ;;  %v10787_v19 = vld [vmem:[#allocation8 + $0x120] ss:$36 sps:$4 sm:$0xff]   ;;  %v10793_v23 = vld [vmem:[#allocation8 + $0x90] ss:$36 sps:$4 sm:$0xff]  }
  0x9c   :  { %1677 = vmatprep.subr.bf16.mxu1 %v10800_v16  ;;  %v10788_v20 = vld [vmem:[#allocation8 + $0xdc] ss:$36 sps:$4 sm:$0xff]   ;;  %v10791_v22 = vld [vmem:[#allocation8 + $0x94] ss:$36 sps:$4 sm:$0xff]   ;;  %v10794_v24 = vld [vmem:[#allocation8 + $0x4c] ss:$36 sps:$4 sm:$0xff]  }
  0x9d   :  { %1678 = vmatpush1.bf16.msra.mxu1 %v10804_v18  ;;  %v10790_v21 = vld [vmem:[#allocation8 + $0xd8] ss:$36 sps:$4 sm:$0xff]   ;;  %v10796_v25 = vld [vmem:[#allocation8 + $0x48] ss:$36 sps:$4 sm:$0xff]   ;;  %v10799_v27 = vld [vmem:[#allocation8] ss:$36 sps:$4 sm:$0xff]  }
  0x9e   :  { %1637 = vmatpush1.bf16.msra.mxu0 %v10781_v13  ;;  %v10797_v26 = vld [vmem:[#allocation8 + $0x4] ss:$36 sps:$4 sm:$0xff]   ;;  %v10802_v28 = vld [vmem:[#allocation8 + $0x43c] ss:$36 sps:$4 sm:$0xff]   ;;  %v10806_v50 = vld [vmem:[#allocation8 + $0x634] ss:$36 sps:$4 sm:$0xff]  }
  0x9f   :  { %206 = vadd.xlane.f32.xlu0 %v205_v9  ;;  %1638 = vmatprep.subr.bf16.mxu0 %v10782_v14  ;;  %v10805_v29 = vld [vmem:[#allocation8 + $0x438] ss:$36 sps:$4 sm:$0xff]   ;;  %v10810_v52 = vld [vmem:[#allocation8 + $0x630] ss:$36 sps:$4 sm:$0xff]   ;;  %v10816_v56 = vld [vmem:[#allocation8 + $0x5e8] ss:$36 sps:$4 sm:$0xff]  }
  0xa0   :  { %v10808_v51 = vld [vmem:[#allocation8 + $0x3f4] ss:$36 sps:$4 sm:$0xff]   ;;  %1679 = vmatprep.subr.bf16.mxu1 %v10806_v50  ;;  %v10812_v54 = vld [vmem:[#allocation8 + $0x5ec] ss:$36 sps:$4 sm:$0xff]   ;;  %v10818_v58 = vld [vmem:[#allocation8 + $0x5a4] ss:$36 sps:$4 sm:$0xff]  }
  0xa1   :  { %v10811_v53 = vld [vmem:[#allocation8 + $0x3f0] ss:$36 sps:$4 sm:$0xff]   ;;  %1680 = vmatpush1.bf16.msra.mxu1 %v10810_v52  ;;  %v10817_v57 = vld [vmem:[#allocation8 + $0x3a8] ss:$36 sps:$4 sm:$0xff]   ;;  %v10822_v60 = vld [vmem:[#allocation8 + $0x5a0] ss:$36 sps:$4 sm:$0xff]  }
  0xa2   :  { %1639 = vmatpush1.bf16.msra.mxu0 %v10784_v15  ;;  %v10814_v55 = vld [vmem:[#allocation8 + $0x3ac] ss:$36 sps:$4 sm:$0xff]   ;;  %1681 = vmatprep.subr.bf16.mxu1 %v10812_v54  ;;  %v10820_v59 = vld [vmem:[#allocation8 + $0x364] ss:$36 sps:$4 sm:$0xff]   ;;  %v10824_v62 = vld [vmem:[#allocation8 + $0x55c] ss:$36 sps:$4 sm:$0xff]  }
  0xa3   :  { %1640 = vmatprep.subr.bf16.mxu0 %v10785_v17  ;;  %v10823_v61 = vld [vmem:[#allocation8 + $0x360] ss:$36 sps:$4 sm:$0xff]   ;;  %v10832_v3 = vld [vmem:[#allocation8 + $0x2d4] ss:$36 sps:$4 sm:$0xff]   ;;  %v10838_v7 = vld [vmem:[#allocation8 + $0x28c] ss:$36 sps:$4 sm:$0xff]  }
  0xa4   :  { %v10826_v63 = vld [vmem:[#allocation8 + $0x31c] ss:$36 sps:$4 sm:$0xff]   ;;  %v10840_v8 = vld [vmem:[#allocation8 + $0x4c8] ss:$36 sps:$4 sm:$0xff]   ;;  %v12358_v9 = vmov 0   ;;  %s9356_s0 = sshll.u32 %s12362_s11, 4  ;;  %s9357_s0 = int_to_ptr.vmem [resolvable:$true] %s9356_s0 }
  0xa5   :  { %1682 = vmatpush1.bf16.msra.mxu1 %v10816_v56  ;;  %1709 = vmatprep.mubr.bf16.mxu1 %v12358_v9  ;;  %v10841_v10 = vld [vmem:[#allocation8 + $0x288] ss:$36 sps:$4 sm:$0xff]   ;;  %v10846_v13 = vld [vmem:[#allocation8 + $0x480] ss:$36 sps:$4 sm:$0xff]   ;;  %s12302_s24 = scalar_lea.vmem %s9357_s0, 768  ;;  %p12307_p5 = scmp.lt.s32.totalorder %s9357_s0, %s9357_s0 }
  0xa6   :  { %1641 = vmatpush1.bf16.msra.mxu0 %v10787_v19  ;;  %1683 = vmatprep.subr.bf16.mxu1 %v10818_v58  ;;  %v10842_v11 = vld [vmem:[#allocation8 + $0x484] ss:$36 sps:$4 sm:$0xff]   ;;  %p12303_p4 = scmp.ne.s32.totalorder %s9357_s0, %s12302_s24  ;;  %p12308_p6 = scmp.lt.s32.totalorder %s12302_s24, %s12302_s24 }
  0xa7   :  { %1642 = vmatprep.subr.bf16.mxu0 %v10788_v20  ;;  %v10844_v12 = vld [vmem:[#allocation8 + $0x244] ss:$36 sps:$4 sm:$0xff]  }
  0xa8   :  { %v10847_v14 = vld [vmem:[#allocation8 + $0x240] ss:$36 sps:$4 sm:$0xff]   ;;  %p12309_p7 = por %p12308_p6, %p12307_p5 }
  0xa9   :  { %1684 = vmatpush1.bf16.msra.mxu1 %v10822_v60  ;;  %v10850_v15 = vld [vmem:[#allocation8 + $0x204] ss:$36 sps:$4 sm:$0xff]  }
  0xaa   :  { %1643 = vmatpush1.bf16.msra.mxu0 %v10790_v21  ;;  %1685 = vmatprep.subr.bf16.mxu1 %v10824_v62  ;;  %v10853_v16 = vld [vmem:[#allocation8 + $0x684] ss:$36 sps:$4 sm:$0xff]   ;;  %p12310_p8 = pnand %p12309_p7, %p12303_p4 }
  0xab   :  { %1644 = vmatprep.subr.bf16.mxu0 %v10791_v22  ;;  %v10851_v58 = vld [vmem:[#allocation8 + $0x680] ss:$36 sps:$4 sm:$0xff]  }
  0xae   :  { %1645 = vmatpush1.bf16.msra.mxu0 %v10793_v23  ;;  %v244_v23 = vlaneseq }
  0xaf   :  { %1646 = vmatprep.subr.bf16.mxu0 %v10794_v24 }
  0xb0   :  { %v12499_v24 = vshrl.u32 %v244_v23, 7 }
  0xb2   :  { %1647 = vmatpush1.bf16.msra.mxu0 %v10796_v25  ;;  %v12502_v25 = vsub.s32 1, %v12499_v24 }
  0xb3   :  { %1648 = vmatprep.subr.bf16.mxu0 %v10797_v26  ;;  %v12505_v26 = vsub.s32 2, %v12499_v24 }
  0xb6   :  { %1649 = vmatpush1.bf16.msra.mxu0 %v10799_v27  ;;  %v198_v27 = vld [vmem:[#allocation5] sm:$0x7] }
  0xb7   :  { %1650 = vmatprep.subr.bf16.mxu0 %v10802_v28  ;;  %v12508_v28 = vsub.s32 0, %v12499_v24 }
  0xba   :  { %1651 = vmatpush2.bf16.msra.mxu0 %v10805_v29 }
  0xbb   :  { %1652 = vmatprep.subr.bf16.mxu0 %v10808_v51 }
  0xbe   :  { %1653 = vmatpush2.bf16.msra.mxu0 %v10811_v53  ;;  %v10848_v53 = vld [vmem:[#allocation8 + $0x200] ss:$36 sps:$4 sm:$0xff]  }
  0xbf   :  { %1654 = vmatprep.subr.bf16.mxu0 %v10814_v55 }
  0xc2   :  { %1655 = vmatpush2.bf16.msra.mxu0 %v10817_v57 }
  0xc3   :  { %1656 = vmatprep.subr.bf16.mxu0 %v10820_v59 }
  0xc6   :  { %1657 = vmatpush2.bf16.msra.mxu0 %v10823_v61  ;;  %v10856_v61 = vld [vmem:[#allocation8 + $0x1bc] ss:$36 sps:$4 sm:$0xff]  }
  0xc7   :  { %1658 = vmatprep.subr.bf16.mxu0 %v10826_v63  ;;  %v10854_v63 = vld [vmem:[#allocation8 + $0x1b8] ss:$36 sps:$4 sm:$0xff]  }
 0x124   :  { %v203_v30 = vpop.xlane.xlu0 %202 }
 0x125   :  { %v209_v31 = vmul.f32 0.0026041667, %v203_v30  ;;  %v199_v30 = vld [vmem:[#allocation7] sm:$0x7] }
 0x126   :  { %v269_v50 = vrot.slane %v199_v30, %v12508_v28 }
 0x127   :  { %v12473_v32 = vsub.f32 %v192_v0, %v209_v31  ;;  %v12475_v33 = vsub.f32 %v193_v1, %v209_v31  ;;  %v12477_v34 = vsub.f32 %v194_v2, %v209_v31  ;;  %v10828_v0 = vld [vmem:[#allocation8 + $0x558] ss:$36 sps:$4 sm:$0xff]  }
 0x128   :  { %v207_v35 = vpop.xlane.xlu0 %206  ;;  %v10829_v1 = vld [vmem:[#allocation8 + $0x318] ss:$36 sps:$4 sm:$0xff]   ;;  %1686 = vmatpush1.bf16.msra.mxu1 %v10828_v0 }
 0x129   :  { %v210_v36 = vmul.f32 0.0026041667, %v207_v35  ;;  %v217_v37 = vmul.f32 %v12473_v32, %v12473_v32  ;;  %v218_v38 = vmul.f32 %v12475_v33, %v12475_v33  ;;  %v219_v39 = vmul.f32 %v12477_v34, %v12477_v34  ;;  %v10830_v2 = vld [vmem:[#allocation8 + $0x514] ss:$36 sps:$4 sm:$0xff]   ;;  %1659 = vmatpush2.bf16.msra.mxu0 %v10829_v1 }
 0x12a   :  { %1687 = vmatprep.subr.bf16.mxu1 %v10830_v2  ;;  %1660 = vmatprep.subr.bf16.mxu0 %v10832_v3  ;;  %v251_v35 = vrot.slane %v198_v27, %v12502_v25  ;;  %v10857_v0 = vld [vmem:[#allocation8 + $0x638] ss:$36 sps:$4 sm:$0xff]   ;;  %v10860_v3 = vld [vmem:[#allocation8 + $0x170] ss:$36 sps:$4 sm:$0xff]  }
 0x12b   :  { %v12485_v40 = vsub.f32 %v195_v4, %v210_v36  ;;  %v12487_v41 = vsub.f32 %v196_v5, %v210_v36  ;;  %v12489_v42 = vsub.f32 %v197_v6, %v210_v36  ;;  %v223_v43 = vadd.f32 %v218_v38, %v217_v37  ;;  %v10834_v4 = vld [vmem:[#allocation8 + $0x510] ss:$36 sps:$4 sm:$0xff]  }
 0x12c   :  { %v10835_v5 = vld [vmem:[#allocation8 + $0x2d0] ss:$36 sps:$4 sm:$0xff]   ;;  %1688 = vmatpush1.bf16.msra.mxu1 %v10834_v4  ;;  %v255_v37 = vrot.slane %v198_v27, %v12505_v26 }
 0x12d   :  { %v224_v44 = vadd.f32 %v223_v43, %v219_v39  ;;  %v220_v45 = vmul.f32 %v12485_v40, %v12485_v40  ;;  %v221_v46 = vmul.f32 %v12487_v41, %v12487_v41  ;;  %v222_v47 = vmul.f32 %v12489_v42, %v12489_v42  ;;  %v10836_v6 = vld [vmem:[#allocation8 + $0x4cc] ss:$36 sps:$4 sm:$0xff]   ;;  %1661 = vmatpush2.bf16.msra.mxu0 %v10835_v5  ;;  %v10862_v1 = vld [vmem:[#allocation8 + $0x174] ss:$36 sps:$4 sm:$0xff]  }
 0x12e   :  { %1689 = vmatprep.subr.bf16.mxu1 %v10836_v6  ;;  %1662 = vmatprep.subr.bf16.mxu0 %v10838_v7  ;;  %v247_v39 = vrot.slane %v198_v27, %v12508_v28  ;;  %v10865_v2 = vld [vmem:[#allocation8 + $0x5f4] ss:$36 sps:$4 sm:$0xff]   ;;  %v10868_v5 = vld [vmem:[#allocation8 + $0x12c] ss:$36 sps:$4 sm:$0xff]  }
 0x12f   :  { %225 = vadd.xlane.f32.xlu1 %v224_v44  ;;  %v227_v48 = vadd.f32 %v221_v46, %v220_v45  ;;  %v273_v44 = vrot.slane %v199_v30, %v12502_v25  ;;  %v277_v45 = vrot.slane %v199_v30, %v12505_v26  ;;  %v10863_v4 = vld [vmem:[#allocation8 + $0x5f0] ss:$36 sps:$4 sm:$0xff]   ;;  %v10866_v7 = vld [vmem:[#allocation8 + $0x128] ss:$36 sps:$4 sm:$0xff]  }
 0x130   :  { %1690 = vmatpush1.bf16.msra.mxu1 %v10840_v8  ;;  %v10871_v6 = vld [vmem:[#allocation8 + $0x5ac] ss:$36 sps:$4 sm:$0xff]  }
 0x131   :  { %v228_v49 = vadd.f32 %v227_v48, %v222_v47  ;;  %1663 = vmatpush2.bf16.msra.mxu0 %v10841_v10  ;;  %1691 = vmatprep.subr.bf16.mxu1 %v10842_v11  ;;  %v10869_v8 = vld [vmem:[#allocation8 + $0x5a8] ss:$36 sps:$4 sm:$0xff]  }
 0x132   :  { %1664 = vmatprep.subr.bf16.mxu0 %v10844_v12  ;;  %v10874_v10 = vld [vmem:[#allocation8 + $0xe4] ss:$36 sps:$4 sm:$0xff]   ;;  %v10895_v27 = vld [vmem:[#allocation8 + $0x48c] ss:$36 sps:$4 sm:$0xff]  }
 0x133   :  { %229 = vadd.xlane.f32.xlu1 %v228_v49  ;;  %v10877_v11 = vld [vmem:[#allocation8 + $0x564] ss:$36 sps:$4 sm:$0xff]  }
 0x134   :  { %1692 = vmatpush1.bf16.msra.mxu1 %v10846_v13  ;;  %v10872_v12 = vld [vmem:[#allocation8 + $0xe0] ss:$36 sps:$4 sm:$0xff]   ;;  %v10893_v30 = vld [vmem:[#allocation8 + $0x488] ss:$36 sps:$4 sm:$0xff]  }
 0x135   :  { %1665 = vmatpush2.bf16.msra.mxu0 %v10847_v14  ;;  %1720 = vmatprep.subr.bf16.mxu1 %v10850_v15  ;;  %v10875_v13 = vld [vmem:[#allocation8 + $0x560] ss:$36 sps:$4 sm:$0xff]  }
 0x136   :  { %1763 = vmatprep.subr.bf16.mxu0 %v10853_v16  ;;  %v10880_v14 = vld [vmem:[#allocation8 + $0x9c] ss:$36 sps:$4 sm:$0xff]  }
 0x137   :  { %v10883_v15 = vld [vmem:[#allocation8 + $0x51c] ss:$36 sps:$4 sm:$0xff]  }
 0x138   :  { %v10878_v16 = vld [vmem:[#allocation8 + $0x98] ss:$36 sps:$4 sm:$0xff]  }
 0x1b8   :  { %v226_v17 = vpop.xlane.xlu1 %225 }
 0x1b9   :  { %v231_v18 = vmul.f32 0.0026041667, %v226_v17  ;;  %v10881_v17 = vld [vmem:[#allocation8 + $0x518] ss:$36 sps:$4 sm:$0xff]  }
 0x1bb   :  { %v233_v19 = vadd.f32 1e-05, %v231_v18  ;;  %v10886_v18 = vld [vmem:[#allocation8 + $0x54] ss:$36 sps:$4 sm:$0xff]  }
 0x1bc   :  { %v230_v20 = vpop.xlane.xlu1 %229 }
 0x1bd   :  { %12000 = vrsqrt.f32 %v233_v19  ;;  %v232_v21 = vmul.f32 0.0026041667, %v230_v20  ;;  %v10889_v19 = vld [vmem:[#allocation8 + $0x4d4] ss:$36 sps:$4 sm:$0xff]  }
 0x1be   :  { %v10884_v20 = vld [vmem:[#allocation8 + $0x50] ss:$36 sps:$4 sm:$0xff]  }
 0x1bf   :  { %v234_v22 = vadd.f32 1e-05, %v232_v21  ;;  %v10887_v21 = vld [vmem:[#allocation8 + $0x4d0] ss:$36 sps:$4 sm:$0xff]  }
 0x1c1   :  { %12002 = vrsqrt.f32 %v234_v22  ;;  %v10892_v22 = vld [vmem:[#allocation8 + $0xc] ss:$36 sps:$4 sm:$0xff]  }
 0x1ca   :  { %v12001_v29 = vpop.eup %12000 }
 0x1cb   :  { %v238_v31 = vmul.f32 %v12001_v29, %v12475_v33  ;;  %v239_v36 = vmul.f32 %v12001_v29, %v12477_v34  ;;  %v237_v38 = vmul.f32 %v12001_v29, %v12473_v32  ;;  %v10890_v29 = vld [vmem:[#allocation8 + $0x8] ss:$36 sps:$4 sm:$0xff]  }
 0x1cd   :  { %v260_v47 = vmul.f32 %v251_v35, %v238_v31  ;;  %v261_v48 = vmul.f32 %v255_v37, %v239_v36  ;;  %v259_v34 = vmul.f32 %v247_v39, %v237_v38  ;;  %v10898_v31 = vld [vmem:[#allocation8 + $0x444] ss:$36 sps:$4 sm:$0xff]   ;;  %v10904_v38 = vld [vmem:[#allocation8 + $0x3fc] ss:$36 sps:$4 sm:$0xff]  }
 0x1ce   :  { %v12003_v43 = vpop.eup %12002  ;;  %v10896_v36 = vld [vmem:[#allocation8 + $0x440] ss:$36 sps:$4 sm:$0xff]  }
 0x1cf   :  { %v241_v46 = vmul.f32 %v12003_v43, %v12487_v41  ;;  %v242_v33 = vmul.f32 %v12003_v43, %v12489_v42  ;;  %v240_v49 = vmul.f32 %v12003_v43, %v12485_v40  ;;  %v282_v54 = vadd.f32 %v273_v44, %v260_v47  ;;  %v10859_v40 = vld [vmem:[#allocation8 + $0x63c] ss:$36 sps:$4 sm:$0xff]   ;;  %v10908_v47 = vld [vmem:[#allocation8 + $0x3b0] ss:$36 sps:$4 sm:$0xff]  }
 0x1d0   :  { %v283_v56 = vadd.f32 %v277_v45, %v261_v48  ;;  %v281_v59 = vadd.f32 %v269_v50, %v259_v34  ;;  %v10902_v43 = vld [vmem:[#allocation8 + $0x3f8] ss:$36 sps:$4 sm:$0xff]   ;;  %v10916_v48 = vld [vmem:[#allocation8 + $0x36c] ss:$36 sps:$4 sm:$0xff]  }
 0x1d1   :  { %v263_v51 = vmul.f32 %v251_v35, %v241_v46  ;;  %v264_v32 = vmul.f32 %v255_v37, %v242_v33  ;;  %v262_v52 = vmul.f32 %v247_v39, %v240_v49  ;;  %v10901_v35 = vld [vmem:[#allocation8 + $0x20c] ss:$36 sps:$4 sm:$0xff]   ;;  %v10907_v39 = vld [vmem:[#allocation8 + $0x1c4] ss:$36 sps:$4 sm:$0xff]   ;;  %v10913_v46 = vld [vmem:[#allocation8 + $0x17c] ss:$36 sps:$4 sm:$0xff]  }
 0x1d2   :  { %v10899_v37 = vld [vmem:[#allocation8 + $0x208] ss:$36 sps:$4 sm:$0xff]   ;;  %v10911_v33 = vld [vmem:[#allocation8 + $0x178] ss:$36 sps:$4 sm:$0xff]  }
 0x1d3   :  { %v285_v55 = vadd.f32 %v273_v44, %v263_v51  ;;  %v286_v57 = vadd.f32 %v277_v45, %v264_v32  ;;  %v284_v41 = vadd.f32 %v269_v50, %v262_v52  ;;  %v10905_v44 = vld [vmem:[#allocation8 + $0x1c0] ss:$36 sps:$4 sm:$0xff]   ;;  %v10910_v45 = vld [vmem:[#allocation8 + $0x3b4] ss:$36 sps:$4 sm:$0xff]   ;;  %v10914_v34 = vld [vmem:[#allocation8 + $0x368] ss:$36 sps:$4 sm:$0xff]  }
 0x1d4   :  { %v10919_v49 = vld [vmem:[#allocation8 + $0x134] ss:$36 sps:$4 sm:$0xff]   ;;  %v10922_v51 = vld [vmem:[#allocation8 + $0x324] ss:$36 sps:$4 sm:$0xff]   ;;  %v10925_v32 = vld [vmem:[#allocation8 + $0xec] ss:$36 sps:$4 sm:$0xff]  }
 0x1d5   :  { %v12522_v60 = vpack.c.bf16 %v285_v55, %v282_v54  ;;  %v12524_v42 = vpack.c.bf16 %v286_v57, %v283_v56  ;;  %v12526_v62 = vpack.c.bf16 %v284_v41, %v281_v59  ;;  %v10917_v50 = vld [vmem:[#allocation8 + $0x130] ss:$36 sps:$4 sm:$0xff]   ;;  %v10920_v52 = vld [vmem:[#allocation8 + $0x320] ss:$36 sps:$4 sm:$0xff]   ;;  %v10926_v56 = vld [vmem:[#allocation8 + $0x2d8] ss:$36 sps:$4 sm:$0xff]  }
 0x1d6   :  { %v10928_v54 = vld [vmem:[#allocation8 + $0x2dc] ss:$36 sps:$4 sm:$0xff]   ;;  %v10931_v55 = vld [vmem:[#allocation8 + $0xa4] ss:$36 sps:$4 sm:$0xff]   ;;  %v10932_v41 = vld [vmem:[#allocation8 + $0x290] ss:$36 sps:$4 sm:$0xff]  }
 0x1d7   :  { %1666 = vmatprep.mubr.bf16.mxu0 %v12522_v60  ;;  %1710 = vmatmul.mubr.bf16.vlgmr.msra.gmra.mxu1 %v12524_v42  ;;  %v10929_v57 = vld [vmem:[#allocation8 + $0xa0] ss:$36 sps:$4 sm:$0xff]  }
 0x1d8   :  { %1721 = vmatpush1.bf16.msra.mxu1 %v10848_v53  ;;  %1667 = vmatmul.mubr.bf16.vlgmr.msra.gmra.mxu0 %v12526_v62  ;;  %v10923_v53 = vld [vmem:[#allocation8 + $0xe8] ss:$36 sps:$4 sm:$0xff]   ;;  %v10937_v59 = vld [vmem:[#allocation8 + $0x5c] ss:$36 sps:$4 sm:$0xff]  }
 0x1d9   :  { %1752 = vmatprep.mubr.bf16.mxu1 %v12522_v60  ;;  %1764 = vmatpush1.bf16.msra.mxu0 %v10851_v58  ;;  %v10934_v58 = vld [vmem:[#allocation8 + $0x294] ss:$36 sps:$4 sm:$0xff]  }
 0x1da   :  { %1722 = vmatprep.subr.bf16.mxu1 %v10856_v61  ;;  %1765 = vmatprep.subr.bf16.mxu0 %v10859_v40  ;;  %v10935_v61 = vld [vmem:[#allocation8 + $0x58] ss:$36 sps:$4 sm:$0xff]   ;;  %v10940_v40 = vld [vmem:[#allocation8 + $0x24c] ss:$36 sps:$4 sm:$0xff]  }
 0x1db   :  { %1795 = vmatprep.mubr.bf16.mxu0 %v12358_v9 }
 0x1dc   :  { %1723 = vmatpush1.bf16.msra.mxu1 %v10854_v63  ;;  %v10943_v63 = vld [vmem:[#allocation8 + $0x14] ss:$36 sps:$4 sm:$0xff]  }
 0x1dd   :  { %1766 = vmatpush1.bf16.msra.mxu0 %v10857_v0  ;;  %1724 = vmatprep.subr.bf16.mxu1 %v10862_v1  ;;  %v10938_v0 = vld [vmem:[#allocation8 + $0x248] ss:$36 sps:$4 sm:$0xff]   ;;  %v10941_v1 = vld [vmem:[#allocation8 + $0x10] ss:$36 sps:$4 sm:$0xff]  }
 0x1de   :  { %1767 = vmatprep.subr.bf16.mxu0 %v10865_v2  ;;  %v10946_v2 = vld [vmem:[#allocation8 + $0x68c] ss:$36 sps:$4 sm:$0xff]  }
 0x1e0   :  { %1725 = vmatpush1.bf16.msra.mxu1 %v10860_v3  ;;  %v10949_v3 = vld [vmem:[#allocation8 + $0x44c] ss:$36 sps:$4 sm:$0xff]  }
 0x1e1   :  { %1768 = vmatpush1.bf16.msra.mxu0 %v10863_v4  ;;  %1726 = vmatprep.subr.bf16.mxu1 %v10868_v5  ;;  %v10944_v4 = vld [vmem:[#allocation8 + $0x688] ss:$36 sps:$4 sm:$0xff]  }
 0x1e2   :  { %1769 = vmatprep.subr.bf16.mxu0 %v10871_v6  ;;  %v10947_v5 = vld [vmem:[#allocation8 + $0x448] ss:$36 sps:$4 sm:$0xff]  }
 0x1e3   :  { %v10952_v6 = vld [vmem:[#allocation8 + $0x644] ss:$36 sps:$4 sm:$0xff]  }
 0x1e4   :  { %1727 = vmatpush1.bf16.msra.mxu1 %v10866_v7  ;;  %v10955_v7 = vld [vmem:[#allocation8 + $0x404] ss:$36 sps:$4 sm:$0xff]  }
 0x1e5   :  { %1770 = vmatpush1.bf16.msra.mxu0 %v10869_v8  ;;  %1728 = vmatprep.subr.bf16.mxu1 %v10874_v10  ;;  %v10950_v8 = vld [vmem:[#allocation8 + $0x640] ss:$36 sps:$4 sm:$0xff]  }
 0x1e6   :  { %1771 = vmatprep.subr.bf16.mxu0 %v10877_v11  ;;  %v10953_v10 = vld [vmem:[#allocation8 + $0x400] ss:$36 sps:$4 sm:$0xff]  }
 0x1e7   :  { %v10958_v11 = vld [vmem:[#allocation8 + $0x5fc] ss:$36 sps:$4 sm:$0xff]  }
 0x1e8   :  { %1729 = vmatpush1.bf16.msra.mxu1 %v10872_v12  ;;  %v10961_v12 = vld [vmem:[#allocation8 + $0x3bc] ss:$36 sps:$4 sm:$0xff]  }
 0x1e9   :  { %1772 = vmatpush1.bf16.msra.mxu0 %v10875_v13  ;;  %1730 = vmatprep.subr.bf16.mxu1 %v10880_v14  ;;  %v10956_v13 = vld [vmem:[#allocation8 + $0x5f8] ss:$36 sps:$4 sm:$0xff]  }
 0x1ea   :  { %1773 = vmatprep.subr.bf16.mxu0 %v10883_v15  ;;  %v10959_v14 = vld [vmem:[#allocation8 + $0x3b8] ss:$36 sps:$4 sm:$0xff]  }
 0x1eb   :  { %v10964_v15 = vld [vmem:[#allocation8 + $0x5b4] ss:$36 sps:$4 sm:$0xff]  }
 0x1ec   :  { %1731 = vmatpush1.bf16.msra.mxu1 %v10878_v16  ;;  %v10967_v16 = vld [vmem:[#allocation8 + $0x374] ss:$36 sps:$4 sm:$0xff]  }
 0x1ed   :  { %1774 = vmatpush1.bf16.msra.mxu0 %v10881_v17  ;;  %1732 = vmatprep.subr.bf16.mxu1 %v10886_v18  ;;  %v10962_v17 = vld [vmem:[#allocation8 + $0x5b0] ss:$36 sps:$4 sm:$0xff]  }
 0x1ee   :  { %1775 = vmatprep.subr.bf16.mxu0 %v10889_v19  ;;  %v10965_v18 = vld [vmem:[#allocation8 + $0x370] ss:$36 sps:$4 sm:$0xff]  }
 0x1ef   :  { %v10970_v19 = vld [vmem:[#allocation8 + $0x56c] ss:$36 sps:$4 sm:$0xff]  }
 0x1f0   :  { %1733 = vmatpush1.bf16.msra.mxu1 %v10884_v20  ;;  %v10973_v20 = vld [vmem:[#allocation8 + $0x32c] ss:$36 sps:$4 sm:$0xff]  }
 0x1f1   :  { %1776 = vmatpush1.bf16.msra.mxu0 %v10887_v21  ;;  %1734 = vmatprep.subr.bf16.mxu1 %v10892_v22  ;;  %v10968_v21 = vld [vmem:[#allocation8 + $0x568] ss:$36 sps:$4 sm:$0xff]  }
 0x1f2   :  { %1777 = vmatprep.subr.bf16.mxu0 %v10895_v27  ;;  %v10971_v22 = vld [vmem:[#allocation8 + $0x328] ss:$36 sps:$4 sm:$0xff]  }
 0x1f3   :  { %v10976_v27 = vld [vmem:[#allocation8 + $0x524] ss:$36 sps:$4 sm:$0xff]  }
 0x1f4   :  { %1735 = vmatpush1.bf16.msra.mxu1 %v10890_v29  ;;  %v10979_v29 = vld [vmem:[#allocation8 + $0x2e4] ss:$36 sps:$4 sm:$0xff]  }
 0x1f5   :  { %1778 = vmatpush1.bf16.msra.mxu0 %v10893_v30  ;;  %1736 = vmatprep.subr.bf16.mxu1 %v10898_v31  ;;  %v10974_v30 = vld [vmem:[#allocation8 + $0x520] ss:$36 sps:$4 sm:$0xff]  }
 0x1f6   :  { %1806 = vmatprep.subr.bf16.mxu0 %v10901_v35  ;;  %v10977_v31 = vld [vmem:[#allocation8 + $0x2e0] ss:$36 sps:$4 sm:$0xff]  }
 0x1f7   :  { %v10982_v35 = vld [vmem:[#allocation8 + $0x4dc] ss:$36 sps:$4 sm:$0xff]  }
 0x1f8   :  { %1737 = vmatpush2.bf16.msra.mxu1 %v10896_v36  ;;  %1796 = vmatmul.mubr.bf16.vlgmr.msra.gmra.mxu0 %v12524_v42  ;;  %v10985_v36 = vld [vmem:[#allocation8 + $0x29c] ss:$36 sps:$4 sm:$0xff]  }
 0x1f9   :  { %1807 = vmatpush1.bf16.msra.mxu0 %v10899_v37  ;;  %1838 = vmatprep.mubr.bf16.mxu0 %v12522_v60  ;;  %v10980_v37 = vld [vmem:[#allocation8 + $0x4d8] ss:$36 sps:$4 sm:$0xff]  }
 0x1fa   :  { %1738 = vmatprep.subr.bf16.mxu1 %v10904_v38  ;;  %1808 = vmatprep.subr.bf16.mxu0 %v10907_v39  ;;  %v10983_v38 = vld [vmem:[#allocation8 + $0x298] ss:$36 sps:$4 sm:$0xff]  }
 0x1fb   :  { %v10988_v39 = vld [vmem:[#allocation8 + $0x494] ss:$36 sps:$4 sm:$0xff]  }
 0x1fc   :  { %1739 = vmatpush2.bf16.msra.mxu1 %v10902_v43  ;;  %v10991_v43 = vld [vmem:[#allocation8 + $0x254] ss:$36 sps:$4 sm:$0xff]  }
 0x1fd   :  { %1809 = vmatpush1.bf16.msra.mxu0 %v10905_v44  ;;  %1740 = vmatprep.subr.bf16.mxu1 %v10910_v45  ;;  %v10986_v44 = vld [vmem:[#allocation8 + $0x490] ss:$36 sps:$4 sm:$0xff]  }
 0x1fe   :  { %1810 = vmatprep.subr.bf16.mxu0 %v10913_v46  ;;  %v10989_v45 = vld [vmem:[#allocation8 + $0x250] ss:$36 sps:$4 sm:$0xff]  }
 0x1ff   :  { %v10994_v46 = vld [vmem:[#allocation8 + $0x214] ss:$36 sps:$4 sm:$0xff]  }
 0x200   :  { %1741 = vmatpush2.bf16.msra.mxu1 %v10908_v47  ;;  %v10997_v47 = vld [vmem:[#allocation8 + $0x694] ss:$36 sps:$4 sm:$0xff]  }
 0x201   :  { %1811 = vmatpush1.bf16.msra.mxu0 %v10911_v33  ;;  %1742 = vmatprep.subr.bf16.mxu1 %v10916_v48  ;;  %v10992_v33 = vld [vmem:[#allocation8 + $0x210] ss:$36 sps:$4 sm:$0xff]  }
 0x202   :  { %1812 = vmatprep.subr.bf16.mxu0 %v10919_v49  ;;  %v10995_v48 = vld [vmem:[#allocation8 + $0x690] ss:$36 sps:$4 sm:$0xff]  }
 0x203   :  { %v11000_v49 = vld [vmem:[#allocation8 + $0x1cc] ss:$36 sps:$4 sm:$0xff]  }
 0x204   :  { %1743 = vmatpush2.bf16.msra.mxu1 %v10914_v34  ;;  %v11003_v34 = vld [vmem:[#allocation8 + $0x64c] ss:$36 sps:$4 sm:$0xff]  }
 0x205   :  { %1813 = vmatpush1.bf16.msra.mxu0 %v10917_v50  ;;  %1744 = vmatprep.subr.bf16.mxu1 %v10922_v51  ;;  %v10998_v50 = vld [vmem:[#allocation8 + $0x1c8] ss:$36 sps:$4 sm:$0xff]  }
 0x206   :  { %1814 = vmatprep.subr.bf16.mxu0 %v10925_v32  ;;  %v11001_v51 = vld [vmem:[#allocation8 + $0x648] ss:$36 sps:$4 sm:$0xff]  }
 0x207   :  { %v11006_v32 = vld [vmem:[#allocation8 + $0x184] ss:$36 sps:$4 sm:$0xff]  }
 0x208   :  { %1745 = vmatpush2.bf16.msra.mxu1 %v10920_v52  ;;  %v11009_v52 = vld [vmem:[#allocation8 + $0x604] ss:$36 sps:$4 sm:$0xff]  }
 0x209   :  { %1815 = vmatpush1.bf16.msra.mxu0 %v10923_v53  ;;  %1746 = vmatprep.subr.bf16.mxu1 %v10928_v54  ;;  %v11004_v53 = vld [vmem:[#allocation8 + $0x180] ss:$36 sps:$4 sm:$0xff]  }
 0x20a   :  { %1816 = vmatprep.subr.bf16.mxu0 %v10931_v55  ;;  %v11007_v54 = vld [vmem:[#allocation8 + $0x600] ss:$36 sps:$4 sm:$0xff]  }
 0x20b   :  { %v11012_v55 = vld [vmem:[#allocation8 + $0x13c] ss:$36 sps:$4 sm:$0xff]  }
 0x20c   :  { %1747 = vmatpush2.bf16.msra.mxu1 %v10926_v56  ;;  %v11015_v56 = vld [vmem:[#allocation8 + $0x5bc] ss:$36 sps:$4 sm:$0xff]  }
 0x20d   :  { %1817 = vmatpush1.bf16.msra.mxu0 %v10929_v57  ;;  %1748 = vmatprep.subr.bf16.mxu1 %v10934_v58  ;;  %v11010_v57 = vld [vmem:[#allocation8 + $0x138] ss:$36 sps:$4 sm:$0xff]  }
 0x20e   :  { %1818 = vmatprep.subr.bf16.mxu0 %v10937_v59  ;;  %v11013_v58 = vld [vmem:[#allocation8 + $0x5b8] ss:$36 sps:$4 sm:$0xff]  }
 0x20f   :  { %v11018_v59 = vld [vmem:[#allocation8 + $0xf4] ss:$36 sps:$4 sm:$0xff]  }
 0x210   :  { %1749 = vmatpush2.bf16.msra.mxu1 %v10932_v41  ;;  %v11021_v41 = vld [vmem:[#allocation8 + $0x574] ss:$36 sps:$4 sm:$0xff]  }
 0x211   :  { %1819 = vmatpush1.bf16.msra.mxu0 %v10935_v61  ;;  %1750 = vmatprep.subr.bf16.mxu1 %v10940_v40  ;;  %v11016_v61 = vld [vmem:[#allocation8 + $0xf0] ss:$36 sps:$4 sm:$0xff]  }
 0x212   :  { %1820 = vmatprep.subr.bf16.mxu0 %v10943_v63  ;;  %v11019_v40 = vld [vmem:[#allocation8 + $0x570] ss:$36 sps:$4 sm:$0xff]  }
 0x213   :  { %v11024_v63 = vld [vmem:[#allocation8 + $0xac] ss:$36 sps:$4 sm:$0xff]  }
 0x214   :  { %1751 = vmatpush2.bf16.msra.mxu1 %v10938_v0  ;;  %v11027_v0 = vld [vmem:[#allocation8 + $0x52c] ss:$36 sps:$4 sm:$0xff]  }
 0x215   :  { %1821 = vmatpush1.bf16.msra.mxu0 %v10941_v1  ;;  %1849 = vmatprep.subr.bf16.mxu1 %v10946_v2  ;;  %v11022_v1 = vld [vmem:[#allocation8 + $0xa8] ss:$36 sps:$4 sm:$0xff]  }
 0x216   :  { %1822 = vmatprep.subr.bf16.mxu0 %v10949_v3  ;;  %v11025_v2 = vld [vmem:[#allocation8 + $0x528] ss:$36 sps:$4 sm:$0xff]  }
 0x217   :  { %1753 = vmatmul.mubr.bf16.vlgmr.msra.gmra.mxu1 %v12526_v62  ;;  %v11030_v3 = vld [vmem:[#allocation8 + $0x64] ss:$36 sps:$4 sm:$0xff]  }
 0x218   :  { %1850 = vmatpush1.bf16.msra.mxu1 %v10944_v4  ;;  %1881 = vmatprep.mubr.bf16.mxu1 %v12358_v9  ;;  %v11033_v4 = vld [vmem:[#allocation8 + $0x4e4] ss:$36 sps:$4 sm:$0xff]  }
 0x219   :  { %1823 = vmatpush2.bf16.msra.mxu0 %v10947_v5  ;;  %1851 = vmatprep.subr.bf16.mxu1 %v10952_v6  ;;  %v11028_v5 = vld [vmem:[#allocation8 + $0x60] ss:$36 sps:$4 sm:$0xff]  }
 0x21a   :  { %1824 = vmatprep.subr.bf16.mxu0 %v10955_v7  ;;  %v11031_v6 = vld [vmem:[#allocation8 + $0x4e0] ss:$36 sps:$4 sm:$0xff]  }
 0x21b   :  { %v11036_v7 = vld [vmem:[#allocation8 + $0x1c] ss:$36 sps:$4 sm:$0xff]  }
 0x21c   :  { %1852 = vmatpush1.bf16.msra.mxu1 %v10950_v8  ;;  %v11039_v8 = vld [vmem:[#allocation8 + $0x49c] ss:$36 sps:$4 sm:$0xff]  }
 0x21d   :  { %1825 = vmatpush2.bf16.msra.mxu0 %v10953_v10  ;;  %1853 = vmatprep.subr.bf16.mxu1 %v10958_v11  ;;  %v11034_v10 = vld [vmem:[#allocation8 + $0x18] ss:$36 sps:$4 sm:$0xff]  }
 0x21e   :  { %1826 = vmatprep.subr.bf16.mxu0 %v10961_v12  ;;  %v11037_v11 = vld [vmem:[#allocation8 + $0x498] ss:$36 sps:$4 sm:$0xff]  }
 0x21f   :  { %v11042_v12 = vld [vmem:[#allocation8 + $0x454] ss:$36 sps:$4 sm:$0xff]  }
 0x220   :  { %1854 = vmatpush1.bf16.msra.mxu1 %v10956_v13  ;;  %v11043_v13 = vld [vmem:[#allocation8 + $0x458] ss:$36 sps:$4 sm:$0xff]  }
 0x221   :  { %1827 = vmatpush2.bf16.msra.mxu0 %v10959_v14  ;;  %1855 = vmatprep.subr.bf16.mxu1 %v10964_v15  ;;  %v11040_v14 = vld [vmem:[#allocation8 + $0x450] ss:$36 sps:$4 sm:$0xff]   ;;  %v11044_v15 = vld [vmem:[#allocation8 + $0x218] ss:$36 sps:$4 sm:$0xff]  }
 0x222   :  { %1828 = vmatprep.subr.bf16.mxu0 %v10967_v16  ;;  %v11047_v16 = vld [vmem:[#allocation8 + $0x40c] ss:$36 sps:$4 sm:$0xff]  }
 0x224   :  { %1856 = vmatpush1.bf16.msra.mxu1 %v10962_v17  ;;  %v11048_v17 = vld [vmem:[#allocation8 + $0x410] ss:$36 sps:$4 sm:$0xff]  }
 0x225   :  { %1829 = vmatpush2.bf16.msra.mxu0 %v10965_v18  ;;  %1857 = vmatprep.subr.bf16.mxu1 %v10970_v19  ;;  %v11045_v18 = vld [vmem:[#allocation8 + $0x408] ss:$36 sps:$4 sm:$0xff]   ;;  %v11049_v19 = vld [vmem:[#allocation8 + $0x1d0] ss:$36 sps:$4 sm:$0xff]  }
 0x226   :  { %1830 = vmatprep.subr.bf16.mxu0 %v10973_v20  ;;  %v11052_v20 = vld [vmem:[#allocation8 + $0x3c4] ss:$36 sps:$4 sm:$0xff]  }
 0x228   :  { %1858 = vmatpush1.bf16.msra.mxu1 %v10968_v21  ;;  %v11053_v21 = vld [vmem:[#allocation8 + $0x3c8] ss:$36 sps:$4 sm:$0xff]  }
 0x229   :  { %1831 = vmatpush2.bf16.msra.mxu0 %v10971_v22  ;;  %1859 = vmatprep.subr.bf16.mxu1 %v10976_v27  ;;  %v11050_v22 = vld [vmem:[#allocation8 + $0x3c0] ss:$36 sps:$4 sm:$0xff]   ;;  %v11054_v27 = vld [vmem:[#allocation8 + $0x188] ss:$36 sps:$4 sm:$0xff]  }
 0x22a   :  { %1832 = vmatprep.subr.bf16.mxu0 %v10979_v29  ;;  %v11057_v29 = vld [vmem:[#allocation8 + $0x37c] ss:$36 sps:$4 sm:$0xff]  }
 0x22c   :  { %1860 = vmatpush1.bf16.msra.mxu1 %v10974_v30  ;;  %v11058_v30 = vld [vmem:[#allocation8 + $0x380] ss:$36 sps:$4 sm:$0xff]  }
 0x22d   :  { %1833 = vmatpush2.bf16.msra.mxu0 %v10977_v31  ;;  %1861 = vmatprep.subr.bf16.mxu1 %v10982_v35  ;;  %v11055_v31 = vld [vmem:[#allocation8 + $0x378] ss:$36 sps:$4 sm:$0xff]   ;;  %v11059_v35 = vld [vmem:[#allocation8 + $0x140] ss:$36 sps:$4 sm:$0xff]  }
 0x22e   :  { %1834 = vmatprep.subr.bf16.mxu0 %v10985_v36  ;;  %v11062_v36 = vld [vmem:[#allocation8 + $0x334] ss:$36 sps:$4 sm:$0xff]  }
 0x230   :  { %1862 = vmatpush1.bf16.msra.mxu1 %v10980_v37  ;;  %v11060_v37 = vld [vmem:[#allocation8 + $0x330] ss:$36 sps:$4 sm:$0xff]  }
 0x231   :  { %1835 = vmatpush2.bf16.msra.mxu0 %v10983_v38  ;;  %1863 = vmatprep.subr.bf16.mxu1 %v10988_v39  ;;  %v11064_v38 = vld [vmem:[#allocation8 + $0xf8] ss:$36 sps:$4 sm:$0xff]   ;;  %v11067_v39 = vld [vmem:[#allocation8 + $0x2ec] ss:$36 sps:$4 sm:$0xff]  }
 0x232   :  { %1836 = vmatprep.subr.bf16.mxu0 %v10991_v43  ;;  %v11068_v43 = vld [vmem:[#allocation8 + $0x2f0] ss:$36 sps:$4 sm:$0xff]  }
 0x234   :  { %1864 = vmatpush1.bf16.msra.mxu1 %v10986_v44  ;;  %v11065_v44 = vld [vmem:[#allocation8 + $0x2e8] ss:$36 sps:$4 sm:$0xff]  }
 0x235   :  { %1837 = vmatpush2.bf16.msra.mxu0 %v10989_v45  ;;  %1892 = vmatprep.subr.bf16.mxu1 %v10994_v46  ;;  %v11069_v45 = vld [vmem:[#allocation8 + $0xb0] ss:$36 sps:$4 sm:$0xff]   ;;  %v11072_v46 = vld [vmem:[#allocation8 + $0x2a4] ss:$36 sps:$4 sm:$0xff]  }
 0x236   :  { %1935 = vmatprep.subr.bf16.mxu0 %v10997_v47  ;;  %v11073_v47 = vld [vmem:[#allocation8 + $0x2a8] ss:$36 sps:$4 sm:$0xff]  }
 0x237   :  { %1882 = vmatmul.mubr.bf16.vlgmr.msra.gmra.mxu1 %v12524_v42 }
 0x238   :  { %1839 = vmatmul.mubr.bf16.vlgmr.msra.gmra.mxu0 %v12526_v62  ;;  %1893 = vmatpush1.bf16.msra.mxu1 %v10992_v33  ;;  %v11070_v33 = vld [vmem:[#allocation8 + $0x2a0] ss:$36 sps:$4 sm:$0xff]  }
 0x239   :  { %1924 = vmatprep.mubr.bf16.mxu1 %v12522_v60  ;;  %1936 = vmatpush1.bf16.msra.mxu0 %v10995_v48  ;;  %v11074_v48 = vld [vmem:[#allocation8 + $0x68] ss:$36 sps:$4 sm:$0xff]  }
 0x23a   :  { %1894 = vmatprep.subr.bf16.mxu1 %v11000_v49  ;;  %1937 = vmatprep.subr.bf16.mxu0 %v11003_v34  ;;  %v11077_v49 = vld [vmem:[#allocation8 + $0x25c] ss:$36 sps:$4 sm:$0xff]  }
 0x23b   :  { %1967 = vmatprep.mubr.bf16.mxu0 %v12358_v9  ;;  %v11078_v34 = vld [vmem:[#allocation8 + $0x260] ss:$36 sps:$4 sm:$0xff]  }
 0x23c   :  { %1895 = vmatpush1.bf16.msra.mxu1 %v10998_v50  ;;  %v11075_v50 = vld [vmem:[#allocation8 + $0x258] ss:$36 sps:$4 sm:$0xff]  }
 0x23d   :  { %1938 = vmatpush1.bf16.msra.mxu0 %v11001_v51  ;;  %1896 = vmatprep.subr.bf16.mxu1 %v11006_v32  ;;  %v11079_v51 = vld [vmem:[#allocation8 + $0x20] ss:$36 sps:$4 sm:$0xff]   ;;  %v11080_v32 = vld [vmem:[#allocation8 + $0x698] ss:$36 sps:$4 sm:$0xff]  }
 0x23e   :  { %1939 = vmatprep.subr.bf16.mxu0 %v11009_v52  ;;  %v12359_v52 = vmov 0.0  }
 0x240   :  { %1897 = vmatpush1.bf16.msra.mxu1 %v11004_v53  ;;  %v11081_v53 = vld [vmem:[#allocation8 + $0x650] ss:$36 sps:$4 sm:$0xff]  }
 0x241   :  { %1940 = vmatpush1.bf16.msra.mxu0 %v11007_v54  ;;  %1898 = vmatprep.subr.bf16.mxu1 %v11012_v55  ;;  %v11082_v54 = vld [vmem:[#allocation8 + $0x608] ss:$36 sps:$4 sm:$0xff]   ;;  %v11083_v55 = vld [vmem:[#allocation8 + $0x5c0] ss:$36 sps:$4 sm:$0xff]  }
 0x242   :  { %1941 = vmatprep.subr.bf16.mxu0 %v11015_v56  ;;  %v11085_v56 = vld [vmem:[#allocation8 + $0x530] ss:$36 sps:$4 sm:$0xff]  }
 0x244   :  { %1899 = vmatpush1.bf16.msra.mxu1 %v11010_v57  ;;  %v11086_v57 = vld [vmem:[#allocation8 + $0x4e8] ss:$36 sps:$4 sm:$0xff]  }
 0x245   :  { %1942 = vmatpush1.bf16.msra.mxu0 %v11013_v58  ;;  %1900 = vmatprep.subr.bf16.mxu1 %v11018_v59  ;;  %v11087_v58 = vld [vmem:[#allocation8 + $0x4a0] ss:$36 sps:$4 sm:$0xff]  }
 0x246   :  { %1943 = vmatprep.subr.bf16.mxu0 %v11021_v41 }
 0x248   :  { %1901 = vmatpush1.bf16.msra.mxu1 %v11016_v61 }
 0x249   :  { %1944 = vmatpush1.bf16.msra.mxu0 %v11019_v40  ;;  %1902 = vmatprep.subr.bf16.mxu1 %v11024_v63 }
 0x24a   :  { %1945 = vmatprep.subr.bf16.mxu0 %v11027_v0 }
 0x24c   :  { %1903 = vmatpush1.bf16.msra.mxu1 %v11022_v1 }
 0x24d   :  { %1946 = vmatpush1.bf16.msra.mxu0 %v11025_v2  ;;  %1904 = vmatprep.subr.bf16.mxu1 %v11030_v3 }
 0x24e   :  { %1947 = vmatprep.subr.bf16.mxu0 %v11033_v4 }
 0x250   :  { %1905 = vmatpush1.bf16.msra.mxu1 %v11028_v5 }
 0x251   :  { %1948 = vmatpush1.bf16.msra.mxu0 %v11031_v6  ;;  %1906 = vmatprep.subr.bf16.mxu1 %v11036_v7 }
 0x252   :  { %1949 = vmatprep.subr.bf16.mxu0 %v11039_v8 }
 0x254   :  { %1907 = vmatpush1.bf16.msra.mxu1 %v11034_v10 }
 0x255   :  { %1950 = vmatpush1.bf16.msra.mxu0 %v11037_v11  ;;  %1908 = vmatprep.subr.bf16.mxu1 %v11042_v12 }
 0x256   :  { %10274 = vmatprep.subr.bf16.mxu0 %v11043_v13 }
 0x258   :  { %1909 = vmatpush2.bf16.msra.mxu1 %v11040_v14  ;;  %1968 = vmatmul.mubr.bf16.vlgmr.msra.gmra.mxu0 %v12524_v42 }
 0x259   :  { %10275 = vmatpush3.bf16.msra.mxu0 %v11044_v15  ;;  %2010 = vmatprep.mubr.bf16.mxu0 %v12522_v60  ;;  %v11063_v60 = vld [vmem:[#allocation8 + $0x338] ss:$36 sps:$4 sm:$0xff]  }
 0x25a   :  { %1910 = vmatprep.subr.bf16.mxu1 %v11047_v16  ;;  %10276 = vmatprep.subr.bf16.mxu0 %v11048_v17 }
 0x25c   :  { %1911 = vmatpush2.bf16.msra.mxu1 %v11045_v18 }
 0x25d   :  { %10277 = vmatpush3.bf16.msra.mxu0 %v11049_v19  ;;  %1912 = vmatprep.subr.bf16.mxu1 %v11052_v20 }
 0x25e   :  { %10278 = vmatprep.subr.bf16.mxu0 %v11053_v21 }
 0x260   :  { %1913 = vmatpush2.bf16.msra.mxu1 %v11050_v22 }
 0x261   :  { %10279 = vmatpush3.bf16.msra.mxu0 %v11054_v27  ;;  %1914 = vmatprep.subr.bf16.mxu1 %v11057_v29 }
 0x262   :  { %10280 = vmatprep.subr.bf16.mxu0 %v11058_v30 }
 0x264   :  { %1915 = vmatpush2.bf16.msra.mxu1 %v11055_v31 }
 0x265   :  { %10281 = vmatpush3.bf16.msra.mxu0 %v11059_v35  ;;  %1916 = vmatprep.subr.bf16.mxu1 %v11062_v36 }
 0x266   :  { %10282 = vmatprep.subr.bf16.mxu0 %v11063_v60 }
 0x268   :  { %1917 = vmatpush2.bf16.msra.mxu1 %v11060_v37 }
 0x269   :  { %10283 = vmatpush3.bf16.msra.mxu0 %v11064_v38  ;;  %1918 = vmatprep.subr.bf16.mxu1 %v11067_v39 }
 0x26a   :  { %10284 = vmatprep.subr.bf16.mxu0 %v11068_v43 }
 0x26c   :  { %1919 = vmatpush2.bf16.msra.mxu1 %v11065_v44 }
 0x26d   :  { %10285 = vmatpush3.bf16.msra.mxu0 %v11069_v45  ;;  %1920 = vmatprep.subr.bf16.mxu1 %v11072_v46 }
 0x26e   :  { %10286 = vmatprep.subr.bf16.mxu0 %v11073_v47 }
 0x270   :  { %1921 = vmatpush2.bf16.msra.mxu1 %v11070_v33 }
 0x271   :  { %10287 = vmatpush3.bf16.msra.mxu0 %v11074_v48  ;;  %1922 = vmatprep.subr.bf16.mxu1 %v11077_v49 }
 0x272   :  { %10288 = vmatprep.subr.bf16.mxu0 %v11078_v34 }
 0x274   :  { %1923 = vmatpush2.bf16.msra.mxu1 %v11075_v50 }
 0x275   :  { %10289 = vmatpush3.bf16.msra.mxu0 %v11079_v51  ;;  %10515 = vmatprep.subr.bf16.mxu1 %v12359_v52 }
 0x276   :  { %10535 = vmatprep.subr.bf16.mxu0 %v12359_v52 }
 0x277   :  { %1925 = vmatmul.mubr.bf16.vlgmr.msra.gmra.mxu1 %v12526_v62 }
 0x278   :  { %2011 = vmatmul.mubr.bf16.vlgmr.msra.gmra.mxu0 %v12526_v62  ;;  %10516 = vmatpush3.bf16.msra.mxu1 %v11080_v32  ;;  %v11084_v62 = vld [vmem:[#allocation8 + $0x578] ss:$36 sps:$4 sm:$0xff]  }
 0x279   :  { %10517 = vmatprep.subr.bf16.mxu1 %v12359_v52  ;;  %10531 = vmatprep.mubr.msk.bf16.mxu1 %vm12360_vm0, %v12359_v52 }
 0x27a   :  { %10537 = vmatprep.mubr.msk.bf16.mxu0 %vm12360_vm0, %v12359_v52 }
 0x27c   :  { %10518 = vmatpush3.bf16.msra.mxu1 %v11081_v53 }
 0x27d   :  { %10519 = vmatprep.subr.bf16.mxu1 %v12359_v52 }
 0x280   :  { %10520 = vmatpush3.bf16.msra.mxu1 %v11082_v54 }
 0x281   :  { %10521 = vmatprep.subr.bf16.mxu1 %v12359_v52 }
 0x284   :  { %10522 = vmatpush3.bf16.msra.mxu1 %v11083_v55 }
 0x285   :  { %10523 = vmatprep.subr.bf16.mxu1 %v12359_v52 }
 0x288   :  { %10524 = vmatpush3.bf16.msra.mxu1 %v11084_v62 }
 0x289   :  { %10525 = vmatprep.subr.bf16.mxu1 %v12359_v52 }
 0x28c   :  { %10526 = vmatpush3.bf16.msra.mxu1 %v11085_v56 }
 0x28d   :  { %10527 = vmatprep.subr.bf16.mxu1 %v12359_v52 }
 0x290   :  { %10528 = vmatpush3.bf16.msra.mxu1 %v11086_v57 }
 0x291   :  { %10529 = vmatprep.subr.bf16.mxu1 %v12359_v52 }
 0x294   :  { %10530 = vmatpush3.bf16.msra.mxu1 %v11087_v58 }
 0x295   :  { %10541 = vmatprep.subr.bf16.mxu1 %v12359_v52 }
 0x297   :  { %10532 = vmatmul.mubr.bf16.vlgmr.msra.gmra.mxu1 %v12524_v42  ;;  %v1711_v59 = vpop.f32.mrf.mxu1 }
 0x298   :  { %v1668_v41 = vpop.f32.mrf.mxu0  ;;  %10543 = vmatprep.mubr.msk.bf16.mxu1 %vm12360_vm0, %v12359_v52 }
 0x299   :  { %v1713_v61 = vpop.f32.mrf.mxu1  ;;  %v1712_v18 = vadd.f32 %v1711_v59, %v1668_v41 }
 0x29a   :  { %v1670_v40 = vpop.f32.mrf.mxu0 }
 0x29b   :  { %v12562_v63 = vadd.f32 %v1713_v61, %v1670_v40  ;;  %v1715_v2 = vpop.f32.mrf.mxu1  ;;  %v12581_v21 = vpack.c.bf16 %v1712_v18, %v1712_v18 }
 0x29c   :  { %v1672_v0 = vpop.f32.mrf.mxu0 }
 0x29d   :  { %v12566_v4 = vpop.f32.mrf.mxu1  ;;  %v1716_v22 = vadd.f32 %v1715_v2, %v1672_v0 }
 0x29e   :  { %v12564_v1 = vpop.f32.mrf.mxu0 }
 0x29f   :  { %v12588_v27 = vpack.c.bf16 %v1716_v22, %v1716_v22 }
 0x2b8   :  { %v1797_v3 = vpop.f32.mrf.mxu0 }
 0x2ba   :  { %v1799_v5 = vpop.f32.mrf.mxu0 }
 0x2bc   :  { %v1801_v42 = vpop.f32.mrf.mxu0 }
 0x2be   :  { %v1803_v14 = vpop.f32.mrf.mxu0 }
 0x2d7   :  { %v1754_v6 = vpop.f32.mrf.mxu1 }
 0x2d8   :  { %v12568_v7 = vadd.f32 %v1797_v3, %v1754_v6 }
 0x2d9   :  { %v1756_v8 = vpop.f32.mrf.mxu1 }
 0x2da   :  { %v1800_v10 = vadd.f32 %v1799_v5, %v1756_v8  ;;  %v2081_v8 = vand.u32 127, %v244_v23 }
 0x2db   :  { %v1758_v11 = vpop.f32.mrf.mxu1 }
 0x2dc   :  { %v12570_v12 = vpack.c.bf16 %v1800_v10, %v1800_v10  ;;  %v12572_v13 = vadd.f32 %v1801_v42, %v1758_v11  ;;  %vm12626_vm3 = vcmp.ge.s32.totalorder %v12499_v24, %v2081_v8 }
 0x2dd   :  { %v1760_v15 = vpop.f32.mrf.mxu1 }
 0x2de   :  { %v2088_v16 = vsel %vm2083_vm1, %v12570_v12, 0  ;;  %v1804_v17 = vadd.f32 %v1803_v14, %v1760_v15 }
 0x2df   :  { %10536 = vmatpush3.bf16.xpose.msra.mxu0 %v2088_v16 }
 0x2e0   :  { %v12576_v19 = vpack.c.bf16 %v1804_v17, %v1804_v17  ;;  %10547 = vmatprep.subr.bf16.mxu0 %v12359_v52 }
 0x2e2   :  { %v2134_v20 = vsel %vm2083_vm1, %v12576_v19, 0 }
 0x2e3   :  { %10542 = vmatpush3.bf16.xpose.msra.mxu1 %v2134_v20 }
 0x2e4   :  { %10553 = vmatprep.subr.bf16.mxu1 %v12359_v52 }
 0x2e6   :  { %10538 = vmatmul.mubr.msk.bf16.vlgmr.msra.gmra.mxu0 %vm2083_vm1, %v12581_v21 }
 0x2e7   :  { %10549 = vmatprep.mubr.msk.bf16.mxu0 %vm12360_vm0, %v12359_v52 }
 0x2ea   :  { %10544 = vmatmul.mubr.msk.bf16.vlgmr.msra.gmra.mxu1 %vm2083_vm1, %v12588_v27 }
 0x2eb   :  { %10555 = vmatprep.mubr.msk.bf16.mxu1 %vm12360_vm0, %v12359_v52 }
 0x2f7   :  { %v1883_v29 = vpop.f32.mrf.mxu1 }
 0x2f8   :  { %v1840_v30 = vpop.f32.mrf.mxu0 }
 0x2f9   :  { %v12594_v31 = vadd.f32 %v1883_v29, %v1840_v30  ;;  %v1885_v35 = vpop.f32.mrf.mxu1 }
 0x2fa   :  { %v1842_v36 = vpop.f32.mrf.mxu0 }
 0x2fb   :  { %v12596_v60 = vadd.f32 %v1885_v35, %v1842_v36  ;;  %v1887_v37 = vpop.f32.mrf.mxu1 }
 0x2fc   :  { %v1844_v38 = vpop.f32.mrf.mxu0 }
 0x2fd   :  { %v12598_v39 = vadd.f32 %v1887_v37, %v1844_v38  ;;  %v12602_v47 = vpop.f32.mrf.mxu1 }
 0x2fe   :  { %v12600_v43 = vpop.f32.mrf.mxu0 }
 0x318   :  { %v1969_v44 = vpop.f32.mrf.mxu0 }
 0x31a   :  { %v1971_v45 = vpop.f32.mrf.mxu0 }
 0x31c   :  { %v1973_v46 = vpop.f32.mrf.mxu0 }
 0x31e   :  { %v12604_v33 = vpop.f32.mrf.mxu0 }
 0x337   :  { %v1926_v48 = vpop.f32.mrf.mxu1 }
 0x338   :  { %v1970_v49 = vadd.f32 %v1969_v44, %v1926_v48  ;;  %v10290_v34 = vpop.f32.mrf.mxu0 }
 0x339   :  { %v1928_v50 = vpop.f32.mrf.mxu1 }
 0x33a   :  { %v12606_v51 = vpack.c.bf16 %v1970_v49, %v1970_v49  ;;  %v12608_v32 = vadd.f32 %v1971_v45, %v1928_v50  ;;  %v10291_v53 = vpop.f32.mrf.mxu0 }
 0x33b   :  { %v10292_v54 = vadd.f32 %v10291_v53, %v10290_v34  ;;  %v1930_v55 = vpop.f32.mrf.mxu1 }
 0x33c   :  { %v2210_v62 = vsel %vm2208_vm2, %v12606_v51, 0  ;;  %v1974_v56 = vadd.f32 %v1973_v46, %v1930_v55  ;;  %v10293_v59 = vpop.f32.mrf.mxu0 }
 0x33d   :  { %10548 = vmatpush3.bf16.msra.mxu0 %v2210_v62  ;;  %v12618_v41 = vpop.f32.mrf.mxu1 }
 0x33e   :  { %v12612_v57 = vpack.c.bf16 %v1974_v56, %v1974_v56  ;;  %10559 = vmatprep.subr.bf16.mxu0 %v12359_v52  ;;  %v10294_v61 = vpop.f32.mrf.mxu0 }
 0x33f   :  { %v10295_v3 = vadd.f32 %v10294_v61, %v10293_v59 }
 0x340   :  { %v2256_v58 = vsel %vm2208_vm2, %v12612_v57, 0 }
 0x341   :  { %10554 = vmatpush3.bf16.msra.mxu1 %v2256_v58 }
 0x342   :  { %10565 = vmatprep.subr.bf16.mxu1 %v12359_v52 }
 0x357   :  { %v2053_v40 = vpop.f32.mrf.mxu1 }
 0x358   :  { %v12620_v0 = vadd.f32 %v10292_v54, %v2053_v40 }
 0x359   :  { %v10533_v2 = vpop.f32.mrf.mxu1 }
 0x35b   :  { %v2056_v5 = vpop.f32.mrf.mxu1 }
 0x35c   :  { %v12622_v6 = vadd.f32 %v10295_v3, %v2056_v5 }
 0x35d   :  { %v10534_v42 = vpop.f32.mrf.mxu1 }
 0x3a6   :  { %v2124_v11 = vpop.f32.mrf.mxu0 }
 0x3a7   :  { %v2178_v14 = vsel %vm12626_vm3, %v2124_v11, -1e+30 }
 0x3a8   :  { %v10539_v15 = vpop.f32.mrf.mxu0  ;;  %v2181_v16 = vsel %vm2180_vm4, %v2178_v14, -inf }
 0x3a9   :  { %2182 = vmax.xlane.f32.xlu0 %v2181_v16 }
 0x3aa   :  { %v2127_v17 = vpop.f32.mrf.mxu0  ;;  %v2170_v18 = vpop.f32.mrf.mxu1 }
 0x3ab   :  { %v2179_v20 = vsel %vm12626_vm3, %v2170_v18, -1e+30 }
 0x3ac   :  { %v10540_v23 = vpop.f32.mrf.mxu0  ;;  %v10545_v22 = vpop.f32.mrf.mxu1  ;;  %v2184_v29 = vsel %vm2180_vm4, %v2179_v20, -inf }
 0x3ad   :  { %2185 = vmax.xlane.f32.xlu1 %v2184_v29 }
 0x3ae   :  { %v2173_v30 = vpop.f32.mrf.mxu1 }
 0x3b0   :  { %v10546_v35 = vpop.f32.mrf.mxu1 }
 0x3be   :  { %2371 = vrot.lane.b32.xlu1 %v12576_v19, %s12361_s10 }
 0x432   :  { %v2183_v36 = vpop.xlane.xlu0 %2182 }
 0x433   :  { %v2187_v37 = vsub.f32 %v2178_v14, %v2183_v36 }
 0x435   :  { %v2189_v38 = vmul.f32 1.442695, %v2187_v37 }
 0x436   :  { %v2186_v44 = vpop.xlane.xlu1 %2185 }
 0x437   :  { %12004 = vpow2.f32 %v2189_v38  ;;  %v2188_v45 = vsub.f32 %v2179_v20, %v2186_v44 }
 0x439   :  { %v2191_v46 = vmul.f32 1.442695, %v2188_v45 }
 0x43a   :  { %v2372_v19 = vpop.permute.xlu1 %2371 }
 0x43b   :  { %12006 = vpow2.f32 %v2191_v46 }
 0x444   :  { %v12005_v48 = vpop.eup %12004 }
 0x445   :  { %v2193_v49 = vsel %vm2180_vm4, %v12005_v48, 0.0 }
 0x446   :  { %2194 = vadd.xlane.f32.xlu0 %v2193_v49 }
 0x448   :  { %v12007_v34 = vpop.eup %12006 }
 0x449   :  { %v2196_v50 = vsel %vm2180_vm4, %v12007_v34, 0.0 }
 0x44a   :  { %2197 = vadd.xlane.f32.xlu1 %v2196_v50 }
 0x45b   :  { %2316 = vrot.lane.b32.xlu1 %v12581_v21, %s12361_s10 }
 0x45c   :  { %2319 = vrot.lane.b32.xlu0 %v12570_v12, %s12361_s10 }
 0x45f   :  { %2368 = vrot.lane.b32.xlu1 %v12588_v27, %s12361_s10  ;;  %v2377_v27 = vsel %vm2083_vm1, %v2372_v19, 0 }
 0x4cf   :  { %v2195_v53 = vpop.xlane.xlu0 %2194 }
 0x4d0   :  { %12008 = vrcp.f32 %v2195_v53 }
 0x4d3   :  { %v2198_v54 = vpop.xlane.xlu1 %2197  ;;  %v2320_v56 = vpop.permute.xlu0 %2319 }
 0x4d4   :  { %12010 = vrcp.f32 %v2198_v54  ;;  %v2325_v61 = vsel %vm2083_vm1, %v2320_v56, 0 }
 0x4d7   :  { %v2317_v40 = vpop.permute.xlu1 %2316 }
 0x4db   :  { %v2369_v2 = vpop.permute.xlu1 %2368 }
 0x4dd   :  { %v12009_v55 = vpop.eup %12008 }
 0x4de   :  { %v2201_v62 = vmul.f32 %v12009_v55, %v12005_v48 }
 0x4e0   :  { %v2203_v58 = vpack.c.bf16 %v2201_v62, %v2201_v62 }
 0x4e1   :  { %v12011_v59 = vpop.eup %12010 }
 0x4e2   :  { %10550 = vmatmul.mubr.msk.bf16.vlgmr.msra.gmra.mxu0 %vm2180_vm4, %v2203_v58  ;;  %v2202_v21 = vmul.f32 %v12011_v59, %v12007_v34 }
 0x4e3   :  { %10560 = vmatpush3.bf16.xpose.msra.mxu0 %v2325_v61  ;;  %10561 = vmatprep.mubr.msk.bf16.mxu0 %vm12360_vm0, %v12359_v52  ;;  %v11090_v61 = vld [vmem:[#allocation10 + $0xac] ss:$12 sps:$4 sm:$0xff]  }
 0x4e4   :  { %v2204_v12 = vpack.c.bf16 %v2202_v21, %v2202_v21  ;;  %10571 = vmatprep.subr.bf16.mxu0 %v12359_v52 }
 0x4e6   :  { %10556 = vmatmul.mubr.msk.bf16.vlgmr.msra.gmra.mxu1 %vm2180_vm4, %v2204_v12 }
 0x4e7   :  { %10566 = vmatpush3.bf16.xpose.msra.mxu1 %v2377_v27  ;;  %10567 = vmatprep.mubr.msk.bf16.mxu1 %vm12360_vm0, %v12359_v52 }
 0x4e8   :  { %10577 = vmatprep.subr.bf16.mxu1 %v12359_v52 }
 0x4ea   :  { %10562 = vmatmul.mubr.msk.bf16.vlgmr.msra.gmra.mxu0 %vm2083_vm1, %v2317_v40 }
 0x4eb   :  { %10573 = vmatprep.mubr.msk.bf16.mxu0 %vm12360_vm0, %v12359_v52 }
 0x4ee   :  { %10568 = vmatmul.mubr.msk.bf16.vlgmr.msra.gmra.mxu1 %vm2083_vm1, %v2369_v2  ;;  %v11088_v2 = vld [vmem:[#allocation10 + $0xa8] ss:$12 sps:$4 sm:$0xff]  }
 0x4ef   :  { %10579 = vmatprep.mubr.msk.bf16.mxu1 %vm12360_vm0, %v12359_v52 }
 0x5a2   :  { %v2246_v3 = vpop.f32.mrf.mxu0 }
 0x5a4   :  { %v10551_v5 = vpop.f32.mrf.mxu0 }
 0x5a5   :  { %v11094_v5 = vld [vmem:[#allocation10 + $0x94] ss:$12 sps:$4 sm:$0xff]  }
 0x5a6   :  { %v2249_v42 = vpop.f32.mrf.mxu0  ;;  %v2292_v8 = vpop.f32.mrf.mxu1 }
 0x5a7   :  { %v12662_v11 = vpack.c.bf16 %v2292_v8, %v2246_v3 }
 0x5a8   :  { %v10552_v14 = vpop.f32.mrf.mxu0  ;;  %v10557_v15 = vpop.f32.mrf.mxu1 }
 0x5a9   :  { %v11092_v14 = vld [vmem:[#allocation10 + $0x90] ss:$12 sps:$4 sm:$0xff]  }
 0x5aa   :  { %v2295_v16 = vpop.f32.mrf.mxu1  ;;  %v2361_v17 = vpop.f32.mrf.mxu0 }
 0x5ab   :  { %v2419_v18 = vsel %vm12626_vm3, %v2361_v17, -1e+30  ;;  %v11098_v16 = vld [vmem:[#allocation10 + $0x7c] ss:$12 sps:$4 sm:$0xff]   ;;  %v11095_v17 = vld [vmem:[#allocation10 + $0x98] ss:$12 sps:$4 sm:$0xff]  }
 0x5ac   :  { %v10558_v20 = vpop.f32.mrf.mxu1  ;;  %v10563_v23 = vpop.f32.mrf.mxu0  ;;  %v2421_v22 = vsel %vm2180_vm4, %v2419_v18, -inf }
 0x5ad   :  { %2422 = vmax.xlane.f32.xlu0 %v2421_v22  ;;  %v11099_v20 = vld [vmem:[#allocation10 + $0x80] ss:$12 sps:$4 sm:$0xff]   ;;  %v11102_v23 = vld [vmem:[#allocation10 + $0x64] ss:$12 sps:$4 sm:$0xff]  }
 0x5ae   :  { %v2364_v29 = vpop.f32.mrf.mxu0  ;;  %v2413_v30 = vpop.f32.mrf.mxu1  ;;  %v11100_v22 = vld [vmem:[#allocation10 + $0x60] ss:$12 sps:$4 sm:$0xff]  }
 0x5af   :  { %v2420_v35 = vsel %vm12626_vm3, %v2413_v30, -1e+30  ;;  %v11103_v29 = vld [vmem:[#allocation10 + $0x68] ss:$12 sps:$4 sm:$0xff]   ;;  %v11106_v30 = vld [vmem:[#allocation10 + $0x4c] ss:$12 sps:$4 sm:$0xff]  }
 0x5b0   :  { %v10564_v36 = vpop.f32.mrf.mxu0  ;;  %v10569_v37 = vpop.f32.mrf.mxu1  ;;  %v2424_v38 = vsel %vm2180_vm4, %v2420_v35, -inf }
 0x5b1   :  { %2425 = vmax.xlane.f32.xlu1 %v2424_v38 }
 0x5b2   :  { %v2416_v44 = vpop.f32.mrf.mxu1 }
 0x5b3   :  { %v11104_v44 = vld [vmem:[#allocation10 + $0x48] ss:$12 sps:$4 sm:$0xff]  }
 0x5b4   :  { %v10570_v45 = vpop.f32.mrf.mxu1 }
 0x5b5   :  { %v11107_v45 = vld [vmem:[#allocation10 + $0x50] ss:$12 sps:$4 sm:$0xff]  }
 0x5c2   :  { %2495 = vrot.lane.b32.xlu1 %v12612_v57, %s12361_s10 }
 0x636   :  { %v2423_v46 = vpop.xlane.xlu0 %2422 }
 0x637   :  { %v2427_v48 = vsub.f32 %v2419_v18, %v2423_v46  ;;  %v11096_v18 = vld [vmem:[#allocation10 + $0x78] ss:$12 sps:$4 sm:$0xff]  }
 0x639   :  { %v2429_v49 = vmul.f32 1.442695, %v2427_v48  ;;  %v11110_v48 = vld [vmem:[#allocation10 + $0x34] ss:$12 sps:$4 sm:$0xff]  }
 0x63a   :  { %v2426_v34 = vpop.xlane.xlu1 %2425 }
 0x63b   :  { %12012 = vpow2.f32 %v2429_v49  ;;  %v2428_v50 = vsub.f32 %v2420_v35, %v2426_v34 }
 0x63d   :  { %v2431_v19 = vmul.f32 1.442695, %v2428_v50 }
 0x63e   :  { %v2496_v53 = vpop.permute.xlu1 %2495 }
 0x63f   :  { %12014 = vpow2.f32 %v2431_v19  ;;  %v2501_v54 = vsel %vm2208_vm2, %v2496_v53, 0  ;;  %v11108_v19 = vld [vmem:[#allocation10 + $0x30] ss:$12 sps:$4 sm:$0xff]   ;;  %v11111_v53 = vld [vmem:[#allocation10 + $0x38] ss:$12 sps:$4 sm:$0xff]  }
 0x640   :  { %10578 = vmatpush3.bf16.msra.mxu1 %v2501_v54  ;;  %v11114_v54 = vld [vmem:[#allocation10 + $0x1c] ss:$12 sps:$4 sm:$0xff]  }
 0x641   :  { %10583 = vmatprep.subr.bf16.mxu1 %v12359_v52 }
 0x648   :  { %v12013_v55 = vpop.eup %12012 }
 0x649   :  { %v2433_v62 = vsel %vm2180_vm4, %v12013_v55, 0.0 }
 0x64a   :  { %2434 = vadd.xlane.f32.xlu0 %v2433_v62  ;;  %v11112_v62 = vld [vmem:[#allocation10 + $0x18] ss:$12 sps:$4 sm:$0xff]  }
 0x64c   :  { %v12015_v56 = vpop.eup %12014 }
 0x64d   :  { %v2436_v57 = vsel %vm2180_vm4, %v12015_v56, 0.0 }
 0x64e   :  { %2437 = vadd.xlane.f32.xlu0 %v2436_v57  ;;  %v11118_v57 = vld [vmem:[#allocation10 + $0x4] ss:$12 sps:$4 sm:$0xff]  }
 0x664   :  { %2446 = vrot.lane.b32.xlu0 %v12606_v51, %s12361_s10  ;;  %v11091_v51 = vld [vmem:[#allocation10 + $0xb0] ss:$12 sps:$4 sm:$0xff]  }
 0x6d3   :  { %v2435_v58 = vpop.xlane.xlu0 %2434 }
 0x6d4   :  { %12016 = vrcp.f32 %v2435_v58  ;;  %v11116_v58 = vld [vmem:[#allocation10] ss:$12 sps:$4 sm:$0xff]  }
 0x6d7   :  { %v2438_v59 = vpop.xlane.xlu0 %2437 }
 0x6d8   :  { %12018 = vrcp.f32 %v2438_v59  ;;  %v11119_v59 = vld [vmem:[#allocation10 + $0x8] ss:$12 sps:$4 sm:$0xff]  }
 0x6db   :  { %v2447_v21 = vpop.permute.xlu0 %2446 }
 0x6dc   :  { %v2452_v12 = vsel %vm2208_vm2, %v2447_v21, 0  ;;  %v12702_v21 = vpack.c.bf16 %v12598_v39, %v12598_v39  ;;  %v1718_v39 = vadd.f32 %v12566_v4, %v12564_v1 }
 0x6dd   :  { %10572 = vmatpush3.bf16.msra.mxu0 %v2452_v12 }
 0x6de   :  { %2635 = vmatprep.subr.bf16.mxu0 %v11090_v61  ;;  %v12698_v61 = vpack.c.bf16 %v12594_v31, %v12594_v31  ;;  %v1976_v31 = vadd.f32 %v12604_v33, %v12618_v41  ;;  %v12726_v33 = vpack.c.bf16 %v12608_v32, %v12608_v32  ;;  %v2064_v1 = vpack.c.bf16 %v1718_v39, %v1718_v39 }
 0x6e0   :  { %v2866_v12 = vsel %vm2083_vm1, %v12698_v61, 0  ;;  %v12728_v41 = vpack.c.bf16 %v1976_v31, %v1976_v31  ;;  %v2984_v4 = vsel %vm2208_vm2, %v12726_v33, 0 }
 0x6e1   :  { %v12017_v27 = vpop.eup %12016 }
 0x6e2   :  { %v2441_v40 = vmul.f32 %v12017_v27, %v12013_v55  ;;  %v2912_v27 = vsel %vm2083_vm1, %v12702_v21, 0 }
 0x6e4   :  { %v2443_v3 = vpack.c.bf16 %v2441_v40, %v2441_v40  ;;  %v3030_v40 = vsel %vm2208_vm2, %v12728_v41, 0 }
 0x6e5   :  { %v12019_v42 = vpop.eup %12018 }
 0x6e6   :  { %10574 = vmatmul.mubr.msk.bf16.vlgmr.msra.gmra.mxu0 %vm2180_vm4, %v2443_v3  ;;  %v2442_v8 = vmul.f32 %v12019_v42, %v12015_v56  ;;  %v11115_v56 = vld [vmem:[#allocation10 + $0x20] ss:$12 sps:$4 sm:$0xff]  }
 0x6e7   :  { %2636 = vmatpush1.bf16.msra.mxu0 %v11088_v2  ;;  %2659 = vmatprep.mubr.bf16.mxu0 %v12358_v9 }
 0x6e8   :  { %v2444_v15 = vpack.c.bf16 %v2442_v8, %v2442_v8  ;;  %2637 = vmatprep.subr.bf16.mxu0 %v11094_v5 }
 0x6ea   :  { %10580 = vmatmul.mubr.msk.bf16.vlgmr.msra.gmra.mxu1 %vm2180_vm4, %v2444_v15 }
 0x6eb   :  { %10584 = vmatpush3.bf16.msra.mxu1 %v11091_v51  ;;  %2638 = vmatpush1.bf16.msra.mxu0 %v11092_v14 }
 0x6ec   :  { %10585 = vmatprep.subr.bf16.mxu1 %v12359_v52  ;;  %2639 = vmatprep.subr.bf16.mxu0 %v11098_v16 }
 0x6ed   :  { %10591 = vmatprep.mubr.msk.bf16.mxu1 %vm12360_vm0, %v12359_v52 }
 0x6ef   :  { %10586 = vmatpush3.bf16.msra.mxu1 %v11095_v17  ;;  %2640 = vmatpush1.bf16.msra.mxu0 %v11096_v18 }
 0x6f0   :  { %10587 = vmatprep.subr.bf16.mxu1 %v12359_v52  ;;  %2641 = vmatprep.subr.bf16.mxu0 %v11102_v23 }
 0x6f3   :  { %10588 = vmatpush3.bf16.msra.mxu1 %v11099_v20  ;;  %2642 = vmatpush1.bf16.msra.mxu0 %v11100_v22 }
 0x6f4   :  { %10589 = vmatprep.subr.bf16.mxu1 %v12359_v52  ;;  %2786 = vmatprep.subr.bf16.mxu0 %v11106_v30 }
 0x6f7   :  { %10590 = vmatpush3.bf16.msra.mxu1 %v11103_v29 }
 0x6f8   :  { %10595 = vmatprep.subr.bf16.mxu1 %v12359_v52 }
 0x7a6   :  { %v2488_v35 = vpop.f32.mrf.mxu0 }
 0x7a8   :  { %v10575_v36 = vpop.f32.mrf.mxu0 }
 0x7aa   :  { %v2491_v37 = vpop.f32.mrf.mxu0  ;;  %v2537_v38 = vpop.f32.mrf.mxu1 }
 0x7ab   :  { %v2543_v46 = vpack.c.bf16 %v2537_v38, %v2488_v35 }
 0x7ac   :  { %v10576_v49 = vpop.f32.mrf.mxu0  ;;  %v10581_v34 = vpop.f32.mrf.mxu1 }
 0x7ad   :  { %9610 = vmatmul.mubr.msk.bf16.vlgmr.msra.gmra.mxu0 %vm2083_vm1, %v2543_v46  ;;  %10592 = vmatmul.mubr.msk.bf16.vlgmr.msra.gmra.mxu1 %vm2083_vm1, %v2543_v46 }
 0x7ae   :  { %2787 = vmatpush1.bf16.msra.mxu0 %v11104_v44  ;;  %10596 = vmatpush3.bf16.msra.mxu1 %v11107_v45  ;;  %v2540_v50 = vpop.f32.mrf.mxu1 }
 0x7af   :  { %2788 = vmatprep.subr.bf16.mxu0 %v11110_v48  ;;  %10597 = vmatprep.subr.bf16.mxu1 %v12359_v52 }
 0x7b0   :  { %v10582_v55 = vpop.f32.mrf.mxu1  ;;  %2810 = vmatprep.mubr.bf16.mxu0 %v12358_v9  ;;  %10603 = vmatprep.mubr.msk.bf16.mxu1 %vm12360_vm0, %v12359_v52 }
 0x7b2   :  { %2789 = vmatpush1.bf16.msra.mxu0 %v11108_v19  ;;  %10598 = vmatpush3.bf16.msra.mxu1 %v11111_v53 }
 0x7b3   :  { %2790 = vmatprep.subr.bf16.mxu0 %v11114_v54  ;;  %10599 = vmatprep.subr.bf16.mxu1 %v12359_v52 }
 0x7b6   :  { %2791 = vmatpush1.bf16.msra.mxu0 %v11112_v62  ;;  %10600 = vmatpush3.bf16.msra.mxu1 %v11115_v56 }
 0x7b7   :  { %2792 = vmatprep.subr.bf16.mxu0 %v11118_v57  ;;  %10601 = vmatprep.subr.bf16.mxu1 %v12359_v52 }
 0x7ba   :  { %2793 = vmatpush1.bf16.msra.mxu0 %v11116_v58  ;;  %10602 = vmatpush3.bf16.msra.mxu1 %v11119_v59 }
 0x7bb   :  { %10607 = vmatprep.subr.bf16.mxu0 %v12359_v52  ;;  %10613 = vmatprep.subr.bf16.mxu1 %v12359_v52 }
 0x7bd   :  { %9624 = vmatmul.mubr.msk.bf16.vlgmr.msra.gmra.mxu0 %vm2083_vm1, %v12662_v11  ;;  %10604 = vmatmul.mubr.msk.bf16.vlgmr.msra.gmra.mxu1 %vm2083_vm1, %v12662_v11  ;;  %v2061_v11 = vpack.c.bf16 %v12562_v63, %v12562_v63 }
 0x7be   :  { %10608 = vmatpush3.bf16.xpose.msra.mxu0 %v2866_v12  ;;  %10614 = vmatpush3.bf16.xpose.msra.mxu1 %v2912_v27 }
 0x7bf   :  { %10609 = vmatprep.mubr.msk.bf16.mxu0 %vm12360_vm0, %v12359_v52  ;;  %10615 = vmatprep.mubr.msk.bf16.mxu1 %vm12360_vm0, %v12359_v52 }
 0x7c0   :  { %10619 = vmatprep.subr.bf16.mxu0 %v12359_v52  ;;  %10625 = vmatprep.subr.bf16.mxu1 %v12359_v52 }
 0x7c5   :  { %10610 = vmatmul.mubr.msk.bf16.vlgmr.msra.gmra.mxu0 %vm2083_vm1, %v2061_v11  ;;  %10616 = vmatmul.mubr.msk.bf16.vlgmr.msra.gmra.mxu1 %vm2083_vm1, %v2064_v1 }
 0x7c6   :  { %10620 = vmatpush3.bf16.msra.mxu0 %v2984_v4  ;;  %10626 = vmatpush3.bf16.msra.mxu1 %v3030_v40 }
 0x7c7   :  { %10621 = vmatprep.mubr.msk.bf16.mxu0 %vm12360_vm0, %v12359_v52  ;;  %10627 = vmatprep.mubr.msk.bf16.mxu1 %vm12360_vm0, %v12359_v52 }
 0x7c8   :  { %10631 = vmatprep.subr.bf16.mxu1 %v12359_v52 }
 0x86d   :  { %v2704_v63 = vpop.f32.mrf.mxu1  ;;  %v2661_v32 = vpop.f32.mrf.mxu0 }
 0x86f   :  { %v10593_v2 = vpop.f32.mrf.mxu1  ;;  %v2663_v5 = vpop.f32.mrf.mxu0 }
 0x871   :  { %v2707_v3 = vpop.f32.mrf.mxu1  ;;  %v2665_v8 = vpop.f32.mrf.mxu0 }
 0x873   :  { %v10594_v42 = vpop.f32.mrf.mxu1  ;;  %v2667_v51 = vpop.f32.mrf.mxu0 }
 0x87d   :  { %v2812_v14 = vpop.f32.mrf.mxu0  ;;  %v2855_v15 = vpop.f32.mrf.mxu1 }
 0x87e   :  { %v12743_v16 = vadd.f32 %v2812_v14, %v2661_v32  ;;  %v12745_v17 = vadd.f32 %v2855_v15, %v2704_v63  ;;  %v11122_v63 = vld [vmem:[#allocation10 + $0x10c] ss:$12 sps:$4 sm:$0xff]   ;;  %v11126_v15 = vld [vmem:[#allocation10 + $0xf4] ss:$12 sps:$4 sm:$0xff]  }
 0x87f   :  { %v2814_v18 = vpop.f32.mrf.mxu0  ;;  %v10605_v20 = vpop.f32.mrf.mxu1  ;;  %3164 = vmatprep.subr.bf16.mxu0 %v11122_v63 }
 0x880   :  { %v12747_v23 = vadd.f32 %v2814_v18, %v2663_v5  ;;  %v11130_v18 = vld [vmem:[#allocation10 + $0xdc] ss:$12 sps:$4 sm:$0xff]   ;;  %v11128_v20 = vld [vmem:[#allocation10 + $0xd8] ss:$12 sps:$4 sm:$0xff]  }
 0x881   :  { %v2816_v22 = vpop.f32.mrf.mxu0  ;;  %v2858_v29 = vpop.f32.mrf.mxu1 }
 0x882   :  { %v12749_v30 = vadd.f32 %v2816_v22, %v2665_v8  ;;  %v12751_v35 = vadd.f32 %v2858_v29, %v2707_v3  ;;  %v11131_v22 = vld [vmem:[#allocation10 + $0xe0] ss:$12 sps:$4 sm:$0xff]   ;;  %v11134_v29 = vld [vmem:[#allocation10 + $0xc4] ss:$12 sps:$4 sm:$0xff]  }
 0x883   :  { %v2818_v36 = vpop.f32.mrf.mxu0  ;;  %v10606_v37 = vpop.f32.mrf.mxu1 }
 0x884   :  { %v12753_v38 = vadd.f32 %v2818_v36, %v2667_v51  ;;  %v11120_v51 = vld [vmem:[#allocation10 + $0x108] ss:$12 sps:$4 sm:$0xff]   ;;  %v11132_v36 = vld [vmem:[#allocation10 + $0xc0] ss:$12 sps:$4 sm:$0xff]  }
 0x885   :  { %v2902_v44 = vpop.f32.mrf.mxu0  ;;  %v2948_v45 = vpop.f32.mrf.mxu1  ;;  %v11135_v37 = vld [vmem:[#allocation10 + $0xc8] ss:$12 sps:$4 sm:$0xff]  }
 0x886   :  { %v2954_v46 = vsel %vm12626_vm3, %v2902_v44, -1e+30  ;;  %v2955_v48 = vsel %vm12626_vm3, %v2948_v45, -1e+30 }
 0x887   :  { %v10611_v49 = vpop.f32.mrf.mxu0  ;;  %v10617_v34 = vpop.f32.mrf.mxu1  ;;  %v2956_v50 = vsel %vm2180_vm4, %v2954_v46, -inf  ;;  %v2959_v19 = vsel %vm2180_vm4, %v2955_v48, -inf }
 0x888   :  { %2957 = vmax.xlane.f32.xlu1 %v2956_v50  ;;  %2960 = vmax.xlane.f32.xlu0 %v2959_v19 }
 0x889   :  { %v2905_v53 = vpop.f32.mrf.mxu0  ;;  %v2951_v54 = vpop.f32.mrf.mxu1 }
 0x88b   :  { %v10612_v55 = vpop.f32.mrf.mxu0  ;;  %v10618_v62 = vpop.f32.mrf.mxu1 }
 0x911   :  { %v2958_v56 = vpop.xlane.xlu1 %2957  ;;  %v2961_v57 = vpop.xlane.xlu0 %2960 }
 0x912   :  { %v2962_v58 = vsub.f32 %v2954_v46, %v2958_v56  ;;  %v2963_v59 = vsub.f32 %v2955_v48, %v2961_v57 }
 0x914   :  { %v2964_v12 = vmul.f32 1.442695, %v2962_v58  ;;  %v2966_v27 = vmul.f32 1.442695, %v2963_v59 }
 0x916   :  { %12020 = vpow2.f32 %v2964_v12 }
 0x917   :  { %12022 = vpow2.f32 %v2966_v27 }
 0x923   :  { %v12021_v31 = vpop.eup %12020 }
 0x924   :  { %v12023_v39 = vpop.eup %12022  ;;  %v2968_v4 = vsel %vm2180_vm4, %v12021_v31, 0.0 }
 0x925   :  { %2969 = vadd.xlane.f32.xlu0 %v2968_v4  ;;  %v2971_v40 = vsel %vm2180_vm4, %v12023_v39, 0.0 }
 0x926   :  { %2972 = vadd.xlane.f32.xlu1 %v2971_v40 }
 0x937   :  { %3302 = vrot.lane.b32.xlu1 %v12702_v21, %s12361_s10  ;;  %v11123_v21 = vld [vmem:[#allocation10 + $0x110] ss:$12 sps:$4 sm:$0xff]  }
 0x93b   :  { %3247 = vrot.lane.b32.xlu1 %v2061_v11, %s12361_s10  ;;  %3250 = vrot.lane.b32.xlu0 %v12698_v61, %s12361_s10  ;;  %v11124_v61 = vld [vmem:[#allocation10 + $0xf0] ss:$12 sps:$4 sm:$0xff]  }
 0x93f   :  { %3299 = vrot.lane.b32.xlu1 %v2064_v1, %s12361_s10  ;;  %v11127_v1 = vld [vmem:[#allocation10 + $0xf8] ss:$12 sps:$4 sm:$0xff]  }
 0x9ae   :  { %v2970_v32 = vpop.xlane.xlu0 %2969 }
 0x9af   :  { %v2973_v2 = vpop.xlane.xlu1 %2972  ;;  %12024 = vrcp.f32 %v2970_v32 }
 0x9b0   :  { %12026 = vrcp.f32 %v2973_v2 }
 0x9b2   :  { %v3251_v46 = vpop.permute.xlu0 %3250 }
 0x9b3   :  { %v3303_v44 = vpop.permute.xlu1 %3302  ;;  %v3256_v53 = vsel %vm2083_vm1, %v3251_v46, 0 }
 0x9b4   :  { %v3308_v19 = vsel %vm2083_vm1, %v3303_v44, 0 }
 0x9b7   :  { %v3248_v55 = vpop.permute.xlu1 %3247 }
 0x9bb   :  { %v3300_v58 = vpop.permute.xlu1 %3299 }
 0x9bc   :  { %v12025_v3 = vpop.eup %12024 }
 0x9bd   :  { %v12027_v5 = vpop.eup %12026  ;;  %v2976_v42 = vmul.f32 %v12025_v3, %v12021_v31 }
 0x9be   :  { %v2977_v8 = vmul.f32 %v12027_v5, %v12023_v39 }
 0x9bf   :  { %v2978_v14 = vpack.c.bf16 %v2976_v42, %v2976_v42 }
 0x9c0   :  { %v2979_v11 = vpack.c.bf16 %v2977_v8, %v2977_v8 }
 0x9c1   :  { %10622 = vmatmul.mubr.msk.bf16.vlgmr.msra.gmra.mxu0 %vm2180_vm4, %v2978_v14 }
 0x9c2   :  { %10628 = vmatmul.mubr.msk.bf16.vlgmr.msra.gmra.mxu1 %vm2180_vm4, %v2979_v11  ;;  %3165 = vmatpush1.bf16.msra.mxu0 %v11120_v51 }
 0x9c3   :  { %10632 = vmatpush3.bf16.msra.mxu1 %v11123_v21  ;;  %3166 = vmatprep.subr.bf16.mxu0 %v11126_v15 }
 0x9c4   :  { %10633 = vmatprep.subr.bf16.mxu1 %v12359_v52  ;;  %3188 = vmatprep.mubr.bf16.mxu0 %v12358_v9 }
 0x9c5   :  { %10639 = vmatprep.mubr.msk.bf16.mxu1 %vm12360_vm0, %v12359_v52 }
 0x9c6   :  { %3167 = vmatpush1.bf16.msra.mxu0 %v11124_v61 }
 0x9c7   :  { %10634 = vmatpush3.bf16.msra.mxu1 %v11127_v1  ;;  %3168 = vmatprep.subr.bf16.mxu0 %v11130_v18 }
 0x9c8   :  { %10635 = vmatprep.subr.bf16.mxu1 %v12359_v52 }
 0x9ca   :  { %3169 = vmatpush1.bf16.msra.mxu0 %v11128_v20 }
 0x9cb   :  { %10636 = vmatpush3.bf16.msra.mxu1 %v11131_v22  ;;  %3170 = vmatprep.subr.bf16.mxu0 %v11134_v29 }
 0x9cc   :  { %10637 = vmatprep.subr.bf16.mxu1 %v12359_v52 }
 0x9ce   :  { %3171 = vmatpush1.bf16.msra.mxu0 %v11132_v36 }
 0x9cf   :  { %10638 = vmatpush3.bf16.msra.mxu1 %v11135_v37  ;;  %10643 = vmatprep.subr.bf16.mxu0 %v12359_v52 }
 0x9d0   :  { %10649 = vmatprep.subr.bf16.mxu1 %v12359_v52 }
 0xa81   :  { %v3020_v45 = vpop.f32.mrf.mxu0 }
 0xa82   :  { %v3066_v48 = vpop.f32.mrf.mxu1 }
 0xa83   :  { %v3072_v49 = vpack.c.bf16 %v3066_v48, %v3020_v45  ;;  %v10623_v34 = vpop.f32.mrf.mxu0 }
 0xa84   :  { %v10629_v50 = vpop.f32.mrf.mxu1 }
 0xa85   :  { %9642 = vmatmul.mubr.msk.bf16.vlgmr.msra.gmra.mxu0 %vm2083_vm1, %v3072_v49  ;;  %10640 = vmatmul.mubr.msk.bf16.vlgmr.msra.gmra.mxu1 %vm2083_vm1, %v3072_v49  ;;  %v3023_v54 = vpop.f32.mrf.mxu0  ;;  %v11138_v50 = vld [vmem:[#allocation10 + $0x16c] ss:$12 sps:$4 sm:$0xff]  }
 0xa86   :  { %10644 = vmatpush3.bf16.xpose.msra.mxu0 %v3256_v53  ;;  %10650 = vmatpush3.bf16.xpose.msra.mxu1 %v3308_v19  ;;  %v3069_v62 = vpop.f32.mrf.mxu1 }
 0xa87   :  { %v10624_v56 = vpop.f32.mrf.mxu0  ;;  %10645 = vmatprep.mubr.msk.bf16.mxu0 %vm12360_vm0, %v12359_v52  ;;  %10651 = vmatprep.mubr.msk.bf16.mxu1 %vm12360_vm0, %v12359_v52  ;;  %v11136_v62 = vld [vmem:[#allocation10 + $0x168] ss:$12 sps:$4 sm:$0xff]  }
 0xa88   :  { %v10630_v57 = vpop.f32.mrf.mxu1  ;;  %10661 = vmatprep.subr.bf16.mxu1 %v12359_v52  ;;  %10655 = vmatprep.subr.bf16.mxu0 %v12359_v52 }
 0xa89   :  { %v11142_v57 = vld [vmem:[#allocation10 + $0x154] ss:$12 sps:$4 sm:$0xff]  }
 0xa8d   :  { %10646 = vmatmul.mubr.msk.bf16.vlgmr.msra.gmra.mxu0 %vm2083_vm1, %v3248_v55  ;;  %10652 = vmatmul.mubr.msk.bf16.vlgmr.msra.gmra.mxu1 %vm2083_vm1, %v3300_v58 }
 0xa8e   :  { %10657 = vmatprep.mubr.msk.bf16.mxu0 %vm12360_vm0, %v12359_v52  ;;  %10663 = vmatprep.mubr.msk.bf16.mxu1 %vm12360_vm0, %v12359_v52 }
 0xb45   :  { %v3190_v59 = vpop.f32.mrf.mxu0  ;;  %v3233_v12 = vpop.f32.mrf.mxu1 }
 0xb46   :  { %v12796_v27 = vadd.f32 %v3190_v59, %v12743_v16  ;;  %v12799_v31 = vadd.f32 %v3233_v12, %v12745_v17  ;;  %v11140_v12 = vld [vmem:[#allocation10 + $0x150] ss:$12 sps:$4 sm:$0xff]  }
 0xb47   :  { %v3192_v39 = vpop.f32.mrf.mxu0  ;;  %v10641_v4 = vpop.f32.mrf.mxu1 }
 0xb48   :  { %v12802_v40 = vadd.f32 %v3192_v39, %v12747_v23  ;;  %v11146_v4 = vld [vmem:[#allocation10 + $0x13c] ss:$12 sps:$4 sm:$0xff]  }
 0xb49   :  { %v3194_v63 = vpop.f32.mrf.mxu0  ;;  %v3236_v32 = vpop.f32.mrf.mxu1 }
 0xb4a   :  { %v12805_v2 = vadd.f32 %v3194_v63, %v12749_v30  ;;  %v12808_v3 = vadd.f32 %v3236_v32, %v12751_v35  ;;  %v11143_v63 = vld [vmem:[#allocation10 + $0x158] ss:$12 sps:$4 sm:$0xff]  }
 0xb4b   :  { %v3196_v5 = vpop.f32.mrf.mxu0  ;;  %v10642_v42 = vpop.f32.mrf.mxu1  ;;  %v11144_v32 = vld [vmem:[#allocation10 + $0x138] ss:$12 sps:$4 sm:$0xff]  }
 0xb4c   :  { %v12811_v16 = vadd.f32 %v3196_v5, %v12753_v38  ;;  %v11147_v5 = vld [vmem:[#allocation10 + $0x140] ss:$12 sps:$4 sm:$0xff]   ;;  %v11150_v42 = vld [vmem:[#allocation10 + $0x124] ss:$12 sps:$4 sm:$0xff]  }
 0xb4d   :  { %v3292_v17 = vpop.f32.mrf.mxu0  ;;  %v3344_v8 = vpop.f32.mrf.mxu1 }
 0xb4e   :  { %v3350_v51 = vsel %vm12626_vm3, %v3292_v17, -1e+30  ;;  %v3351_v23 = vsel %vm12626_vm3, %v3344_v8, -1e+30  ;;  %v11148_v17 = vld [vmem:[#allocation10 + $0x120] ss:$12 sps:$4 sm:$0xff]  }
 0xb4f   :  { %v10647_v14 = vpop.f32.mrf.mxu0  ;;  %v10653_v21 = vpop.f32.mrf.mxu1  ;;  %v3352_v30 = vsel %vm2180_vm4, %v3350_v51, -inf  ;;  %v3355_v35 = vsel %vm2180_vm4, %v3351_v23, -inf  ;;  %v11151_v8 = vld [vmem:[#allocation10 + $0x128] ss:$12 sps:$4 sm:$0xff]  }
 0xb50   :  { %3353 = vmax.xlane.f32.xlu0 %v3352_v30  ;;  %3356 = vmax.xlane.f32.xlu1 %v3355_v35  ;;  %v12842_v21 = vpack.c.bf16 %v12596_v60, %v12596_v60 }
 0xb51   :  { %v3295_v15 = vpop.f32.mrf.mxu0  ;;  %v3347_v11 = vpop.f32.mrf.mxu1 }
 0xb53   :  { %v10648_v38 = vpop.f32.mrf.mxu0  ;;  %v10654_v61 = vpop.f32.mrf.mxu1 }
 0xb61   :  { %3426 = vrot.lane.b32.xlu1 %v12728_v41, %s12361_s10 }
 0xbd9   :  { %v3354_v1 = vpop.xlane.xlu0 %3353  ;;  %v3357_v18 = vpop.xlane.xlu1 %3356 }
 0xbda   :  { %v3358_v20 = vsub.f32 %v3350_v51, %v3354_v1  ;;  %v3359_v22 = vsub.f32 %v3351_v23, %v3357_v18  ;;  %v1890_v51 = vadd.f32 %v12602_v47, %v12600_v43  ;;  %v3652_v1 = vsel %vm2083_vm1, %v12842_v21, 0 }
 0xbdb   :  { %v12860_v18 = vpack.c.bf16 %v12620_v0, %v12620_v0 }
 0xbdc   :  { %v3360_v29 = vmul.f32 1.442695, %v3358_v20  ;;  %v3362_v36 = vmul.f32 1.442695, %v3359_v22  ;;  %v12844_v30 = vpack.c.bf16 %v1890_v51, %v1890_v51  ;;  %v12864_v20 = vpack.c.bf16 %v12622_v6, %v12622_v6 }
 0xbdd   :  { %v3427_v37 = vpop.permute.xlu1 %3426  ;;  %v2062_v22 = vpack.c.bf16 %v12568_v7, %v12568_v7 }
 0xbde   :  { %12028 = vpow2.f32 %v3360_v29  ;;  %v3432_v44 = vsel %vm2208_vm2, %v3427_v37, 0  ;;  %v3698_v43 = vsel %vm2083_vm1, %v12844_v30, 0  ;;  %v2065_v29 = vpack.c.bf16 %v12572_v13, %v12572_v13 }
 0xbdf   :  { %10662 = vmatpush3.bf16.msra.mxu1 %v3432_v44  ;;  %12030 = vpow2.f32 %v3362_v36  ;;  %v3770_v36 = vsel %vm2208_vm2, %v12860_v18, 0  ;;  %v3816_v37 = vsel %vm2208_vm2, %v12864_v20, 0 }
 0xbe0   :  { %10667 = vmatprep.subr.bf16.mxu1 %v12359_v52 }
 0xbeb   :  { %v12029_v45 = vpop.eup %12028 }
 0xbec   :  { %v3364_v46 = vsel %vm2180_vm4, %v12029_v45, 0.0  ;;  %v12031_v48 = vpop.eup %12030 }
 0xbed   :  { %3365 = vadd.xlane.f32.xlu0 %v3364_v46  ;;  %v3367_v41 = vsel %vm2180_vm4, %v12031_v48, 0.0 }
 0xbf1   :  { %3368 = vadd.xlane.f32.xlu0 %v3367_v41 }
 0xc07   :  { %3377 = vrot.lane.b32.xlu0 %v12726_v33, %s12361_s10  ;;  %v11139_v33 = vld [vmem:[#allocation10 + $0x170] ss:$12 sps:$4 sm:$0xff]  }
 0xc76   :  { %v3366_v49 = vpop.xlane.xlu0 %3365 }
 0xc77   :  { %12032 = vrcp.f32 %v3366_v49 }
 0xc7a   :  { %v3369_v34 = vpop.xlane.xlu0 %3368 }
 0xc7b   :  { %12034 = vrcp.f32 %v3369_v34 }
 0xc7e   :  { %v3378_v19 = vpop.permute.xlu0 %3377 }
 0xc7f   :  { %v3383_v53 = vsel %vm2208_vm2, %v3378_v19, 0 }
 0xc80   :  { %10656 = vmatpush3.bf16.msra.mxu0 %v3383_v53 }
 0xc81   :  { %3566 = vmatprep.subr.bf16.mxu0 %v11138_v50 }
 0xc84   :  { %v12033_v54 = vpop.eup %12032 }
 0xc85   :  { %v3372_v55 = vmul.f32 %v12033_v54, %v12029_v45 }
 0xc87   :  { %v3374_v56 = vpack.c.bf16 %v3372_v55, %v3372_v55 }
 0xc88   :  { %v12035_v58 = vpop.eup %12034 }
 0xc89   :  { %10658 = vmatmul.mubr.msk.bf16.vlgmr.msra.gmra.mxu0 %vm2180_vm4, %v3374_v56  ;;  %v3373_v59 = vmul.f32 %v12035_v58, %v12031_v48 }
 0xc8a   :  { %3567 = vmatpush1.bf16.msra.mxu0 %v11136_v62  ;;  %3590 = vmatprep.mubr.bf16.mxu0 %v12358_v9 }
 0xc8b   :  { %v3375_v39 = vpack.c.bf16 %v3373_v59, %v3373_v59  ;;  %3568 = vmatprep.subr.bf16.mxu0 %v11142_v57 }
 0xc8d   :  { %10664 = vmatmul.mubr.msk.bf16.vlgmr.msra.gmra.mxu1 %vm2180_vm4, %v3375_v39 }
 0xc8e   :  { %10668 = vmatpush3.bf16.msra.mxu1 %v11139_v33  ;;  %3569 = vmatpush1.bf16.msra.mxu0 %v11140_v12 }
 0xc8f   :  { %10669 = vmatprep.subr.bf16.mxu1 %v12359_v52  ;;  %3570 = vmatprep.subr.bf16.mxu0 %v11146_v4 }
 0xc90   :  { %10675 = vmatprep.mubr.msk.bf16.mxu1 %vm12360_vm0, %v12359_v52 }
 0xc92   :  { %10670 = vmatpush3.bf16.msra.mxu1 %v11143_v63  ;;  %3571 = vmatpush1.bf16.msra.mxu0 %v11144_v32 }
 0xc93   :  { %10671 = vmatprep.subr.bf16.mxu1 %v12359_v52  ;;  %3572 = vmatprep.subr.bf16.mxu0 %v11150_v42 }
 0xc96   :  { %10672 = vmatpush3.bf16.msra.mxu1 %v11147_v5  ;;  %3573 = vmatpush1.bf16.msra.mxu0 %v11148_v17 }
 0xc97   :  { %10673 = vmatprep.subr.bf16.mxu1 %v12359_v52  ;;  %10679 = vmatprep.subr.bf16.mxu0 %v12359_v52 }
 0xc9a   :  { %10674 = vmatpush3.bf16.msra.mxu1 %v11151_v8  ;;  %v11154_v8 = vld [vmem:[#allocation10 + $0x1cc] ss:$12 sps:$4 sm:$0xff]  }
 0xc9b   :  { %10685 = vmatprep.subr.bf16.mxu1 %v12359_v52 }
 0xd49   :  { %v3419_v23 = vpop.f32.mrf.mxu0 }
 0xd4b   :  { %v10659_v14 = vpop.f32.mrf.mxu0 }
 0xd4d   :  { %v3422_v35 = vpop.f32.mrf.mxu0  ;;  %v3468_v15 = vpop.f32.mrf.mxu1 }
 0xd4e   :  { %v3474_v11 = vpack.c.bf16 %v3468_v15, %v3419_v23 }
 0xd4f   :  { %v10660_v38 = vpop.f32.mrf.mxu0  ;;  %v10665_v61 = vpop.f32.mrf.mxu1 }
 0xd50   :  { %9660 = vmatmul.mubr.msk.bf16.vlgmr.msra.gmra.mxu0 %vm2083_vm1, %v3474_v11  ;;  %10676 = vmatmul.mubr.msk.bf16.vlgmr.msra.gmra.mxu1 %vm2083_vm1, %v3474_v11  ;;  %v11152_v38 = vld [vmem:[#allocation10 + $0x1c8] ss:$12 sps:$4 sm:$0xff]  }
 0xd51   :  { %10680 = vmatpush3.bf16.xpose.msra.mxu0 %v3652_v1  ;;  %10686 = vmatpush3.bf16.xpose.msra.mxu1 %v3698_v43  ;;  %v3471_v60 = vpop.f32.mrf.mxu1  ;;  %v11158_v1 = vld [vmem:[#allocation10 + $0x1b4] ss:$12 sps:$4 sm:$0xff]  }
 0xd52   :  { %10681 = vmatprep.mubr.msk.bf16.mxu0 %vm12360_vm0, %v12359_v52  ;;  %10687 = vmatprep.mubr.msk.bf16.mxu1 %vm12360_vm0, %v12359_v52  ;;  %v11159_v60 = vld [vmem:[#allocation10 + $0x1b8] ss:$12 sps:$4 sm:$0xff]  }
 0xd53   :  { %v10666_v47 = vpop.f32.mrf.mxu1  ;;  %10691 = vmatprep.subr.bf16.mxu0 %v12359_v52  ;;  %10697 = vmatprep.subr.bf16.mxu1 %v12359_v52 }
 0xd54   :  { %v11162_v47 = vld [vmem:[#allocation10 + $0x19c] ss:$12 sps:$4 sm:$0xff]  }
 0xd58   :  { %10682 = vmatmul.mubr.msk.bf16.vlgmr.msra.gmra.mxu0 %vm2083_vm1, %v2062_v22  ;;  %10688 = vmatmul.mubr.msk.bf16.vlgmr.msra.gmra.mxu1 %vm2083_vm1, %v2065_v29 }
 0xd59   :  { %10692 = vmatpush3.bf16.msra.mxu0 %v3770_v36  ;;  %10698 = vmatpush3.bf16.msra.mxu1 %v3816_v37  ;;  %v11166_v36 = vld [vmem:[#allocation10 + $0x184] ss:$12 sps:$4 sm:$0xff]   ;;  %v11164_v37 = vld [vmem:[#allocation10 + $0x180] ss:$12 sps:$4 sm:$0xff]  }
 0xd5a   :  { %10693 = vmatprep.mubr.msk.bf16.mxu0 %vm12360_vm0, %v12359_v52  ;;  %10699 = vmatprep.mubr.msk.bf16.mxu1 %vm12360_vm0, %v12359_v52 }
 0xd5b   :  { %10703 = vmatprep.subr.bf16.mxu1 %v12359_v52  ;;  %3950 = vmatprep.subr.bf16.mxu0 %v11154_v8 }
 0xe10   :  { %v3592_v7 = vpop.f32.mrf.mxu0  ;;  %v3635_v13 = vpop.f32.mrf.mxu1 }
 0xe11   :  { %v12882_v0 = vadd.f32 %v3592_v7, %v12796_v27  ;;  %v12885_v6 = vadd.f32 %v3635_v13, %v12799_v31  ;;  %v11167_v7 = vld [vmem:[#allocation10 + $0x188] ss:$12 sps:$4 sm:$0xff]  }
 0xe12   :  { %v3594_v44 = vpop.f32.mrf.mxu0  ;;  %v10677_v45 = vpop.f32.mrf.mxu1 }
 0xe13   :  { %v12888_v46 = vadd.f32 %v3594_v44, %v12802_v40 }
 0xe14   :  { %v3596_v48 = vpop.f32.mrf.mxu0  ;;  %v3638_v41 = vpop.f32.mrf.mxu1 }
 0xe15   :  { %v12891_v49 = vadd.f32 %v3596_v48, %v12805_v2  ;;  %v12894_v34 = vadd.f32 %v3638_v41, %v12808_v3 }
 0xe16   :  { %v3598_v50 = vpop.f32.mrf.mxu0  ;;  %v10678_v19 = vpop.f32.mrf.mxu1 }
 0xe17   :  { %v12897_v27 = vadd.f32 %v3598_v50, %v12811_v16 }
 0xe18   :  { %v3688_v31 = vpop.f32.mrf.mxu0  ;;  %v3734_v53 = vpop.f32.mrf.mxu1 }
 0xe19   :  { %v3740_v54 = vsel %vm12626_vm3, %v3688_v31, -1e+30  ;;  %v3741_v40 = vsel %vm12626_vm3, %v3734_v53, -1e+30 }
 0xe1a   :  { %v10683_v55 = vpop.f32.mrf.mxu0  ;;  %v10689_v62 = vpop.f32.mrf.mxu1  ;;  %v3742_v2 = vsel %vm2180_vm4, %v3740_v54, -inf  ;;  %v3745_v3 = vsel %vm2180_vm4, %v3741_v40, -inf }
 0xe1b   :  { %3743 = vmax.xlane.f32.xlu1 %v3742_v2  ;;  %3746 = vmax.xlane.f32.xlu0 %v3745_v3 }
 0xe1c   :  { %v3691_v56 = vpop.f32.mrf.mxu0  ;;  %v3737_v57 = vpop.f32.mrf.mxu1 }
 0xe1e   :  { %v10684_v16 = vpop.f32.mrf.mxu0  ;;  %v10690_v58 = vpop.f32.mrf.mxu1 }
 0xea4   :  { %v3744_v59 = vpop.xlane.xlu1 %3743  ;;  %v3747_v33 = vpop.xlane.xlu0 %3746 }
 0xea5   :  { %v3748_v12 = vsub.f32 %v3740_v54, %v3744_v59  ;;  %v3749_v39 = vsub.f32 %v3741_v40, %v3747_v33 }
 0xea7   :  { %v3750_v4 = vmul.f32 1.442695, %v3748_v12  ;;  %v3752_v63 = vmul.f32 1.442695, %v3749_v39 }
 0xea9   :  { %12036 = vpow2.f32 %v3750_v4 }
 0xeaa   :  { %12038 = vpow2.f32 %v3752_v63 }
 0xeb6   :  { %v12037_v32 = vpop.eup %12036 }
 0xeb7   :  { %v12039_v5 = vpop.eup %12038  ;;  %v3754_v42 = vsel %vm2180_vm4, %v12037_v32, 0.0 }
 0xeb8   :  { %3755 = vadd.xlane.f32.xlu0 %v3754_v42  ;;  %v3757_v17 = vsel %vm2180_vm4, %v12039_v5, 0.0 }
 0xeb9   :  { %3758 = vadd.xlane.f32.xlu1 %v3757_v17 }
 0xeca   :  { %4088 = vrot.lane.b32.xlu1 %v12844_v30, %s12361_s10  ;;  %v11155_v30 = vld [vmem:[#allocation10 + $0x1d0] ss:$12 sps:$4 sm:$0xff]  }
 0xece   :  { %4033 = vrot.lane.b32.xlu1 %v2062_v22, %s12361_s10  ;;  %4036 = vrot.lane.b32.xlu0 %v12842_v21, %s12361_s10  ;;  %v11156_v21 = vld [vmem:[#allocation10 + $0x1b0] ss:$12 sps:$4 sm:$0xff]   ;;  %v11160_v22 = vld [vmem:[#allocation10 + $0x198] ss:$12 sps:$4 sm:$0xff]  }
 0xed2   :  { %4085 = vrot.lane.b32.xlu1 %v2065_v29, %s12361_s10  ;;  %v11163_v29 = vld [vmem:[#allocation10 + $0x1a0] ss:$12 sps:$4 sm:$0xff]  }
 0xf41   :  { %v3756_v51 = vpop.xlane.xlu0 %3755 }
 0xf42   :  { %v3759_v23 = vpop.xlane.xlu1 %3758  ;;  %12040 = vrcp.f32 %v3756_v51 }
 0xf43   :  { %12042 = vrcp.f32 %v3759_v23 }
 0xf45   :  { %v4037_v45 = vpop.permute.xlu0 %4036 }
 0xf46   :  { %v4089_v13 = vpop.permute.xlu1 %4088  ;;  %v4042_v53 = vsel %vm2083_vm1, %v4037_v45, 0 }
 0xf47   :  { %v4094_v31 = vsel %vm2083_vm1, %v4089_v13, 0 }
 0xf4a   :  { %v4034_v40 = vpop.permute.xlu1 %4033 }
 0xf4e   :  { %v4086_v3 = vpop.permute.xlu1 %4085 }
 0xf4f   :  { %v12041_v14 = vpop.eup %12040 }
 0xf50   :  { %v12043_v35 = vpop.eup %12042  ;;  %v3762_v15 = vmul.f32 %v12041_v14, %v12037_v32 }
 0xf51   :  { %v3763_v11 = vmul.f32 %v12043_v35, %v12039_v5 }
 0xf52   :  { %v3764_v61 = vpack.c.bf16 %v3762_v15, %v3762_v15 }
 0xf53   :  { %v3765_v43 = vpack.c.bf16 %v3763_v11, %v3763_v11 }
 0xf54   :  { %10694 = vmatmul.mubr.msk.bf16.vlgmr.msra.gmra.mxu0 %vm2180_vm4, %v3764_v61 }
 0xf55   :  { %10700 = vmatmul.mubr.msk.bf16.vlgmr.msra.gmra.mxu1 %vm2180_vm4, %v3765_v43  ;;  %3951 = vmatpush1.bf16.msra.mxu0 %v11152_v38 }
 0xf56   :  { %10704 = vmatpush3.bf16.msra.mxu1 %v11155_v30  ;;  %3952 = vmatprep.subr.bf16.mxu0 %v11158_v1 }
 0xf57   :  { %10705 = vmatprep.subr.bf16.mxu1 %v12359_v52  ;;  %3974 = vmatprep.mubr.bf16.mxu0 %v12358_v9 }
 0xf58   :  { %10711 = vmatprep.mubr.msk.bf16.mxu1 %vm12360_vm0, %v12359_v52 }
 0xf59   :  { %3953 = vmatpush1.bf16.msra.mxu0 %v11156_v21 }
 0xf5a   :  { %10706 = vmatpush3.bf16.msra.mxu1 %v11159_v60  ;;  %3954 = vmatprep.subr.bf16.mxu0 %v11162_v47 }
 0xf5b   :  { %10707 = vmatprep.subr.bf16.mxu1 %v12359_v52 }
 0xf5d   :  { %3955 = vmatpush1.bf16.msra.mxu0 %v11160_v22 }
 0xf5e   :  { %10708 = vmatpush3.bf16.msra.mxu1 %v11163_v29  ;;  %3956 = vmatprep.subr.bf16.mxu0 %v11166_v36 }
 0xf5f   :  { %10709 = vmatprep.subr.bf16.mxu1 %v12359_v52 }
 0xf61   :  { %3957 = vmatpush1.bf16.msra.mxu0 %v11164_v37  ;;  %v11170_v37 = vld [vmem:[#allocation10 + $0x22c] ss:$12 sps:$4 sm:$0xff]  }
 0xf62   :  { %10710 = vmatpush3.bf16.msra.mxu1 %v11167_v7  ;;  %10715 = vmatprep.subr.bf16.mxu0 %v12359_v52 }
 0xf63   :  { %10721 = vmatprep.subr.bf16.mxu1 %v12359_v52 }
0x1014   :  { %v3806_v44 = vpop.f32.mrf.mxu0 }
0x1015   :  { %v3852_v48 = vpop.f32.mrf.mxu1 }
0x1016   :  { %v3858_v41 = vpack.c.bf16 %v3852_v48, %v3806_v44  ;;  %v10695_v50 = vpop.f32.mrf.mxu0  ;;  %v11168_v48 = vld [vmem:[#allocation10 + $0x228] ss:$12 sps:$4 sm:$0xff]  }
0x1017   :  { %v10701_v19 = vpop.f32.mrf.mxu1  ;;  %v11174_v50 = vld [vmem:[#allocation10 + $0x214] ss:$12 sps:$4 sm:$0xff]  }
0x1018   :  { %9678 = vmatmul.mubr.msk.bf16.vlgmr.msra.gmra.mxu0 %vm2083_vm1, %v3858_v41  ;;  %10712 = vmatmul.mubr.msk.bf16.vlgmr.msra.gmra.mxu1 %vm2083_vm1, %v3858_v41  ;;  %v3809_v54 = vpop.f32.mrf.mxu0 }
0x1019   :  { %10716 = vmatpush3.bf16.xpose.msra.mxu0 %v4042_v53  ;;  %10722 = vmatpush3.bf16.xpose.msra.mxu1 %v4094_v31  ;;  %v3855_v55 = vpop.f32.mrf.mxu1  ;;  %v11172_v53 = vld [vmem:[#allocation10 + $0x210] ss:$12 sps:$4 sm:$0xff]  }
0x101a   :  { %v10696_v62 = vpop.f32.mrf.mxu0  ;;  %10717 = vmatprep.mubr.msk.bf16.mxu0 %vm12360_vm0, %v12359_v52  ;;  %10723 = vmatprep.mubr.msk.bf16.mxu1 %vm12360_vm0, %v12359_v52  ;;  %v11175_v55 = vld [vmem:[#allocation10 + $0x218] ss:$12 sps:$4 sm:$0xff]  }
0x101b   :  { %v10702_v2 = vpop.f32.mrf.mxu1  ;;  %10733 = vmatprep.subr.bf16.mxu1 %v12359_v52  ;;  %10727 = vmatprep.subr.bf16.mxu0 %v12359_v52  ;;  %v11176_v62 = vld [vmem:[#allocation10 + $0x1f8] ss:$12 sps:$4 sm:$0xff]  }
0x101c   :  { %v11179_v2 = vld [vmem:[#allocation10 + $0x200] ss:$12 sps:$4 sm:$0xff]  }
0x1020   :  { %10718 = vmatmul.mubr.msk.bf16.vlgmr.msra.gmra.mxu0 %vm2083_vm1, %v4034_v40  ;;  %10724 = vmatmul.mubr.msk.bf16.vlgmr.msra.gmra.mxu1 %vm2083_vm1, %v4086_v3  ;;  %v11178_v40 = vld [vmem:[#allocation10 + $0x1fc] ss:$12 sps:$4 sm:$0xff]   ;;  %v11180_v3 = vld [vmem:[#allocation10 + $0x1e0] ss:$12 sps:$4 sm:$0xff]  }
0x1021   :  { %10729 = vmatprep.mubr.msk.bf16.mxu0 %vm12360_vm0, %v12359_v52  ;;  %10735 = vmatprep.mubr.msk.bf16.mxu1 %vm12360_vm0, %v12359_v52 }
0x10d8   :  { %v3976_v56 = vpop.f32.mrf.mxu0  ;;  %v4019_v57 = vpop.f32.mrf.mxu1 }
0x10d9   :  { %v12940_v16 = vadd.f32 %v3976_v56, %v12882_v0  ;;  %v12943_v58 = vadd.f32 %v4019_v57, %v12885_v6  ;;  %v11182_v56 = vld [vmem:[#allocation10 + $0x1e4] ss:$12 sps:$4 sm:$0xff]   ;;  %v11183_v57 = vld [vmem:[#allocation10 + $0x1e8] ss:$12 sps:$4 sm:$0xff]  }
0x10da   :  { %v3978_v59 = vpop.f32.mrf.mxu0  ;;  %v10713_v33 = vpop.f32.mrf.mxu1 }
0x10db   :  { %v12946_v12 = vadd.f32 %v3978_v59, %v12888_v46 }
0x10dc   :  { %v3980_v39 = vpop.f32.mrf.mxu0  ;;  %v4022_v4 = vpop.f32.mrf.mxu1 }
0x10dd   :  { %v12949_v63 = vadd.f32 %v3980_v39, %v12891_v49  ;;  %v12952_v32 = vadd.f32 %v4022_v4, %v12894_v34 }
0x10de   :  { %v3982_v5 = vpop.f32.mrf.mxu0  ;;  %v10714_v42 = vpop.f32.mrf.mxu1 }
0x10df   :  { %v12955_v0 = vadd.f32 %v3982_v5, %v12897_v27 }
0x10e0   :  { %v4078_v6 = vpop.f32.mrf.mxu0  ;;  %v4130_v17 = vpop.f32.mrf.mxu1 }
0x10e1   :  { %v4136_v8 = vsel %vm12626_vm3, %v4078_v6, -1e+30  ;;  %v4137_v46 = vsel %vm12626_vm3, %v4130_v17, -1e+30 }
0x10e2   :  { %v10719_v51 = vpop.f32.mrf.mxu0  ;;  %v10725_v23 = vpop.f32.mrf.mxu1  ;;  %v4138_v49 = vsel %vm2180_vm4, %v4136_v8, -inf  ;;  %v4141_v34 = vsel %vm2180_vm4, %v4137_v46, -inf }
0x10e3   :  { %4139 = vmax.xlane.f32.xlu0 %v4138_v49  ;;  %4142 = vmax.xlane.f32.xlu1 %v4141_v34 }
0x10e4   :  { %v4081_v14 = vpop.f32.mrf.mxu0  ;;  %v4133_v35 = vpop.f32.mrf.mxu1 }
0x10e5   :  { %v12056_v35 = vld [vmem:[#allocation2] sm:$0xff] }
0x10e6   :  { %v10720_v27 = vpop.f32.mrf.mxu0  ;;  %v10726_v15 = vpop.f32.mrf.mxu1 }
0x10f4   :  { %4212 = vrot.lane.b32.xlu1 %v12864_v20, %s12361_s10 }
0x116c   :  { %v4140_v11 = vpop.xlane.xlu0 %4139  ;;  %v4143_v38 = vpop.xlane.xlu1 %4142 }
0x116d   :  { %v4144_v61 = vsub.f32 %v4136_v8, %v4140_v11  ;;  %v4145_v10 = vsub.f32 %v4137_v46, %v4143_v38  ;;  %v4440_v46 = vld [vmem:[#allocation11] sm:$0x7] }
0x116e   :  { %v4445_v15 = vrot.slane %v4440_v46, %v12508_v28  ;;  %v4449_v38 = vrot.slane %v4440_v46, %v12502_v25 }
0x116f   :  { %v4146_v30 = vmul.f32 1.442695, %v4144_v61  ;;  %v4148_v1 = vmul.f32 1.442695, %v4145_v10 }
0x1170   :  { %v4213_v43 = vpop.permute.xlu1 %4212 }
0x1171   :  { %12044 = vpow2.f32 %v4146_v30  ;;  %v4218_v21 = vsel %vm2208_vm2, %v4213_v43, 0  ;;  %v12057_v30 = vld [vmem:[#allocation2 + $0x10] sm:$0xff]  ;;  %v4453_v43 = vrot.slane %v4440_v46, %v12505_v26 }
0x1172   :  { %10734 = vmatpush3.bf16.msra.mxu1 %v4218_v21  ;;  %12046 = vpow2.f32 %v4148_v1  ;;  %v12058_v21 = vld [vmem:[#allocation2 + $0x8] sm:$0xff] }
0x1173   :  { %10739 = vmatprep.subr.bf16.mxu1 %v12359_v52 }
0x117e   :  { %v12045_v60 = vpop.eup %12044 }
0x117f   :  { %v4150_v47 = vsel %vm2180_vm4, %v12045_v60, 0.0  ;;  %v12047_v22 = vpop.eup %12046 }
0x1180   :  { %4151 = vadd.xlane.f32.xlu0 %v4150_v47  ;;  %v4153_v20 = vsel %vm2180_vm4, %v12047_v22, 0.0 }
0x1184   :  { %4154 = vadd.xlane.f32.xlu0 %v4153_v20 }
0x119a   :  { %4163 = vrot.lane.b32.xlu0 %v12860_v18, %s12361_s10  ;;  %v11171_v18 = vld [vmem:[#allocation10 + $0x230] ss:$12 sps:$4 sm:$0xff]  }
0x1209   :  { %v4152_v29 = vpop.xlane.xlu0 %4151 }
0x120a   :  { %12048 = vrcp.f32 %v4152_v29 }
0x120d   :  { %v4155_v36 = vpop.xlane.xlu0 %4154 }
0x120e   :  { %12050 = vrcp.f32 %v4155_v36 }
0x1211   :  { %v4164_v7 = vpop.permute.xlu0 %4163 }
0x1212   :  { %v4169_v13 = vsel %vm2208_vm2, %v4164_v7, 0 }
0x1213   :  { %10728 = vmatpush3.bf16.msra.mxu0 %v4169_v13  ;;  %v12060_v13 = vld [vmem:[#allocation2 + $0x28] sm:$0xff] }
0x1214   :  { %4352 = vmatprep.subr.bf16.mxu0 %v11170_v37 }
0x1217   :  { %v12049_v44 = vpop.eup %12048 }
0x1218   :  { %v4158_v45 = vmul.f32 %v12049_v44, %v12045_v60 }
0x121a   :  { %v4160_v41 = vpack.c.bf16 %v4158_v45, %v4158_v45  ;;  %v12061_v45 = vld [vmem:[#allocation2 + $0x20] sm:$0xff] }
0x121b   :  { %v12051_v19 = vpop.eup %12050 }
0x121c   :  { %10730 = vmatmul.mubr.msk.bf16.vlgmr.msra.gmra.mxu0 %vm2180_vm4, %v4160_v41  ;;  %v4159_v31 = vmul.f32 %v12051_v19, %v12047_v22 }
0x121d   :  { %4353 = vmatpush1.bf16.msra.mxu0 %v11168_v48  ;;  %4376 = vmatprep.mubr.bf16.mxu0 %v12358_v9 }
0x121e   :  { %v4161_v54 = vpack.c.bf16 %v4159_v31, %v4159_v31  ;;  %4354 = vmatprep.subr.bf16.mxu0 %v11174_v50 }
0x1220   :  { %10736 = vmatmul.mubr.msk.bf16.vlgmr.msra.gmra.mxu1 %vm2180_vm4, %v4161_v54  ;;  %v11189_v54 = vld [vmem:[#allocation16 + $0x244] ss:$48 sps:$4 sm:$0xff]  }
0x1221   :  { %10740 = vmatpush3.bf16.msra.mxu1 %v11171_v18  ;;  %4355 = vmatpush1.bf16.msra.mxu0 %v11172_v53  ;;  %v11184_v18 = vld [vmem:[#allocation16 + $0x2a0] ss:$48 sps:$4 sm:$0xff]   ;;  %v11186_v53 = vld [vmem:[#allocation16 + $0x2a4] ss:$48 sps:$4 sm:$0xff]  }
0x1222   :  { %10741 = vmatprep.subr.bf16.mxu1 %v12359_v52  ;;  %4356 = vmatprep.subr.bf16.mxu0 %v11178_v40  ;;  %v11187_v40 = vld [vmem:[#allocation16 + $0x240] ss:$48 sps:$4 sm:$0xff]  }
0x1223   :  { %10747 = vmatprep.mubr.msk.bf16.mxu1 %vm12360_vm0, %v12359_v52 }
0x1225   :  { %10742 = vmatpush3.bf16.msra.mxu1 %v11175_v55  ;;  %4357 = vmatpush1.bf16.msra.mxu0 %v11176_v62  ;;  %v11192_v55 = vld [vmem:[#allocation16 + $0x1e4] ss:$48 sps:$4 sm:$0xff]   ;;  %v11208_v62 = vld [vmem:[#allocation16 + $0x8a0] ss:$48 sps:$4 sm:$0xff]  }
0x1226   :  { %10743 = vmatprep.subr.bf16.mxu1 %v12359_v52  ;;  %4358 = vmatprep.subr.bf16.mxu0 %v11182_v56  ;;  %v11195_v56 = vld [vmem:[#allocation16 + $0x184] ss:$48 sps:$4 sm:$0xff]  }
0x1229   :  { %10744 = vmatpush3.bf16.msra.mxu1 %v11179_v2  ;;  %4359 = vmatpush1.bf16.msra.mxu0 %v11180_v3  ;;  %v11210_v2 = vld [vmem:[#allocation16 + $0x8a4] ss:$48 sps:$4 sm:$0xff]   ;;  %v11190_v3 = vld [vmem:[#allocation16 + $0x1e0] ss:$48 sps:$4 sm:$0xff]  }
0x122a   :  { %10745 = vmatprep.subr.bf16.mxu1 %v12359_v52  ;;  %6346 = vmatprep.subr.bf16.mxu0 %v11186_v53  ;;  %v11232_v53 = vld [vmem:[#allocation16 + $0x720] ss:$48 sps:$4 sm:$0xff]  }
0x122d   :  { %10746 = vmatpush3.bf16.msra.mxu1 %v11183_v57  ;;  %v11193_v57 = vld [vmem:[#allocation16 + $0x180] ss:$48 sps:$4 sm:$0xff]  }
0x122e   :  { %6389 = vmatprep.subr.bf16.mxu1 %v11210_v2  ;;  %v11241_v2 = vld [vmem:[#allocation16 + $0x3c0] ss:$48 sps:$4 sm:$0xff]  }
0x12dc   :  { %v4205_v59 = vpop.f32.mrf.mxu0 }
0x12de   :  { %v10731_v33 = vpop.f32.mrf.mxu0 }
0x12df   :  { %v11196_v33 = vld [vmem:[#allocation16 + $0x120] ss:$48 sps:$4 sm:$0xff]  }
0x12e0   :  { %v4208_v39 = vpop.f32.mrf.mxu0  ;;  %v4254_v4 = vpop.f32.mrf.mxu1 }
0x12e1   :  { %v4260_v5 = vpack.c.bf16 %v4254_v4, %v4205_v59  ;;  %v11198_v59 = vld [vmem:[#allocation16 + $0x124] ss:$48 sps:$4 sm:$0xff]   ;;  %v11199_v4 = vld [vmem:[#allocation16 + $0xc0] ss:$48 sps:$4 sm:$0xff]  }
0x12e2   :  { %v10732_v42 = vpop.f32.mrf.mxu0  ;;  %v10737_v6 = vpop.f32.mrf.mxu1  ;;  %v11201_v39 = vld [vmem:[#allocation16 + $0xc4] ss:$48 sps:$4 sm:$0xff]  }
0x12e3   :  { %9696 = vmatmul.mubr.msk.bf16.vlgmr.msra.gmra.mxu0 %vm2083_vm1, %v4260_v5  ;;  %10748 = vmatmul.mubr.msk.bf16.vlgmr.msra.gmra.mxu1 %vm2083_vm1, %v4260_v5  ;;  %v11204_v5 = vld [vmem:[#allocation16 + $0x64] ss:$48 sps:$4 sm:$0xff]   ;;  %v11202_v42 = vld [vmem:[#allocation16 + $0x60] ss:$48 sps:$4 sm:$0xff]  }
0x12e4   :  { %v4257_v17 = vpop.f32.mrf.mxu1  ;;  %6421 = vmatprep.mubr.bf16.mxu1 %v12358_v9  ;;  %6347 = vmatpush1.bf16.msra.mxu0 %v11184_v18  ;;  %v11207_v6 = vld [vmem:[#allocation16 + $0x4] ss:$48 sps:$4 sm:$0xff]  }
0x12e5   :  { %6348 = vmatprep.subr.bf16.mxu0 %v11189_v54  ;;  %6390 = vmatpush1.bf16.msra.mxu1 %v11208_v62  ;;  %v11205_v17 = vld [vmem:[#allocation16] ss:$48 sps:$4 sm:$0xff]   ;;  %v11237_v18 = vld [vmem:[#allocation16 + $0x424] ss:$48 sps:$4 sm:$0xff]  }
0x12e6   :  { %v10738_v8 = vpop.f32.mrf.mxu1  ;;  %v11235_v54 = vld [vmem:[#allocation16 + $0x420] ss:$48 sps:$4 sm:$0xff]  }
0x12e7   :  { %v11213_v8 = vld [vmem:[#allocation16 + $0x5a4] ss:$48 sps:$4 sm:$0xff]   ;;  %v11238_v62 = vld [vmem:[#allocation16 + $0x6c0] ss:$48 sps:$4 sm:$0xff]  }
0x12e8   :  { %6349 = vmatpush1.bf16.msra.mxu0 %v11187_v40  ;;  %v11240_v40 = vld [vmem:[#allocation16 + $0x6c4] ss:$48 sps:$4 sm:$0xff]  }
0x12e9   :  { %6350 = vmatprep.subr.bf16.mxu0 %v11192_v55  ;;  %v11243_v55 = vld [vmem:[#allocation16 + $0x3c4] ss:$48 sps:$4 sm:$0xff]  }
0x12ec   :  { %6351 = vmatpush1.bf16.msra.mxu0 %v11190_v3  ;;  %v11246_v3 = vld [vmem:[#allocation16 + $0x664] ss:$48 sps:$4 sm:$0xff]  }
0x12ed   :  { %6352 = vmatprep.subr.bf16.mxu0 %v11195_v56  ;;  %v11249_v56 = vld [vmem:[#allocation16 + $0x364] ss:$48 sps:$4 sm:$0xff]  }
0x12f0   :  { %6353 = vmatpush1.bf16.msra.mxu0 %v11193_v57  ;;  %v11244_v57 = vld [vmem:[#allocation16 + $0x660] ss:$48 sps:$4 sm:$0xff]  }
0x12f1   :  { %6354 = vmatprep.subr.bf16.mxu0 %v11198_v59  ;;  %v11247_v59 = vld [vmem:[#allocation16 + $0x360] ss:$48 sps:$4 sm:$0xff]  }
0x12f4   :  { %6355 = vmatpush1.bf16.msra.mxu0 %v11196_v33  ;;  %v11252_v33 = vld [vmem:[#allocation16 + $0x604] ss:$48 sps:$4 sm:$0xff]  }
0x12f5   :  { %6356 = vmatprep.subr.bf16.mxu0 %v11201_v39  ;;  %v11255_v39 = vld [vmem:[#allocation16 + $0x304] ss:$48 sps:$4 sm:$0xff]  }
0x12f8   :  { %6357 = vmatpush1.bf16.msra.mxu0 %v11199_v4  ;;  %v11250_v4 = vld [vmem:[#allocation16 + $0x600] ss:$48 sps:$4 sm:$0xff]  }
0x12f9   :  { %6358 = vmatprep.subr.bf16.mxu0 %v11204_v5  ;;  %v11253_v5 = vld [vmem:[#allocation16 + $0x300] ss:$48 sps:$4 sm:$0xff]  }
0x12fc   :  { %6359 = vmatpush1.bf16.msra.mxu0 %v11202_v42  ;;  %v11258_v42 = vld [vmem:[#allocation16 + $0x2ac] ss:$48 sps:$4 sm:$0xff]  }
0x12fd   :  { %6360 = vmatprep.subr.bf16.mxu0 %v11207_v6  ;;  %v11261_v6 = vld [vmem:[#allocation16 + $0x8ac] ss:$48 sps:$4 sm:$0xff]  }
0x1300   :  { %6361 = vmatpush1.bf16.msra.mxu0 %v11205_v17 }
0x1301   :  { %6362 = vmatprep.subr.bf16.mxu0 %v11213_v8 }
0x13a3   :  { %v4378_v52 = vpop.f32.mrf.mxu0  ;;  %v4421_v51 = vpop.f32.mrf.mxu1 }
0x13a4   :  { %v4428_v23 = vadd.f32 %v4378_v52, %v12940_v16  ;;  %v4430_v49 = vadd.f32 %v4421_v51, %v12943_v58  ;;  %v11211_v52 = vld [vmem:[#allocation16 + $0x5a0] ss:$48 sps:$4 sm:$0xff]  }
0x13a5   :  { %v4380_v34 = vpop.f32.mrf.mxu0  ;;  %v10749_v14 = vpop.f32.mrf.mxu1  ;;  %6363 = vmatpush2.bf16.msra.mxu0 %v11211_v52 }
0x13a6   :  { %v4434_v27 = vadd.f32 %v12056_v35, %v4428_v23  ;;  %v4429_v11 = vadd.f32 %v4380_v34, %v12946_v12  ;;  %v4436_v1 = vadd.f32 %v12057_v30, %v4430_v49  ;;  %v12059_v12 = vld [vmem:[#allocation2 + $0x18] sm:$0xff] }
0x13a7   :  { %v4382_v61 = vpop.f32.mrf.mxu0  ;;  %v4424_v10 = vpop.f32.mrf.mxu1 }
0x13a8   :  { %v4435_v16 = vadd.f32 %v12058_v21, %v4429_v11  ;;  %v4431_v58 = vadd.f32 %v4382_v61, %v12949_v63  ;;  %v4433_v60 = vadd.f32 %v4424_v10, %v12952_v32  ;;  %v12991_v20 = vadd.f32 %v4445_v15, %v4434_v27 }
0x13a9   :  { %v4384_v47 = vpop.f32.mrf.mxu0  ;;  %v10750_v22 = vpop.f32.mrf.mxu1  ;;  %v12996_v7 = vadd.f32 %v4453_v43, %v4436_v1 }
0x13aa   :  { %v12993_v29 = vadd.f32 %v4449_v38, %v4435_v16  ;;  %v4437_v36 = vadd.f32 %v12059_v12, %v4431_v58  ;;  %v4432_v37 = vadd.f32 %v4384_v47, %v12955_v0  ;;  %v4439_v44 = vadd.f32 %v12060_v13, %v4433_v60  ;;  %v11216_v47 = vld [vmem:[#allocation16 + $0x844] ss:$48 sps:$4 sm:$0xff]   ;;  %v11214_v22 = vld [vmem:[#allocation16 + $0x840] ss:$48 sps:$4 sm:$0xff]  }
0x13ab   :  { %v11219_v12 = vld [vmem:[#allocation16 + $0x544] ss:$48 sps:$4 sm:$0xff]   ;;  %6391 = vmatprep.subr.bf16.mxu1 %v11216_v47  ;;  %v11220_v13 = vld [vmem:[#allocation16 + $0x7e0] ss:$48 sps:$4 sm:$0xff]  }
0x13ac   :  { %v4438_v48 = vadd.f32 %v12061_v45, %v4432_v37  ;;  %v4465_v63 = vadd.f32 %v12993_v29, %v12991_v20  ;;  %v13000_v32 = vadd.f32 %v4445_v15, %v4437_v36  ;;  %v13005_v19 = vadd.f32 %v4453_v43, %v4439_v44  ;;  %v11217_v36 = vld [vmem:[#allocation16 + $0x540] ss:$48 sps:$4 sm:$0xff]   ;;  %6364 = vmatprep.subr.bf16.mxu0 %v11219_v12  ;;  %v11222_v37 = vld [vmem:[#allocation16 + $0x7e4] ss:$48 sps:$4 sm:$0xff]  }
0x13ad   :  { %6392 = vmatpush1.bf16.msra.mxu1 %v11214_v22  ;;  %6365 = vmatpush2.bf16.msra.mxu0 %v11217_v36  ;;  %v11225_v44 = vld [vmem:[#allocation16 + $0x4e4] ss:$48 sps:$4 sm:$0xff]   ;;  %v11223_v45 = vld [vmem:[#allocation16 + $0x4e0] ss:$48 sps:$4 sm:$0xff]  }
0x13ae   :  { %v13002_v41 = vadd.f32 %v4449_v38, %v4438_v48  ;;  %v4466_v50 = vadd.f32 %v4465_v63, %v12996_v7  ;;  %6393 = vmatprep.subr.bf16.mxu1 %v11222_v37  ;;  %6366 = vmatprep.subr.bf16.mxu0 %v11225_v44  ;;  %v11226_v48 = vld [vmem:[#allocation16 + $0x780] ss:$48 sps:$4 sm:$0xff]   ;;  %v11228_v63 = vld [vmem:[#allocation16 + $0x784] ss:$48 sps:$4 sm:$0xff]  }
0x13b0   :  { %4467 = vadd.xlane.f32.xlu1 %v4466_v50  ;;  %v4469_v0 = vadd.f32 %v13002_v41, %v13000_v32  ;;  %v11229_v50 = vld [vmem:[#allocation16 + $0x480] ss:$48 sps:$4 sm:$0xff]  }
0x13b1   :  { %6394 = vmatpush1.bf16.msra.mxu1 %v11220_v13  ;;  %6367 = vmatpush2.bf16.msra.mxu0 %v11223_v45 }
0x13b2   :  { %v4470_v31 = vadd.f32 %v4469_v0, %v13005_v19  ;;  %v11231_v0 = vld [vmem:[#allocation16 + $0x484] ss:$48 sps:$4 sm:$0xff]   ;;  %6395 = vmatprep.subr.bf16.mxu1 %v11228_v63 }
0x13b3   :  { %6368 = vmatprep.subr.bf16.mxu0 %v11231_v0 }
0x13b4   :  { %4471 = vadd.xlane.f32.xlu0 %v4470_v31  ;;  %v11234_v31 = vld [vmem:[#allocation16 + $0x724] ss:$48 sps:$4 sm:$0xff]  }
0x13b5   :  { %6396 = vmatpush1.bf16.msra.mxu1 %v11226_v48  ;;  %6369 = vmatpush2.bf16.msra.mxu0 %v11229_v50 }
0x13b6   :  { %6397 = vmatprep.subr.bf16.mxu1 %v11234_v31  ;;  %6370 = vmatprep.subr.bf16.mxu0 %v11237_v18  ;;  %v11256_v31 = vld [vmem:[#allocation16 + $0x2a8] ss:$48 sps:$4 sm:$0xff]  }
0x13b9   :  { %6398 = vmatpush1.bf16.msra.mxu1 %v11232_v53  ;;  %6371 = vmatpush2.bf16.msra.mxu0 %v11235_v54 }
0x13ba   :  { %6399 = vmatprep.subr.bf16.mxu1 %v11240_v40  ;;  %6372 = vmatprep.subr.bf16.mxu0 %v11243_v55  ;;  %v11267_v55 = vld [vmem:[#allocation16 + $0x84c] ss:$48 sps:$4 sm:$0xff]  }
0x13bd   :  { %6400 = vmatpush1.bf16.msra.mxu1 %v11238_v62  ;;  %6373 = vmatpush2.bf16.msra.mxu0 %v11241_v2  ;;  %v11262_v62 = vld [vmem:[#allocation16 + $0x248] ss:$48 sps:$4 sm:$0xff]  }
0x13be   :  { %6401 = vmatprep.subr.bf16.mxu1 %v11246_v3  ;;  %6374 = vmatprep.subr.bf16.mxu0 %v11249_v56  ;;  %v11265_v2 = vld [vmem:[#allocation16 + $0x848] ss:$48 sps:$4 sm:$0xff]   ;;  %v11270_v3 = vld [vmem:[#allocation16 + $0x1ec] ss:$48 sps:$4 sm:$0xff]  }
0x13bf   :  { %v11273_v56 = vld [vmem:[#allocation16 + $0x7ec] ss:$48 sps:$4 sm:$0xff]  }
0x13c1   :  { %6402 = vmatpush1.bf16.msra.mxu1 %v11244_v57  ;;  %6375 = vmatpush2.bf16.msra.mxu0 %v11247_v59  ;;  %v11268_v57 = vld [vmem:[#allocation16 + $0x1e8] ss:$48 sps:$4 sm:$0xff]  }
0x13c2   :  { %6403 = vmatprep.subr.bf16.mxu1 %v11252_v33  ;;  %6376 = vmatprep.subr.bf16.mxu0 %v11255_v39  ;;  %v11271_v59 = vld [vmem:[#allocation16 + $0x7e8] ss:$48 sps:$4 sm:$0xff]   ;;  %v11276_v33 = vld [vmem:[#allocation16 + $0x18c] ss:$48 sps:$4 sm:$0xff]  }
0x13c3   :  { %v11279_v39 = vld [vmem:[#allocation16 + $0x78c] ss:$48 sps:$4 sm:$0xff]  }
0x13c5   :  { %6404 = vmatpush1.bf16.msra.mxu1 %v11250_v4  ;;  %6377 = vmatpush2.bf16.msra.mxu0 %v11253_v5  ;;  %v11274_v4 = vld [vmem:[#allocation16 + $0x188] ss:$48 sps:$4 sm:$0xff]  }
0x13c6   :  { %6432 = vmatprep.subr.bf16.mxu1 %v11258_v42  ;;  %6475 = vmatprep.subr.bf16.mxu0 %v11261_v6  ;;  %v11277_v5 = vld [vmem:[#allocation16 + $0x788] ss:$48 sps:$4 sm:$0xff]   ;;  %v11282_v42 = vld [vmem:[#allocation16 + $0x12c] ss:$48 sps:$4 sm:$0xff]  }
0x13c7   :  { %v11285_v6 = vld [vmem:[#allocation16 + $0x72c] ss:$48 sps:$4 sm:$0xff]  }
0x1439   :  { %v4468_v46 = vpop.xlane.xlu1 %4467 }
0x143a   :  { %v4473_v51 = vmul.f32 0.0026041667, %v4468_v46 }
0x143c   :  { %v13011_v23 = vsub.f32 %v12991_v20, %v4473_v51  ;;  %v13014_v49 = vsub.f32 %v12993_v29, %v4473_v51  ;;  %v13017_v34 = vsub.f32 %v12996_v7, %v4473_v51 }
0x143d   :  { %v4472_v14 = vpop.xlane.xlu0 %4471 }
0x143e   :  { %v4474_v35 = vmul.f32 0.0026041667, %v4472_v14  ;;  %v4481_v27 = vmul.f32 %v13011_v23, %v13011_v23  ;;  %v4482_v15 = vmul.f32 %v13014_v49, %v13014_v49  ;;  %v4483_v11 = vmul.f32 %v13017_v34, %v13017_v34 }
0x1440   :  { %v13026_v38 = vsub.f32 %v13000_v32, %v4474_v35  ;;  %v13029_v61 = vsub.f32 %v13002_v41, %v4474_v35  ;;  %v13032_v10 = vsub.f32 %v13005_v19, %v4474_v35  ;;  %v4487_v30 = vadd.f32 %v4482_v15, %v4481_v27  ;;  %v4463_v35 = vld [vmem:[#allocation13] sm:$0x7]  ;;  %v4464_v15 = vld [vmem:[#allocation14] sm:$0x7] }
0x1441   :  { %v4541_v47 = vrot.slane %v4464_v15, %v12505_v26  ;;  %v4533_v13 = vrot.slane %v4464_v15, %v12508_v28 }
0x1442   :  { %v4488_v1 = vadd.f32 %v4487_v30, %v4483_v11  ;;  %v4484_v43 = vmul.f32 %v13026_v38, %v13026_v38  ;;  %v4485_v21 = vmul.f32 %v13029_v61, %v13029_v61  ;;  %v4486_v16 = vmul.f32 %v13032_v10, %v13032_v10 }
0x1443   :  { %v4515_v30 = vrot.slane %v4463_v35, %v12502_v25 }
0x1444   :  { %4489 = vadd.xlane.f32.xlu0 %v4488_v1  ;;  %v4491_v58 = vadd.f32 %v4485_v21, %v4484_v43  ;;  %v4519_v43 = vrot.slane %v4463_v35, %v12505_v26 }
0x1446   :  { %v4492_v60 = vadd.f32 %v4491_v58, %v4486_v16  ;;  %v4511_v16 = vrot.slane %v4463_v35, %v12508_v28  ;;  %v11294_v35 = vld [vmem:[#allocation16 + $0x6c] ss:$48 sps:$4 sm:$0xff]  }
0x1448   :  { %4493 = vadd.xlane.f32.xlu1 %v4492_v60  ;;  %v4537_v60 = vrot.slane %v4464_v15, %v12502_v25  ;;  %v11292_v15 = vld [vmem:[#allocation16 + $0x68] ss:$48 sps:$4 sm:$0xff]  }
0x14cd   :  { %v4490_v17 = vpop.xlane.xlu0 %4489 }
0x14ce   :  { %v4495_v8 = vmul.f32 0.0026041667, %v4490_v17  ;;  %v11280_v17 = vld [vmem:[#allocation16 + $0x128] ss:$48 sps:$4 sm:$0xff]  }
0x14d0   :  { %v4497_v52 = vadd.f32 1e-05, %v4495_v8  ;;  %v11283_v8 = vld [vmem:[#allocation16 + $0x728] ss:$48 sps:$4 sm:$0xff]  }
0x14d1   :  { %v4494_v46 = vpop.xlane.xlu1 %4493 }
0x14d2   :  { %12052 = vrsqrt.f32 %v4497_v52  ;;  %v4496_v51 = vmul.f32 0.0026041667, %v4494_v46  ;;  %v11288_v52 = vld [vmem:[#allocation16 + $0xcc] ss:$48 sps:$4 sm:$0xff]  }
0x14d3   :  { %v11291_v46 = vld [vmem:[#allocation16 + $0x6cc] ss:$48 sps:$4 sm:$0xff]  }
0x14d4   :  { %v4498_v14 = vadd.f32 1e-05, %v4496_v51  ;;  %v11286_v51 = vld [vmem:[#allocation16 + $0xc8] ss:$48 sps:$4 sm:$0xff]  }
0x14d6   :  { %12054 = vrsqrt.f32 %v4498_v14  ;;  %v11289_v14 = vld [vmem:[#allocation16 + $0x6c8] ss:$48 sps:$4 sm:$0xff]  }
0x14df   :  { %v12053_v27 = vpop.eup %12052 }
0x14e0   :  { %v4502_v11 = vmul.f32 %v12053_v27, %v13014_v49  ;;  %v4503_v1 = vmul.f32 %v12053_v27, %v13017_v34  ;;  %v4501_v21 = vmul.f32 %v12053_v27, %v13011_v23  ;;  %v11297_v27 = vld [vmem:[#allocation16 + $0x66c] ss:$48 sps:$4 sm:$0xff]  }
0x14e2   :  { %v4524_v12 = vmul.f32 %v4515_v30, %v4502_v11  ;;  %v4525_v36 = vmul.f32 %v4519_v43, %v4503_v1  ;;  %v4523_v34 = vmul.f32 %v4511_v16, %v4501_v21  ;;  %v11295_v11 = vld [vmem:[#allocation16 + $0x668] ss:$48 sps:$4 sm:$0xff]   ;;  %v11303_v1 = vld [vmem:[#allocation16 + $0x60c] ss:$48 sps:$4 sm:$0xff]  }
0x14e3   :  { %v12055_v58 = vpop.eup %12054  ;;  %v11301_v21 = vld [vmem:[#allocation16 + $0x608] ss:$48 sps:$4 sm:$0xff]  }
0x14e4   :  { %v4505_v22 = vmul.f32 %v12055_v58, %v13029_v61  ;;  %v4506_v49 = vmul.f32 %v12055_v58, %v13032_v10  ;;  %v4504_v37 = vmul.f32 %v12055_v58, %v13026_v38  ;;  %v4546_v48 = vadd.f32 %v4537_v60, %v4524_v12  ;;  %v11259_v10 = vld [vmem:[#allocation16 + $0x8a8] ss:$48 sps:$4 sm:$0xff]   ;;  %v11264_v38 = vld [vmem:[#allocation16 + $0x24c] ss:$48 sps:$4 sm:$0xff]   ;;  %v11309_v58 = vld [vmem:[#allocation16 + $0x2b4] ss:$48 sps:$4 sm:$0xff]  }
0x14e5   :  { %v4547_v50 = vadd.f32 %v4541_v47, %v4525_v36  ;;  %v4545_v18 = vadd.f32 %v4533_v13, %v4523_v34  ;;  %v11315_v12 = vld [vmem:[#allocation16 + $0x254] ss:$48 sps:$4 sm:$0xff]   ;;  %v11313_v36 = vld [vmem:[#allocation16 + $0x250] ss:$48 sps:$4 sm:$0xff]  }
0x14e6   :  { %v4527_v44 = vmul.f32 %v4515_v30, %v4505_v22  ;;  %v4528_v23 = vmul.f32 %v4519_v43, %v4506_v49  ;;  %v4526_v45 = vmul.f32 %v4511_v16, %v4504_v37  ;;  %v11300_v30 = vld [vmem:[#allocation16 + $0xc] ss:$48 sps:$4 sm:$0xff]   ;;  %v11298_v43 = vld [vmem:[#allocation16 + $0x8] ss:$48 sps:$4 sm:$0xff]   ;;  %v11321_v34 = vld [vmem:[#allocation16 + $0x1f4] ss:$48 sps:$4 sm:$0xff]  }
0x14e7   :  { %v11306_v16 = vld [vmem:[#allocation16 + $0x5ac] ss:$48 sps:$4 sm:$0xff]   ;;  %v11310_v49 = vld [vmem:[#allocation16 + $0x548] ss:$48 sps:$4 sm:$0xff]  }
0x14e8   :  { %v4549_v63 = vadd.f32 %v4537_v60, %v4527_v44  ;;  %v4550_v0 = vadd.f32 %v4541_v47, %v4528_v23  ;;  %v4548_v53 = vadd.f32 %v4533_v13, %v4526_v45  ;;  %v11304_v60 = vld [vmem:[#allocation16 + $0x5a8] ss:$48 sps:$4 sm:$0xff]   ;;  %v11307_v47 = vld [vmem:[#allocation16 + $0x2b0] ss:$48 sps:$4 sm:$0xff]   ;;  %v11312_v22 = vld [vmem:[#allocation16 + $0x54c] ss:$48 sps:$4 sm:$0xff]  }
0x14e9   :  { %v11318_v37 = vld [vmem:[#allocation16 + $0x4ec] ss:$48 sps:$4 sm:$0xff]   ;;  %v11316_v13 = vld [vmem:[#allocation16 + $0x4e8] ss:$48 sps:$4 sm:$0xff]   ;;  %v11319_v44 = vld [vmem:[#allocation16 + $0x1f0] ss:$48 sps:$4 sm:$0xff]  }
0x14ea   :  { %v13052_v61 = vpack.c.bf16 %v4549_v63, %v4546_v48  ;;  %v13054_v54 = vpack.c.bf16 %v4550_v0, %v4547_v50  ;;  %v13056_v40 = vpack.c.bf16 %v4548_v53, %v4545_v18  ;;  %v11324_v23 = vld [vmem:[#allocation16 + $0x48c] ss:$48 sps:$4 sm:$0xff]   ;;  %v11327_v45 = vld [vmem:[#allocation16 + $0x194] ss:$48 sps:$4 sm:$0xff]   ;;  %v11322_v48 = vld [vmem:[#allocation16 + $0x488] ss:$48 sps:$4 sm:$0xff]  }
0x14eb   :  { %v11325_v63 = vld [vmem:[#allocation16 + $0x190] ss:$48 sps:$4 sm:$0xff]   ;;  %v11330_v50 = vld [vmem:[#allocation16 + $0x42c] ss:$48 sps:$4 sm:$0xff]   ;;  %v11333_v0 = vld [vmem:[#allocation16 + $0x134] ss:$48 sps:$4 sm:$0xff]  }
0x14ec   :  { %6378 = vmatprep.mubr.bf16.mxu0 %v13052_v61  ;;  %6422 = vmatmul.mubr.bf16.vlgmr.msra.gmra.mxu1 %v13054_v54  ;;  %v11331_v18 = vld [vmem:[#allocation16 + $0x130] ss:$48 sps:$4 sm:$0xff]   ;;  %v11336_v53 = vld [vmem:[#allocation16 + $0x3cc] ss:$48 sps:$4 sm:$0xff]  }
0x14ed   :  { %6433 = vmatpush1.bf16.msra.mxu1 %v11256_v31  ;;  %6379 = vmatmul.mubr.bf16.vlgmr.msra.gmra.mxu0 %v13056_v40  ;;  %v11328_v31 = vld [vmem:[#allocation16 + $0x428] ss:$48 sps:$4 sm:$0xff]  }
0x14ee   :  { %6464 = vmatprep.mubr.bf16.mxu1 %v13052_v61  ;;  %6476 = vmatpush1.bf16.msra.mxu0 %v11259_v10  ;;  %v11339_v10 = vld [vmem:[#allocation16 + $0xd4] ss:$48 sps:$4 sm:$0xff]  }
0x14ef   :  { %6434 = vmatprep.subr.bf16.mxu1 %v11264_v38  ;;  %6477 = vmatprep.subr.bf16.mxu0 %v11267_v55  ;;  %v11334_v38 = vld [vmem:[#allocation16 + $0x3c8] ss:$48 sps:$4 sm:$0xff]   ;;  %v11337_v55 = vld [vmem:[#allocation16 + $0xd0] ss:$48 sps:$4 sm:$0xff]  }
0x14f0   :  { %6507 = vmatprep.mubr.bf16.mxu0 %v12358_v9 }
0x14f1   :  { %6435 = vmatpush1.bf16.msra.mxu1 %v11262_v62  ;;  %v11342_v62 = vld [vmem:[#allocation16 + $0x36c] ss:$48 sps:$4 sm:$0xff]  }
0x14f2   :  { %6478 = vmatpush1.bf16.msra.mxu0 %v11265_v2  ;;  %6436 = vmatprep.subr.bf16.mxu1 %v11270_v3  ;;  %v11345_v2 = vld [vmem:[#allocation16 + $0x74] ss:$48 sps:$4 sm:$0xff]   ;;  %v11340_v3 = vld [vmem:[#allocation16 + $0x368] ss:$48 sps:$4 sm:$0xff]  }
0x14f3   :  { %6479 = vmatprep.subr.bf16.mxu0 %v11273_v56  ;;  %v11343_v56 = vld [vmem:[#allocation16 + $0x70] ss:$48 sps:$4 sm:$0xff]  }
0x14f5   :  { %6437 = vmatpush1.bf16.msra.mxu1 %v11268_v57  ;;  %v11348_v57 = vld [vmem:[#allocation16 + $0x30c] ss:$48 sps:$4 sm:$0xff]  }
0x14f6   :  { %6480 = vmatpush1.bf16.msra.mxu0 %v11271_v59  ;;  %6438 = vmatprep.subr.bf16.mxu1 %v11276_v33  ;;  %v11351_v59 = vld [vmem:[#allocation16 + $0x14] ss:$48 sps:$4 sm:$0xff]   ;;  %v11346_v33 = vld [vmem:[#allocation16 + $0x308] ss:$48 sps:$4 sm:$0xff]  }
0x14f7   :  { %6481 = vmatprep.subr.bf16.mxu0 %v11279_v39  ;;  %v11349_v39 = vld [vmem:[#allocation16 + $0x10] ss:$48 sps:$4 sm:$0xff]  }
0x14f9   :  { %6439 = vmatpush1.bf16.msra.mxu1 %v11274_v4  ;;  %v11354_v4 = vld [vmem:[#allocation16 + $0x8b4] ss:$48 sps:$4 sm:$0xff]  }
0x14fa   :  { %6482 = vmatpush1.bf16.msra.mxu0 %v11277_v5  ;;  %6440 = vmatprep.subr.bf16.mxu1 %v11282_v42  ;;  %v11357_v5 = vld [vmem:[#allocation16 + $0x5b4] ss:$48 sps:$4 sm:$0xff]   ;;  %v11352_v42 = vld [vmem:[#allocation16 + $0x8b0] ss:$48 sps:$4 sm:$0xff]  }
0x14fb   :  { %6483 = vmatprep.subr.bf16.mxu0 %v11285_v6  ;;  %v11355_v6 = vld [vmem:[#allocation16 + $0x5b0] ss:$48 sps:$4 sm:$0xff]  }
0x14fd   :  { %6441 = vmatpush1.bf16.msra.mxu1 %v11280_v17  ;;  %v11360_v17 = vld [vmem:[#allocation16 + $0x854] ss:$48 sps:$4 sm:$0xff]  }
0x14fe   :  { %6484 = vmatpush1.bf16.msra.mxu0 %v11283_v8  ;;  %6442 = vmatprep.subr.bf16.mxu1 %v11288_v52  ;;  %v11363_v8 = vld [vmem:[#allocation16 + $0x554] ss:$48 sps:$4 sm:$0xff]   ;;  %v11358_v52 = vld [vmem:[#allocation16 + $0x850] ss:$48 sps:$4 sm:$0xff]  }
0x14ff   :  { %6485 = vmatprep.subr.bf16.mxu0 %v11291_v46  ;;  %v11361_v46 = vld [vmem:[#allocation16 + $0x550] ss:$48 sps:$4 sm:$0xff]  }
0x1501   :  { %6443 = vmatpush1.bf16.msra.mxu1 %v11286_v51  ;;  %v11366_v51 = vld [vmem:[#allocation16 + $0x7f4] ss:$48 sps:$4 sm:$0xff]  }
0x1502   :  { %6486 = vmatpush1.bf16.msra.mxu0 %v11289_v14  ;;  %6444 = vmatprep.subr.bf16.mxu1 %v11294_v35  ;;  %v11369_v14 = vld [vmem:[#allocation16 + $0x4f4] ss:$48 sps:$4 sm:$0xff]   ;;  %v11364_v35 = vld [vmem:[#allocation16 + $0x7f0] ss:$48 sps:$4 sm:$0xff]  }
0x1503   :  { %6487 = vmatprep.subr.bf16.mxu0 %v11297_v27  ;;  %v11367_v27 = vld [vmem:[#allocation16 + $0x4f0] ss:$48 sps:$4 sm:$0xff]  }
0x1505   :  { %6445 = vmatpush1.bf16.msra.mxu1 %v11292_v15  ;;  %v11372_v15 = vld [vmem:[#allocation16 + $0x794] ss:$48 sps:$4 sm:$0xff]  }
0x1506   :  { %6488 = vmatpush1.bf16.msra.mxu0 %v11295_v11  ;;  %6446 = vmatprep.subr.bf16.mxu1 %v11300_v30  ;;  %v11375_v11 = vld [vmem:[#allocation16 + $0x494] ss:$48 sps:$4 sm:$0xff]   ;;  %v11370_v30 = vld [vmem:[#allocation16 + $0x790] ss:$48 sps:$4 sm:$0xff]  }
0x1507   :  { %6489 = vmatprep.subr.bf16.mxu0 %v11303_v1  ;;  %v11373_v1 = vld [vmem:[#allocation16 + $0x490] ss:$48 sps:$4 sm:$0xff]  }
0x1509   :  { %6447 = vmatpush1.bf16.msra.mxu1 %v11298_v43  ;;  %v11378_v43 = vld [vmem:[#allocation16 + $0x734] ss:$48 sps:$4 sm:$0xff]  }
0x150a   :  { %6490 = vmatpush1.bf16.msra.mxu0 %v11301_v21  ;;  %6448 = vmatprep.subr.bf16.mxu1 %v11306_v16  ;;  %v11381_v21 = vld [vmem:[#allocation16 + $0x434] ss:$48 sps:$4 sm:$0xff]   ;;  %v11376_v16 = vld [vmem:[#allocation16 + $0x730] ss:$48 sps:$4 sm:$0xff]  }
0x150b   :  { %6518 = vmatprep.subr.bf16.mxu0 %v11309_v58  ;;  %v11379_v58 = vld [vmem:[#allocation16 + $0x430] ss:$48 sps:$4 sm:$0xff]  }
0x150d   :  { %6449 = vmatpush2.bf16.msra.mxu1 %v11304_v60  ;;  %6508 = vmatmul.mubr.bf16.vlgmr.msra.gmra.mxu0 %v13054_v54  ;;  %v11384_v60 = vld [vmem:[#allocation16 + $0x6d4] ss:$48 sps:$4 sm:$0xff]  }
0x150e   :  { %6519 = vmatpush1.bf16.msra.mxu0 %v11307_v47  ;;  %6550 = vmatprep.mubr.bf16.mxu0 %v13052_v61  ;;  %v11387_v47 = vld [vmem:[#allocation16 + $0x3d4] ss:$48 sps:$4 sm:$0xff]  }
0x150f   :  { %6450 = vmatprep.subr.bf16.mxu1 %v11312_v22  ;;  %6520 = vmatprep.subr.bf16.mxu0 %v11315_v12  ;;  %v11382_v22 = vld [vmem:[#allocation16 + $0x6d0] ss:$48 sps:$4 sm:$0xff]  }
0x1510   :  { %v11385_v12 = vld [vmem:[#allocation16 + $0x3d0] ss:$48 sps:$4 sm:$0xff]  }
0x1511   :  { %6451 = vmatpush2.bf16.msra.mxu1 %v11310_v49  ;;  %v11390_v49 = vld [vmem:[#allocation16 + $0x674] ss:$48 sps:$4 sm:$0xff]  }
0x1512   :  { %6521 = vmatpush1.bf16.msra.mxu0 %v11313_v36  ;;  %6452 = vmatprep.subr.bf16.mxu1 %v11318_v37  ;;  %v11393_v36 = vld [vmem:[#allocation16 + $0x374] ss:$48 sps:$4 sm:$0xff]   ;;  %v11388_v37 = vld [vmem:[#allocation16 + $0x670] ss:$48 sps:$4 sm:$0xff]  }
0x1513   :  { %6522 = vmatprep.subr.bf16.mxu0 %v11321_v34  ;;  %v11391_v34 = vld [vmem:[#allocation16 + $0x370] ss:$48 sps:$4 sm:$0xff]  }
0x1515   :  { %6453 = vmatpush2.bf16.msra.mxu1 %v11316_v13  ;;  %v11396_v13 = vld [vmem:[#allocation16 + $0x614] ss:$48 sps:$4 sm:$0xff]  }
0x1516   :  { %6523 = vmatpush1.bf16.msra.mxu0 %v11319_v44  ;;  %6454 = vmatprep.subr.bf16.mxu1 %v11324_v23  ;;  %v11399_v44 = vld [vmem:[#allocation16 + $0x314] ss:$48 sps:$4 sm:$0xff]   ;;  %v11394_v23 = vld [vmem:[#allocation16 + $0x610] ss:$48 sps:$4 sm:$0xff]  }
0x1517   :  { %6524 = vmatprep.subr.bf16.mxu0 %v11327_v45  ;;  %v11397_v45 = vld [vmem:[#allocation16 + $0x310] ss:$48 sps:$4 sm:$0xff]  }
0x1519   :  { %6455 = vmatpush2.bf16.msra.mxu1 %v11322_v48  ;;  %v11402_v48 = vld [vmem:[#allocation16 + $0x2bc] ss:$48 sps:$4 sm:$0xff]  }
0x151a   :  { %6525 = vmatpush1.bf16.msra.mxu0 %v11325_v63  ;;  %6456 = vmatprep.subr.bf16.mxu1 %v11330_v50  ;;  %v11405_v63 = vld [vmem:[#allocation16 + $0x8bc] ss:$48 sps:$4 sm:$0xff]   ;;  %v11400_v50 = vld [vmem:[#allocation16 + $0x2b8] ss:$48 sps:$4 sm:$0xff]  }
0x151b   :  { %6526 = vmatprep.subr.bf16.mxu0 %v11333_v0  ;;  %v11403_v0 = vld [vmem:[#allocation16 + $0x8b8] ss:$48 sps:$4 sm:$0xff]  }
0x151d   :  { %6457 = vmatpush2.bf16.msra.mxu1 %v11328_v31  ;;  %v11408_v31 = vld [vmem:[#allocation16 + $0x25c] ss:$48 sps:$4 sm:$0xff]  }
0x151e   :  { %6527 = vmatpush1.bf16.msra.mxu0 %v11331_v18  ;;  %6458 = vmatprep.subr.bf16.mxu1 %v11336_v53  ;;  %v11411_v18 = vld [vmem:[#allocation16 + $0x85c] ss:$48 sps:$4 sm:$0xff]   ;;  %v11406_v53 = vld [vmem:[#allocation16 + $0x258] ss:$48 sps:$4 sm:$0xff]  }
0x151f   :  { %6528 = vmatprep.subr.bf16.mxu0 %v11339_v10  ;;  %v11409_v10 = vld [vmem:[#allocation16 + $0x858] ss:$48 sps:$4 sm:$0xff]  }
0x1521   :  { %6459 = vmatpush2.bf16.msra.mxu1 %v11334_v38  ;;  %v11414_v38 = vld [vmem:[#allocation16 + $0x1fc] ss:$48 sps:$4 sm:$0xff]  }
0x1522   :  { %6529 = vmatpush1.bf16.msra.mxu0 %v11337_v55  ;;  %6460 = vmatprep.subr.bf16.mxu1 %v11342_v62  ;;  %v11417_v55 = vld [vmem:[#allocation16 + $0x7fc] ss:$48 sps:$4 sm:$0xff]   ;;  %v11412_v62 = vld [vmem:[#allocation16 + $0x1f8] ss:$48 sps:$4 sm:$0xff]  }
0x1523   :  { %6530 = vmatprep.subr.bf16.mxu0 %v11345_v2  ;;  %v11415_v2 = vld [vmem:[#allocation16 + $0x7f8] ss:$48 sps:$4 sm:$0xff]  }
0x1525   :  { %6461 = vmatpush2.bf16.msra.mxu1 %v11340_v3  ;;  %v11420_v3 = vld [vmem:[#allocation16 + $0x19c] ss:$48 sps:$4 sm:$0xff]  }
0x1526   :  { %6531 = vmatpush1.bf16.msra.mxu0 %v11343_v56  ;;  %6462 = vmatprep.subr.bf16.mxu1 %v11348_v57  ;;  %v11423_v56 = vld [vmem:[#allocation16 + $0x79c] ss:$48 sps:$4 sm:$0xff]   ;;  %v11418_v57 = vld [vmem:[#allocation16 + $0x198] ss:$48 sps:$4 sm:$0xff]  }
0x1527   :  { %6532 = vmatprep.subr.bf16.mxu0 %v11351_v59  ;;  %v11421_v59 = vld [vmem:[#allocation16 + $0x798] ss:$48 sps:$4 sm:$0xff]  }
0x1529   :  { %6463 = vmatpush2.bf16.msra.mxu1 %v11346_v33  ;;  %v11426_v33 = vld [vmem:[#allocation16 + $0x13c] ss:$48 sps:$4 sm:$0xff]  }
0x152a   :  { %6533 = vmatpush1.bf16.msra.mxu0 %v11349_v39  ;;  %6561 = vmatprep.subr.bf16.mxu1 %v11354_v4  ;;  %v11429_v39 = vld [vmem:[#allocation16 + $0x73c] ss:$48 sps:$4 sm:$0xff]   ;;  %v11424_v4 = vld [vmem:[#allocation16 + $0x138] ss:$48 sps:$4 sm:$0xff]  }
0x152b   :  { %6534 = vmatprep.subr.bf16.mxu0 %v11357_v5  ;;  %v11427_v5 = vld [vmem:[#allocation16 + $0x738] ss:$48 sps:$4 sm:$0xff]  }
0x152c   :  { %6465 = vmatmul.mubr.bf16.vlgmr.msra.gmra.mxu1 %v13056_v40 }
0x152d   :  { %6562 = vmatpush1.bf16.msra.mxu1 %v11352_v42  ;;  %6593 = vmatprep.mubr.bf16.mxu1 %v12358_v9  ;;  %v11432_v42 = vld [vmem:[#allocation16 + $0xdc] ss:$48 sps:$4 sm:$0xff]  }
0x152e   :  { %6535 = vmatpush2.bf16.msra.mxu0 %v11355_v6  ;;  %6563 = vmatprep.subr.bf16.mxu1 %v11360_v17  ;;  %v11435_v6 = vld [vmem:[#allocation16 + $0x6dc] ss:$48 sps:$4 sm:$0xff]   ;;  %v11430_v17 = vld [vmem:[#allocation16 + $0xd8] ss:$48 sps:$4 sm:$0xff]  }
0x152f   :  { %6536 = vmatprep.subr.bf16.mxu0 %v11363_v8  ;;  %v11433_v8 = vld [vmem:[#allocation16 + $0x6d8] ss:$48 sps:$4 sm:$0xff]  }
0x1531   :  { %6564 = vmatpush1.bf16.msra.mxu1 %v11358_v52  ;;  %v11438_v52 = vld [vmem:[#allocation16 + $0x7c] ss:$48 sps:$4 sm:$0xff]  }
0x1532   :  { %6537 = vmatpush2.bf16.msra.mxu0 %v11361_v46  ;;  %6565 = vmatprep.subr.bf16.mxu1 %v11366_v51  ;;  %v11441_v46 = vld [vmem:[#allocation16 + $0x67c] ss:$48 sps:$4 sm:$0xff]   ;;  %v11436_v51 = vld [vmem:[#allocation16 + $0x78] ss:$48 sps:$4 sm:$0xff]  }
0x1533   :  { %6538 = vmatprep.subr.bf16.mxu0 %v11369_v14  ;;  %v11439_v14 = vld [vmem:[#allocation16 + $0x678] ss:$48 sps:$4 sm:$0xff]  }
0x1535   :  { %6566 = vmatpush1.bf16.msra.mxu1 %v11364_v35  ;;  %v11444_v35 = vld [vmem:[#allocation16 + $0x1c] ss:$48 sps:$4 sm:$0xff]  }
0x1536   :  { %6539 = vmatpush2.bf16.msra.mxu0 %v11367_v27  ;;  %6567 = vmatprep.subr.bf16.mxu1 %v11372_v15  ;;  %v11447_v27 = vld [vmem:[#allocation16 + $0x61c] ss:$48 sps:$4 sm:$0xff]   ;;  %v11442_v15 = vld [vmem:[#allocation16 + $0x18] ss:$48 sps:$4 sm:$0xff]  }
0x1537   :  { %6540 = vmatprep.subr.bf16.mxu0 %v11375_v11  ;;  %v11445_v11 = vld [vmem:[#allocation16 + $0x618] ss:$48 sps:$4 sm:$0xff]  }
0x1539   :  { %6568 = vmatpush1.bf16.msra.mxu1 %v11370_v30  ;;  %v11450_v30 = vld [vmem:[#allocation16 + $0x5bc] ss:$48 sps:$4 sm:$0xff]  }
0x153a   :  { %6541 = vmatpush2.bf16.msra.mxu0 %v11373_v1  ;;  %6569 = vmatprep.subr.bf16.mxu1 %v11378_v43  ;;  %v11453_v1 = vld [vmem:[#allocation16 + $0x2c4] ss:$48 sps:$4 sm:$0xff]   ;;  %v11448_v43 = vld [vmem:[#allocation16 + $0x5b8] ss:$48 sps:$4 sm:$0xff]  }
0x153b   :  { %6542 = vmatprep.subr.bf16.mxu0 %v11381_v21  ;;  %v11451_v21 = vld [vmem:[#allocation16 + $0x2c0] ss:$48 sps:$4 sm:$0xff]  }
0x153d   :  { %6570 = vmatpush1.bf16.msra.mxu1 %v11376_v16  ;;  %v11456_v16 = vld [vmem:[#allocation16 + $0x55c] ss:$48 sps:$4 sm:$0xff]  }
0x153e   :  { %6543 = vmatpush2.bf16.msra.mxu0 %v11379_v58  ;;  %6571 = vmatprep.subr.bf16.mxu1 %v11384_v60  ;;  %v11459_v58 = vld [vmem:[#allocation16 + $0x264] ss:$48 sps:$4 sm:$0xff]   ;;  %v11454_v60 = vld [vmem:[#allocation16 + $0x558] ss:$48 sps:$4 sm:$0xff]  }
0x153f   :  { %6544 = vmatprep.subr.bf16.mxu0 %v11387_v47  ;;  %v11457_v47 = vld [vmem:[#allocation16 + $0x260] ss:$48 sps:$4 sm:$0xff]  }
0x1541   :  { %6572 = vmatpush1.bf16.msra.mxu1 %v11382_v22  ;;  %v11462_v22 = vld [vmem:[#allocation16 + $0x4fc] ss:$48 sps:$4 sm:$0xff]  }
0x1542   :  { %6545 = vmatpush2.bf16.msra.mxu0 %v11385_v12  ;;  %6573 = vmatprep.subr.bf16.mxu1 %v11390_v49  ;;  %v11465_v12 = vld [vmem:[#allocation16 + $0x204] ss:$48 sps:$4 sm:$0xff]   ;;  %v11460_v49 = vld [vmem:[#allocation16 + $0x4f8] ss:$48 sps:$4 sm:$0xff]  }
0x1543   :  { %6546 = vmatprep.subr.bf16.mxu0 %v11393_v36  ;;  %v11463_v36 = vld [vmem:[#allocation16 + $0x200] ss:$48 sps:$4 sm:$0xff]  }
0x1545   :  { %6574 = vmatpush1.bf16.msra.mxu1 %v11388_v37  ;;  %v11468_v37 = vld [vmem:[#allocation16 + $0x49c] ss:$48 sps:$4 sm:$0xff]  }
0x1546   :  { %6547 = vmatpush2.bf16.msra.mxu0 %v11391_v34  ;;  %6575 = vmatprep.subr.bf16.mxu1 %v11396_v13  ;;  %v11471_v34 = vld [vmem:[#allocation16 + $0x1a4] ss:$48 sps:$4 sm:$0xff]   ;;  %v11466_v13 = vld [vmem:[#allocation16 + $0x498] ss:$48 sps:$4 sm:$0xff]  }
0x1547   :  { %6548 = vmatprep.subr.bf16.mxu0 %v11399_v44  ;;  %v11469_v44 = vld [vmem:[#allocation16 + $0x1a0] ss:$48 sps:$4 sm:$0xff]  }
0x1549   :  { %6576 = vmatpush1.bf16.msra.mxu1 %v11394_v23  ;;  %v11474_v23 = vld [vmem:[#allocation16 + $0x43c] ss:$48 sps:$4 sm:$0xff]  }
0x154a   :  { %6549 = vmatpush2.bf16.msra.mxu0 %v11397_v45  ;;  %6604 = vmatprep.subr.bf16.mxu1 %v11402_v48  ;;  %v11477_v45 = vld [vmem:[#allocation16 + $0x144] ss:$48 sps:$4 sm:$0xff]   ;;  %v11472_v48 = vld [vmem:[#allocation16 + $0x438] ss:$48 sps:$4 sm:$0xff]  }
0x154b   :  { %6647 = vmatprep.subr.bf16.mxu0 %v11405_v63  ;;  %v11475_v63 = vld [vmem:[#allocation16 + $0x140] ss:$48 sps:$4 sm:$0xff]  }
0x154c   :  { %6594 = vmatmul.mubr.bf16.vlgmr.msra.gmra.mxu1 %v13054_v54 }
0x154d   :  { %6551 = vmatmul.mubr.bf16.vlgmr.msra.gmra.mxu0 %v13056_v40  ;;  %6605 = vmatpush1.bf16.msra.mxu1 %v11400_v50  ;;  %v11480_v50 = vld [vmem:[#allocation16 + $0x3dc] ss:$48 sps:$4 sm:$0xff]  }
0x154e   :  { %6636 = vmatprep.mubr.bf16.mxu1 %v13052_v61  ;;  %6648 = vmatpush1.bf16.msra.mxu0 %v11403_v0  ;;  %v11483_v0 = vld [vmem:[#allocation16 + $0xe4] ss:$48 sps:$4 sm:$0xff]  }
0x154f   :  { %6606 = vmatprep.subr.bf16.mxu1 %v11408_v31  ;;  %6649 = vmatprep.subr.bf16.mxu0 %v11411_v18  ;;  %v11478_v31 = vld [vmem:[#allocation16 + $0x3d8] ss:$48 sps:$4 sm:$0xff]   ;;  %v11481_v18 = vld [vmem:[#allocation16 + $0xe0] ss:$48 sps:$4 sm:$0xff]  }
0x1550   :  { %6679 = vmatprep.mubr.bf16.mxu0 %v12358_v9 }
0x1551   :  { %6607 = vmatpush1.bf16.msra.mxu1 %v11406_v53  ;;  %v11486_v53 = vld [vmem:[#allocation16 + $0x37c] ss:$48 sps:$4 sm:$0xff]  }
0x1552   :  { %6650 = vmatpush1.bf16.msra.mxu0 %v11409_v10  ;;  %6608 = vmatprep.subr.bf16.mxu1 %v11414_v38  ;;  %v11489_v10 = vld [vmem:[#allocation16 + $0x84] ss:$48 sps:$4 sm:$0xff]   ;;  %v11484_v38 = vld [vmem:[#allocation16 + $0x378] ss:$48 sps:$4 sm:$0xff]  }
0x1553   :  { %6651 = vmatprep.subr.bf16.mxu0 %v11417_v55  ;;  %v11487_v55 = vld [vmem:[#allocation16 + $0x80] ss:$48 sps:$4 sm:$0xff]  }
0x1555   :  { %6609 = vmatpush1.bf16.msra.mxu1 %v11412_v62  ;;  %v11492_v62 = vld [vmem:[#allocation16 + $0x31c] ss:$48 sps:$4 sm:$0xff]  }
0x1556   :  { %6652 = vmatpush1.bf16.msra.mxu0 %v11415_v2  ;;  %6610 = vmatprep.subr.bf16.mxu1 %v11420_v3  ;;  %v11495_v2 = vld [vmem:[#allocation16 + $0x24] ss:$48 sps:$4 sm:$0xff]   ;;  %v11490_v3 = vld [vmem:[#allocation16 + $0x318] ss:$48 sps:$4 sm:$0xff]  }
0x1557   :  { %6653 = vmatprep.subr.bf16.mxu0 %v11423_v56  ;;  %v11493_v56 = vld [vmem:[#allocation16 + $0x20] ss:$48 sps:$4 sm:$0xff]  }
0x1559   :  { %6611 = vmatpush1.bf16.msra.mxu1 %v11418_v57  ;;  %v11498_v57 = vld [vmem:[#allocation16 + $0x8c4] ss:$48 sps:$4 sm:$0xff]  }
0x155a   :  { %6654 = vmatpush1.bf16.msra.mxu0 %v11421_v59  ;;  %6612 = vmatprep.subr.bf16.mxu1 %v11426_v33  ;;  %v11501_v59 = vld [vmem:[#allocation16 + $0x5c4] ss:$48 sps:$4 sm:$0xff]   ;;  %v11496_v33 = vld [vmem:[#allocation16 + $0x8c0] ss:$48 sps:$4 sm:$0xff]  }
0x155b   :  { %6655 = vmatprep.subr.bf16.mxu0 %v11429_v39  ;;  %v11499_v39 = vld [vmem:[#allocation16 + $0x5c0] ss:$48 sps:$4 sm:$0xff]  }
0x155d   :  { %6613 = vmatpush1.bf16.msra.mxu1 %v11424_v4  ;;  %v11504_v4 = vld [vmem:[#allocation16 + $0x864] ss:$48 sps:$4 sm:$0xff]  }
0x155e   :  { %6656 = vmatpush1.bf16.msra.mxu0 %v11427_v5  ;;  %6614 = vmatprep.subr.bf16.mxu1 %v11432_v42  ;;  %v11507_v5 = vld [vmem:[#allocation16 + $0x564] ss:$48 sps:$4 sm:$0xff]   ;;  %v11502_v42 = vld [vmem:[#allocation16 + $0x860] ss:$48 sps:$4 sm:$0xff]  }
0x155f   :  { %6657 = vmatprep.subr.bf16.mxu0 %v11435_v6  ;;  %v11505_v6 = vld [vmem:[#allocation16 + $0x560] ss:$48 sps:$4 sm:$0xff]  }
0x1561   :  { %6615 = vmatpush1.bf16.msra.mxu1 %v11430_v17  ;;  %v11510_v17 = vld [vmem:[#allocation16 + $0x804] ss:$48 sps:$4 sm:$0xff]  }
0x1562   :  { %6658 = vmatpush1.bf16.msra.mxu0 %v11433_v8  ;;  %6616 = vmatprep.subr.bf16.mxu1 %v11438_v52  ;;  %v11513_v8 = vld [vmem:[#allocation16 + $0x504] ss:$48 sps:$4 sm:$0xff]   ;;  %v11508_v52 = vld [vmem:[#allocation16 + $0x800] ss:$48 sps:$4 sm:$0xff]  }
0x1563   :  { %6659 = vmatprep.subr.bf16.mxu0 %v11441_v46  ;;  %v11511_v46 = vld [vmem:[#allocation16 + $0x500] ss:$48 sps:$4 sm:$0xff]  }
0x1565   :  { %6617 = vmatpush1.bf16.msra.mxu1 %v11436_v51  ;;  %v11516_v51 = vld [vmem:[#allocation16 + $0x7a4] ss:$48 sps:$4 sm:$0xff]  }
0x1566   :  { %6660 = vmatpush1.bf16.msra.mxu0 %v11439_v14  ;;  %6618 = vmatprep.subr.bf16.mxu1 %v11444_v35  ;;  %v11519_v14 = vld [vmem:[#allocation16 + $0x4a4] ss:$48 sps:$4 sm:$0xff]   ;;  %v11514_v35 = vld [vmem:[#allocation16 + $0x7a0] ss:$48 sps:$4 sm:$0xff]  }
0x1567   :  { %6661 = vmatprep.subr.bf16.mxu0 %v11447_v27  ;;  %v11517_v27 = vld [vmem:[#allocation16 + $0x4a0] ss:$48 sps:$4 sm:$0xff]  }
0x1569   :  { %6619 = vmatpush1.bf16.msra.mxu1 %v11442_v15  ;;  %v11522_v15 = vld [vmem:[#allocation16 + $0x744] ss:$48 sps:$4 sm:$0xff]  }
0x156a   :  { %6662 = vmatpush1.bf16.msra.mxu0 %v11445_v11  ;;  %6620 = vmatprep.subr.bf16.mxu1 %v11450_v30  ;;  %v11525_v11 = vld [vmem:[#allocation16 + $0x444] ss:$48 sps:$4 sm:$0xff]   ;;  %v11520_v30 = vld [vmem:[#allocation16 + $0x740] ss:$48 sps:$4 sm:$0xff]  }
0x156b   :  { %6690 = vmatprep.subr.bf16.mxu0 %v11453_v1  ;;  %v11523_v1 = vld [vmem:[#allocation16 + $0x440] ss:$48 sps:$4 sm:$0xff]  }
0x156d   :  { %6621 = vmatpush2.bf16.msra.mxu1 %v11448_v43  ;;  %6680 = vmatmul.mubr.bf16.vlgmr.msra.gmra.mxu0 %v13054_v54  ;;  %v11528_v43 = vld [vmem:[#allocation16 + $0x6e4] ss:$48 sps:$4 sm:$0xff]  }
0x156e   :  { %6691 = vmatpush1.bf16.msra.mxu0 %v11451_v21  ;;  %6722 = vmatprep.mubr.bf16.mxu0 %v13052_v61  ;;  %v11531_v21 = vld [vmem:[#allocation16 + $0x3e4] ss:$48 sps:$4 sm:$0xff]  }
0x156f   :  { %6622 = vmatprep.subr.bf16.mxu1 %v11456_v16  ;;  %6692 = vmatprep.subr.bf16.mxu0 %v11459_v58  ;;  %v11526_v16 = vld [vmem:[#allocation16 + $0x6e0] ss:$48 sps:$4 sm:$0xff]  }
0x1570   :  { %v11529_v58 = vld [vmem:[#allocation16 + $0x3e0] ss:$48 sps:$4 sm:$0xff]  }
0x1571   :  { %6623 = vmatpush2.bf16.msra.mxu1 %v11454_v60  ;;  %v11534_v60 = vld [vmem:[#allocation16 + $0x684] ss:$48 sps:$4 sm:$0xff]  }
0x1572   :  { %6693 = vmatpush1.bf16.msra.mxu0 %v11457_v47  ;;  %6624 = vmatprep.subr.bf16.mxu1 %v11462_v22  ;;  %v11537_v47 = vld [vmem:[#allocation16 + $0x384] ss:$48 sps:$4 sm:$0xff]   ;;  %v11532_v22 = vld [vmem:[#allocation16 + $0x680] ss:$48 sps:$4 sm:$0xff]  }
0x1573   :  { %6694 = vmatprep.subr.bf16.mxu0 %v11465_v12  ;;  %v11535_v12 = vld [vmem:[#allocation16 + $0x380] ss:$48 sps:$4 sm:$0xff]  }
0x1575   :  { %6625 = vmatpush2.bf16.msra.mxu1 %v11460_v49  ;;  %v11540_v49 = vld [vmem:[#allocation16 + $0x624] ss:$48 sps:$4 sm:$0xff]  }
0x1576   :  { %6695 = vmatpush1.bf16.msra.mxu0 %v11463_v36  ;;  %6626 = vmatprep.subr.bf16.mxu1 %v11468_v37  ;;  %v11543_v36 = vld [vmem:[#allocation16 + $0x324] ss:$48 sps:$4 sm:$0xff]   ;;  %v11538_v37 = vld [vmem:[#allocation16 + $0x620] ss:$48 sps:$4 sm:$0xff]  }
0x1577   :  { %6696 = vmatprep.subr.bf16.mxu0 %v11471_v34  ;;  %v11541_v34 = vld [vmem:[#allocation16 + $0x320] ss:$48 sps:$4 sm:$0xff]  }
0x1579   :  { %6627 = vmatpush2.bf16.msra.mxu1 %v11466_v13  ;;  %v11546_v13 = vld [vmem:[#allocation16 + $0x2cc] ss:$48 sps:$4 sm:$0xff]  }
0x157a   :  { %6697 = vmatpush1.bf16.msra.mxu0 %v11469_v44  ;;  %6628 = vmatprep.subr.bf16.mxu1 %v11474_v23  ;;  %v11549_v44 = vld [vmem:[#allocation16 + $0x8cc] ss:$48 sps:$4 sm:$0xff]   ;;  %v13075_v23 = vld [vmem:[#allocation17] sm:$0xff] }
0x157b   :  { %6698 = vmatprep.subr.bf16.mxu0 %v11477_v45  ;;  %v11544_v45 = vld [vmem:[#allocation16 + $0x2c8] ss:$48 sps:$4 sm:$0xff]  }
0x157d   :  { %6629 = vmatpush2.bf16.msra.mxu1 %v11472_v48  ;;  %v11547_v48 = vld [vmem:[#allocation16 + $0x8c8] ss:$48 sps:$4 sm:$0xff]  }
0x157e   :  { %6699 = vmatpush1.bf16.msra.mxu0 %v11475_v63  ;;  %6630 = vmatprep.subr.bf16.mxu1 %v11480_v50  ;;  %v4849_v63 = vrot.slane %v13075_v23, %v12508_v28  ;;  %v11552_v50 = vld [vmem:[#allocation16 + $0x26c] ss:$48 sps:$4 sm:$0xff]  }
0x157f   :  { %6700 = vmatprep.subr.bf16.mxu0 %v11483_v0  ;;  %v11555_v0 = vld [vmem:[#allocation16 + $0x86c] ss:$48 sps:$4 sm:$0xff]  }
0x1581   :  { %6631 = vmatpush2.bf16.msra.mxu1 %v11478_v31 }
0x1582   :  { %6701 = vmatpush1.bf16.msra.mxu0 %v11481_v18  ;;  %6632 = vmatprep.subr.bf16.mxu1 %v11486_v53  ;;  %v11550_v53 = vld [vmem:[#allocation16 + $0x268] ss:$48 sps:$4 sm:$0xff]  }
0x1583   :  { %6702 = vmatprep.subr.bf16.mxu0 %v11489_v10 }
0x1585   :  { %6633 = vmatpush2.bf16.msra.mxu1 %v11484_v38  ;;  %v11553_v38 = vld [vmem:[#allocation16 + $0x868] ss:$48 sps:$4 sm:$0xff]  }
0x1586   :  { %6703 = vmatpush1.bf16.msra.mxu0 %v11487_v55  ;;  %6634 = vmatprep.subr.bf16.mxu1 %v11492_v62  ;;  %v11558_v55 = vld [vmem:[#allocation16 + $0x20c] ss:$48 sps:$4 sm:$0xff]  }
0x1587   :  { %6704 = vmatprep.subr.bf16.mxu0 %v11495_v2 }
0x1589   :  { %6635 = vmatpush2.bf16.msra.mxu1 %v11490_v3  ;;  %v11561_v3 = vld [vmem:[#allocation16 + $0x80c] ss:$48 sps:$4 sm:$0xff]  }
0x158a   :  { %6705 = vmatpush1.bf16.msra.mxu0 %v11493_v56  ;;  %6733 = vmatprep.subr.bf16.mxu1 %v11498_v57 }
0x158b   :  { %6706 = vmatprep.subr.bf16.mxu0 %v11501_v59  ;;  %v11556_v59 = vld [vmem:[#allocation16 + $0x208] ss:$48 sps:$4 sm:$0xff]  }
0x158c   :  { %6637 = vmatmul.mubr.bf16.vlgmr.msra.gmra.mxu1 %v13056_v40 }
0x158d   :  { %6734 = vmatpush1.bf16.msra.mxu1 %v11496_v33  ;;  %6765 = vmatprep.mubr.bf16.mxu1 %v12358_v9 }
0x158e   :  { %6707 = vmatpush2.bf16.msra.mxu0 %v11499_v39  ;;  %6735 = vmatprep.subr.bf16.mxu1 %v11504_v4  ;;  %v11559_v39 = vld [vmem:[#allocation16 + $0x808] ss:$48 sps:$4 sm:$0xff]  }
0x158f   :  { %6708 = vmatprep.subr.bf16.mxu0 %v11507_v5  ;;  %v11567_v5 = vld [vmem:[#allocation16 + $0x7ac] ss:$48 sps:$4 sm:$0xff]  }
0x1591   :  { %6736 = vmatpush1.bf16.msra.mxu1 %v11502_v42 }
0x1592   :  { %6709 = vmatpush2.bf16.msra.mxu0 %v11505_v6  ;;  %6737 = vmatprep.subr.bf16.mxu1 %v11510_v17  ;;  %v11562_v6 = vld [vmem:[#allocation16 + $0x1a8] ss:$48 sps:$4 sm:$0xff]  }
0x1593   :  { %6710 = vmatprep.subr.bf16.mxu0 %v11513_v8 }
0x1595   :  { %6738 = vmatpush1.bf16.msra.mxu1 %v11508_v52  ;;  %v11565_v52 = vld [vmem:[#allocation16 + $0x7a8] ss:$48 sps:$4 sm:$0xff]  }
0x1596   :  { %6711 = vmatpush2.bf16.msra.mxu0 %v11511_v46  ;;  %6739 = vmatprep.subr.bf16.mxu1 %v11516_v51  ;;  %v11573_v46 = vld [vmem:[#allocation16 + $0x74c] ss:$48 sps:$4 sm:$0xff]  }
0x1597   :  { %6712 = vmatprep.subr.bf16.mxu0 %v11519_v14  ;;  %v11568_v14 = vld [vmem:[#allocation16 + $0x148] ss:$48 sps:$4 sm:$0xff]  }
0x1599   :  { %6740 = vmatpush1.bf16.msra.mxu1 %v11514_v35  ;;  %v11571_v35 = vld [vmem:[#allocation16 + $0x748] ss:$48 sps:$4 sm:$0xff]  }
0x159a   :  { %6713 = vmatpush2.bf16.msra.mxu0 %v11517_v27  ;;  %6741 = vmatprep.subr.bf16.mxu1 %v11522_v15  ;;  %v11576_v27 = vld [vmem:[#allocation16 + $0xec] ss:$48 sps:$4 sm:$0xff]  }
0x159b   :  { %6714 = vmatprep.subr.bf16.mxu0 %v11525_v11  ;;  %v11579_v15 = vld [vmem:[#allocation16 + $0x6ec] ss:$48 sps:$4 sm:$0xff]  }
0x159d   :  { %6742 = vmatpush1.bf16.msra.mxu1 %v11520_v30  ;;  %v11574_v30 = vld [vmem:[#allocation16 + $0xe8] ss:$48 sps:$4 sm:$0xff]  }
0x159e   :  { %6715 = vmatpush2.bf16.msra.mxu0 %v11523_v1  ;;  %6743 = vmatprep.subr.bf16.mxu1 %v11528_v43  ;;  %v4853_v1 = vrot.slane %v13075_v23, %v12502_v25  ;;  %v11577_v43 = vld [vmem:[#allocation16 + $0x6e8] ss:$48 sps:$4 sm:$0xff]  }
0x159f   :  { %6716 = vmatprep.subr.bf16.mxu0 %v11531_v21  ;;  %v11582_v21 = vld [vmem:[#allocation16 + $0x8c] ss:$48 sps:$4 sm:$0xff]  }
0x15a1   :  { %6744 = vmatpush1.bf16.msra.mxu1 %v11526_v16  ;;  %v11585_v16 = vld [vmem:[#allocation16 + $0x68c] ss:$48 sps:$4 sm:$0xff]  }
0x15a2   :  { %6717 = vmatpush2.bf16.msra.mxu0 %v11529_v58  ;;  %6745 = vmatprep.subr.bf16.mxu1 %v11534_v60  ;;  %v11580_v60 = vld [vmem:[#allocation16 + $0x88] ss:$48 sps:$4 sm:$0xff]  }
0x15a3   :  { %6718 = vmatprep.subr.bf16.mxu0 %v11537_v47 }
0x15a5   :  { %6746 = vmatpush1.bf16.msra.mxu1 %v11532_v22  ;;  %v11583_v22 = vld [vmem:[#allocation16 + $0x688] ss:$48 sps:$4 sm:$0xff]  }
0x15a6   :  { %6719 = vmatpush2.bf16.msra.mxu0 %v11535_v12  ;;  %6747 = vmatprep.subr.bf16.mxu1 %v11540_v49  ;;  %v11588_v12 = vld [vmem:[#allocation16 + $0x2c] ss:$48 sps:$4 sm:$0xff]  }
0x15a7   :  { %6720 = vmatprep.subr.bf16.mxu0 %v11543_v36  ;;  %v11591_v36 = vld [vmem:[#allocation16 + $0x62c] ss:$48 sps:$4 sm:$0xff]  }
0x15a9   :  { %6748 = vmatpush1.bf16.msra.mxu1 %v11538_v37 }
0x15aa   :  { %6721 = vmatpush2.bf16.msra.mxu0 %v11541_v34  ;;  %6776 = vmatprep.subr.bf16.mxu1 %v11546_v13  ;;  %v11586_v34 = vld [vmem:[#allocation16 + $0x28] ss:$48 sps:$4 sm:$0xff]  }
0x15ab   :  { %6819 = vmatprep.subr.bf16.mxu0 %v11549_v44  ;;  %v11589_v44 = vld [vmem:[#allocation16 + $0x628] ss:$48 sps:$4 sm:$0xff]  }
0x15ac   :  { %6766 = vmatmul.mubr.bf16.vlgmr.msra.gmra.mxu1 %v13054_v54  ;;  %v6423_v31 = vpop.f32.mrf.mxu1 }
0x15ad   :  { %6723 = vmatmul.mubr.bf16.vlgmr.msra.gmra.mxu0 %v13056_v40  ;;  %6777 = vmatpush1.bf16.msra.mxu1 %v11544_v45  ;;  %v6380_v18 = vpop.f32.mrf.mxu0  ;;  %v11594_v45 = vld [vmem:[#allocation16 + $0x5cc] ss:$48 sps:$4 sm:$0xff]  }
0x15ae   :  { %6808 = vmatprep.mubr.bf16.mxu1 %v13052_v61  ;;  %v6381_v10 = vadd.f32 %v6380_v18, %v4849_v63  ;;  %6820 = vmatpush1.bf16.msra.mxu0 %v11547_v48  ;;  %v6425_v62 = vpop.f32.mrf.mxu1  ;;  %v11564_v61 = vld [vmem:[#allocation16 + $0x1ac] ss:$48 sps:$4 sm:$0xff]   ;;  %v11597_v48 = vld [vmem:[#allocation19 + $0xac] ss:$12 sps:$4 sm:$0xff]  }
0x15af   :  { %v6382_v2 = vpop.f32.mrf.mxu0  ;;  %6778 = vmatprep.subr.bf16.mxu1 %v11552_v50  ;;  %6821 = vmatprep.subr.bf16.mxu0 %v11555_v0  ;;  %v11592_v50 = vld [vmem:[#allocation16 + $0x5c8] ss:$48 sps:$4 sm:$0xff]   ;;  %v11600_v18 = vld [vmem:[#allocation16 + $0x56c] ss:$48 sps:$4 sm:$0xff]  }
0x15b0   :  { %v6424_v56 = vadd.f32 %v6423_v31, %v6381_v10  ;;  %6851 = vmatprep.mubr.bf16.mxu0 %v12358_v9  ;;  %v6427_v4 = vpop.f32.mrf.mxu1  ;;  %v11570_v9 = vld [vmem:[#allocation16 + $0x14c] ss:$48 sps:$4 sm:$0xff]   ;;  %v6383_v47 = vadd.f32 %v6382_v2, %v4853_v1  ;;  %v11595_v31 = vld [vmem:[#allocation19 + $0xa8] ss:$12 sps:$4 sm:$0xff]  }
0x15b1   :  { %6779 = vmatpush1.bf16.msra.mxu1 %v11550_v53  ;;  %v6384_v57 = vpop.f32.mrf.mxu0  ;;  %v11603_v53 = vld [vmem:[#allocation19 + $0x94] ss:$12 sps:$4 sm:$0xff]   ;;  %v11609_v2 = vld [vmem:[#allocation19 + $0x7c] ss:$12 sps:$4 sm:$0xff]  }
0x15b2   :  { %v6385_v33 = vadd.f32 %v6384_v57, %v4849_v63  ;;  %6822 = vmatpush1.bf16.msra.mxu0 %v11553_v38  ;;  %6780 = vmatprep.subr.bf16.mxu1 %v11558_v55  ;;  %v6862_v17 = vmax.f32 %v6424_v56, 0.0  ;;  %v6429_v49 = vpop.f32.mrf.mxu1  ;;  %v6426_v13 = vadd.f32 %v6425_v62, %v6383_v47  ;;  %v11598_v38 = vld [vmem:[#allocation16 + $0x568] ss:$48 sps:$4 sm:$0xff]   ;;  %v11606_v62 = vld [vmem:[#allocation16 + $0x50c] ss:$48 sps:$4 sm:$0xff]  }
0x15b3   :  { %6823 = vmatprep.subr.bf16.mxu0 %v11561_v3  ;;  %v6386_v11 = vpop.f32.mrf.mxu0  ;;  %v11601_v55 = vld [vmem:[#allocation19 + $0x90] ss:$12 sps:$4 sm:$0xff]   ;;  %v11607_v56 = vld [vmem:[#allocation19 + $0x78] ss:$12 sps:$4 sm:$0xff]  }
0x15b4   :  { %v6428_v42 = vadd.f32 %v6427_v4, %v6385_v33  ;;  %v6387_v58 = vadd.f32 %v6386_v11, %v4853_v1  ;;  %v6863_v0 = vmax.f32 %v6426_v13, 0.0  ;;  %v11604_v3 = vld [vmem:[#allocation16 + $0x508] ss:$48 sps:$4 sm:$0xff]   ;;  %v11612_v57 = vld [vmem:[#allocation16 + $0x4ac] ss:$48 sps:$4 sm:$0xff]  }
0x15b5   :  { %6781 = vmatpush1.bf16.msra.mxu1 %v11556_v59  ;;  %v11615_v59 = vld [vmem:[#allocation19 + $0x64] ss:$12 sps:$4 sm:$0xff]   ;;  %v11610_v33 = vld [vmem:[#allocation16 + $0x4a8] ss:$48 sps:$4 sm:$0xff]  }
0x15b6   :  { %v6874_v8 = vmax.f32 %v6428_v42, 0.0  ;;  %6824 = vmatpush1.bf16.msra.mxu0 %v11559_v39  ;;  %6782 = vmatprep.subr.bf16.mxu1 %v11564_v61  ;;  %v6430_v37 = vadd.f32 %v6429_v49, %v6387_v58  ;;  %v11618_v39 = vld [vmem:[#allocation16 + $0x44c] ss:$48 sps:$4 sm:$0xff]   ;;  %v11621_v61 = vld [vmem:[#allocation19 + $0x4c] ss:$12 sps:$4 sm:$0xff]  }
0x15b7   :  { %6825 = vmatprep.subr.bf16.mxu0 %v11567_v5  ;;  %v11616_v4 = vld [vmem:[#allocation16 + $0x448] ss:$48 sps:$4 sm:$0xff]   ;;  %v11619_v5 = vld [vmem:[#allocation19 + $0x48] ss:$12 sps:$4 sm:$0xff]   ;;  %v11624_v42 = vld [vmem:[#allocation16 + $0x3ec] ss:$48 sps:$4 sm:$0xff]  }
0x15b8   :  { %v13083_v51 = vpack.c.bf16 %v6874_v8, %v6862_v17  ;;  %v6875_v63 = vmax.f32 %v6430_v37, 0.0  ;;  %v11622_v17 = vld [vmem:[#allocation16 + $0x3e8] ss:$48 sps:$4 sm:$0xff]   ;;  %v11643_v58 = vld [vmem:[#allocation19 + $0x168] ss:$12 sps:$4 sm:$0xff]  }
0x15b9   :  { %6783 = vmatpush1.bf16.msra.mxu1 %v11562_v6  ;;  %v11627_v6 = vld [vmem:[#allocation19 + $0x34] ss:$12 sps:$4 sm:$0xff]   ;;  %v11625_v8 = vld [vmem:[#allocation19 + $0x30] ss:$12 sps:$4 sm:$0xff]   ;;  %v11645_v1 = vld [vmem:[#allocation19 + $0x16c] ss:$12 sps:$4 sm:$0xff]  }
0x15ba   :  { %6826 = vmatpush1.bf16.msra.mxu0 %v11565_v52  ;;  %6784 = vmatprep.subr.bf16.mxu1 %v11570_v9  ;;  %v13087_v10 = vpack.c.bf16 %v6875_v63, %v6863_v0  ;;  %v11630_v52 = vld [vmem:[#allocation16 + $0x38c] ss:$48 sps:$4 sm:$0xff]   ;;  %v11633_v9 = vld [vmem:[#allocation19 + $0x1c] ss:$12 sps:$4 sm:$0xff]  }
0x15bb   :  { %6827 = vmatprep.subr.bf16.mxu0 %v11573_v46  ;;  %v11628_v46 = vld [vmem:[#allocation16 + $0x388] ss:$48 sps:$4 sm:$0xff]  }
0x15bc   :  { %v11637_v11 = vld [vmem:[#allocation19] ss:$12 sps:$4 sm:$0xff]   ;;  %v11654_v13 = vld [vmem:[#allocation19 + $0x1fc] ss:$12 sps:$4 sm:$0xff]  }
0x15bd   :  { %6785 = vmatpush1.bf16.msra.mxu1 %v11568_v14  ;;  %v11631_v14 = vld [vmem:[#allocation19 + $0x18] ss:$12 sps:$4 sm:$0xff]  }
0x15be   :  { %6828 = vmatpush1.bf16.msra.mxu0 %v11571_v35  ;;  %6786 = vmatprep.subr.bf16.mxu1 %v11576_v27  ;;  %v11636_v35 = vld [vmem:[#allocation16 + $0x32c] ss:$48 sps:$4 sm:$0xff]  }
0x15bf   :  { %6829 = vmatprep.subr.bf16.mxu0 %v11579_v15  ;;  %v11639_v27 = vld [vmem:[#allocation19 + $0x4] ss:$12 sps:$4 sm:$0xff]   ;;  %v11634_v15 = vld [vmem:[#allocation16 + $0x328] ss:$48 sps:$4 sm:$0xff]  }
0x15c1   :  { %6787 = vmatpush1.bf16.msra.mxu1 %v11574_v30  ;;  %v11642_v30 = vld [vmem:[#allocation19 + $0x22c] ss:$12 sps:$4 sm:$0xff]  }
0x15c2   :  { %6830 = vmatpush1.bf16.msra.mxu0 %v11577_v43  ;;  %6788 = vmatprep.subr.bf16.mxu1 %v11582_v21  ;;  %v4860_v43 = vsub.s32 3, %v12499_v24 }
0x15c3   :  { %6831 = vmatprep.subr.bf16.mxu0 %v11585_v16  ;;  %v11640_v16 = vld [vmem:[#allocation19 + $0x228] ss:$12 sps:$4 sm:$0xff]  }
0x15c4   :  { %v4861_v47 = vrot.slane %v13075_v23, %v4860_v43 }
0x15c5   :  { %6789 = vmatpush1.bf16.msra.mxu1 %v11580_v60  ;;  %v11648_v60 = vld [vmem:[#allocation19 + $0x214] ss:$12 sps:$4 sm:$0xff]  }
0x15c6   :  { %6832 = vmatpush1.bf16.msra.mxu0 %v11583_v22  ;;  %6790 = vmatprep.subr.bf16.mxu1 %v11588_v12  ;;  %v11651_v22 = vld [vmem:[#allocation19 + $0x154] ss:$12 sps:$4 sm:$0xff]  }
0x15c7   :  { %6833 = vmatprep.subr.bf16.mxu0 %v11591_v36  ;;  %v11646_v36 = vld [vmem:[#allocation19 + $0x210] ss:$12 sps:$4 sm:$0xff]  }
0x15c9   :  { %6791 = vmatpush1.bf16.msra.mxu1 %v11586_v34  ;;  %v11649_v34 = vld [vmem:[#allocation19 + $0x150] ss:$12 sps:$4 sm:$0xff]  }
0x15ca   :  { %6834 = vmatpush1.bf16.msra.mxu0 %v11589_v44  ;;  %6792 = vmatprep.subr.bf16.mxu1 %v11594_v45  ;;  %v11657_v45 = vld [vmem:[#allocation19 + $0x13c] ss:$12 sps:$4 sm:$0xff]  }
0x15cb   :  { %8835 = vmatprep.subr.bf16.mxu0 %v11597_v48 }
0x15cd   :  { %6793 = vmatpush2.bf16.msra.mxu1 %v11592_v50  ;;  %6852 = vmatmul.mubr.bf16.vlgmr.msra.gmra.mxu0 %v13054_v54  ;;  %v11613_v54 = vld [vmem:[#allocation19 + $0x60] ss:$12 sps:$4 sm:$0xff]   ;;  %v13092_v21 = vpop.f32.mrf.mxu0  ;;  %v11652_v50 = vld [vmem:[#allocation19 + $0x1f8] ss:$12 sps:$4 sm:$0xff]  }
0x15ce   :  { %8836 = vmatpush1.bf16.msra.mxu0 %v11595_v31  ;;  %8867 = vmatprep.mubr.bf16.mxu0 %v13087_v10  ;;  %v11660_v31 = vld [vmem:[#allocation19 + $0x1e4] ss:$12 sps:$4 sm:$0xff]  }
0x15cf   :  { %6794 = vmatprep.subr.bf16.mxu1 %v11600_v18  ;;  %8837 = vmatprep.subr.bf16.mxu0 %v11603_v53  ;;  %v6511_v12 = vpop.f32.mrf.mxu0 }
0x15d1   :  { %6795 = vmatpush2.bf16.msra.mxu1 %v11598_v38  ;;  %v13100_v48 = vpop.f32.mrf.mxu0  ;;  %v11663_v38 = vld [vmem:[#allocation19 + $0x124] ss:$12 sps:$4 sm:$0xff]  }
0x15d2   :  { %8838 = vmatpush1.bf16.msra.mxu0 %v11601_v55  ;;  %6796 = vmatprep.subr.bf16.mxu1 %v11606_v62 }
0x15d3   :  { %8839 = vmatprep.subr.bf16.mxu0 %v11609_v2  ;;  %v6515_v55 = vpop.f32.mrf.mxu0  ;;  %v11658_v2 = vld [vmem:[#allocation19 + $0x1e0] ss:$12 sps:$4 sm:$0xff]  }
0x15d5   :  { %6797 = vmatpush2.bf16.msra.mxu1 %v11604_v3  ;;  %v11661_v3 = vld [vmem:[#allocation19 + $0x120] ss:$12 sps:$4 sm:$0xff]  }
0x15d6   :  { %8840 = vmatpush1.bf16.msra.mxu0 %v11607_v56  ;;  %6798 = vmatprep.subr.bf16.mxu1 %v11612_v57  ;;  %v11666_v56 = vld [vmem:[#allocation19 + $0x1cc] ss:$12 sps:$4 sm:$0xff]  }
0x15d7   :  { %8841 = vmatprep.subr.bf16.mxu0 %v11615_v59 }
0x15d9   :  { %6799 = vmatpush2.bf16.msra.mxu1 %v11610_v33  ;;  %v11669_v33 = vld [vmem:[#allocation19 + $0x10c] ss:$12 sps:$4 sm:$0xff]  }
0x15da   :  { %8842 = vmatpush1.bf16.msra.mxu0 %v11613_v54  ;;  %6800 = vmatprep.subr.bf16.mxu1 %v11618_v39  ;;  %v11664_v39 = vld [vmem:[#allocation19 + $0x1c8] ss:$12 sps:$4 sm:$0xff]  }
0x15db   :  { %8843 = vmatprep.subr.bf16.mxu0 %v11621_v61  ;;  %v11667_v61 = vld [vmem:[#allocation19 + $0x108] ss:$12 sps:$4 sm:$0xff]  }
0x15dd   :  { %6801 = vmatpush2.bf16.msra.mxu1 %v11616_v4  ;;  %v11672_v4 = vld [vmem:[#allocation19 + $0x1b4] ss:$12 sps:$4 sm:$0xff]  }
0x15de   :  { %8844 = vmatpush1.bf16.msra.mxu0 %v11619_v5  ;;  %6802 = vmatprep.subr.bf16.mxu1 %v11624_v42  ;;  %v11675_v5 = vld [vmem:[#allocation19 + $0xf4] ss:$12 sps:$4 sm:$0xff]   ;;  %v11670_v42 = vld [vmem:[#allocation19 + $0x1b0] ss:$12 sps:$4 sm:$0xff]  }
0x15df   :  { %8845 = vmatprep.subr.bf16.mxu0 %v11627_v6  ;;  %v11673_v6 = vld [vmem:[#allocation19 + $0xf0] ss:$12 sps:$4 sm:$0xff]  }
0x15e1   :  { %6803 = vmatpush2.bf16.msra.mxu1 %v11622_v17  ;;  %v11678_v17 = vld [vmem:[#allocation19 + $0x19c] ss:$12 sps:$4 sm:$0xff]  }
0x15e2   :  { %8846 = vmatpush1.bf16.msra.mxu0 %v11625_v8  ;;  %6804 = vmatprep.subr.bf16.mxu1 %v11630_v52  ;;  %v11681_v8 = vld [vmem:[#allocation19 + $0xdc] ss:$12 sps:$4 sm:$0xff]   ;;  %v11676_v52 = vld [vmem:[#allocation19 + $0x198] ss:$12 sps:$4 sm:$0xff]  }
0x15e3   :  { %8847 = vmatprep.subr.bf16.mxu0 %v11633_v9  ;;  %v11679_v9 = vld [vmem:[#allocation19 + $0xd8] ss:$12 sps:$4 sm:$0xff]  }
0x15e5   :  { %6805 = vmatpush2.bf16.msra.mxu1 %v11628_v46  ;;  %v11684_v46 = vld [vmem:[#allocation19 + $0x184] ss:$12 sps:$4 sm:$0xff]  }
0x15e6   :  { %8848 = vmatpush1.bf16.msra.mxu0 %v11631_v14  ;;  %6806 = vmatprep.subr.bf16.mxu1 %v11636_v35  ;;  %v11687_v14 = vld [vmem:[#allocation19 + $0xc4] ss:$12 sps:$4 sm:$0xff]   ;;  %v11682_v35 = vld [vmem:[#allocation19 + $0x180] ss:$12 sps:$4 sm:$0xff]  }
0x15e7   :  { %8849 = vmatprep.subr.bf16.mxu0 %v11639_v27  ;;  %v11685_v27 = vld [vmem:[#allocation19 + $0xc0] ss:$12 sps:$4 sm:$0xff]  }
0x15e9   :  { %6807 = vmatpush2.bf16.msra.mxu1 %v11634_v15  ;;  %v11690_v15 = vld [vmem:[#allocation19 + $0x2ec] ss:$12 sps:$4 sm:$0xff]  }
0x15ea   :  { %8850 = vmatpush1.bf16.msra.mxu0 %v11637_v11  ;;  %8878 = vmatprep.subr.bf16.mxu1 %v11642_v30  ;;  %v11693_v11 = vld [vmem:[#allocation19 + $0x3ac] ss:$12 sps:$4 sm:$0xff]   ;;  %v4868_v30 = vsub.s32 5, %v12499_v24 }
0x15eb   :  { %8851 = vmatprep.subr.bf16.mxu0 %v11645_v1  ;;  %v11688_v1 = vld [vmem:[#allocation19 + $0x2e8] ss:$12 sps:$4 sm:$0xff]  }
0x15ec   :  { %v13097_v49 = vpop.f32.mrf.mxu1  ;;  %6809 = vmatmul.mubr.bf16.vlgmr.msra.gmra.mxu1 %v13056_v40  ;;  %v11655_v40 = vld [vmem:[#allocation19 + $0x138] ss:$12 sps:$4 sm:$0xff]  }
0x15ed   :  { %8879 = vmatpush1.bf16.msra.mxu1 %v11640_v16  ;;  %v11691_v16 = vld [vmem:[#allocation19 + $0x3a8] ss:$12 sps:$4 sm:$0xff]  }
0x15ee   :  { %v6468_v37 = vpop.f32.mrf.mxu1  ;;  %8852 = vmatpush2.bf16.msra.mxu0 %v11643_v58  ;;  %8880 = vmatprep.subr.bf16.mxu1 %v11648_v60  ;;  %v11696_v58 = vld [vmem:[#allocation19 + $0x2d4] ss:$12 sps:$4 sm:$0xff]  }
0x15ef   :  { %v6469_v44 = vadd.f32 %v6468_v37, %v4861_v47  ;;  %8853 = vmatprep.subr.bf16.mxu0 %v11651_v22  ;;  %v11699_v60 = vld [vmem:[#allocation19 + $0x394] ss:$12 sps:$4 sm:$0xff]   ;;  %v4869_v22 = vrot.slane %v13075_v23, %v4868_v30 }
0x15f0   :  { %v13102_v63 = vpop.f32.mrf.mxu1 }
0x15f1   :  { %8881 = vmatpush1.bf16.msra.mxu1 %v11646_v36  ;;  %v6512_v18 = vadd.f32 %v6511_v12, %v6469_v44  ;;  %v11694_v36 = vld [vmem:[#allocation19 + $0x2d0] ss:$12 sps:$4 sm:$0xff]  }
0x15f2   :  { %v6472_v0 = vpop.f32.mrf.mxu1  ;;  %8854 = vmatpush2.bf16.msra.mxu0 %v11649_v34  ;;  %8882 = vmatprep.subr.bf16.mxu1 %v11654_v13  ;;  %v11697_v34 = vld [vmem:[#allocation19 + $0x390] ss:$12 sps:$4 sm:$0xff]  }
0x15f3   :  { %v6473_v53 = vadd.f32 %v6472_v0, %v4861_v47  ;;  %8855 = vmatprep.subr.bf16.mxu0 %v11657_v45  ;;  %v6865_v57 = vmax.f32 %v6512_v18, 0.0  ;;  %v11702_v13 = vld [vmem:[#allocation19 + $0x2bc] ss:$12 sps:$4 sm:$0xff]   ;;  %v11703_v18 = vld [vmem:[#allocation19 + $0x378] ss:$12 sps:$4 sm:$0xff]  }
0x15f4   :  { %v11705_v45 = vld [vmem:[#allocation19 + $0x37c] ss:$12 sps:$4 sm:$0xff]  }
0x15f5   :  { %v6516_v62 = vadd.f32 %v6515_v55, %v6473_v53  ;;  %8883 = vmatpush1.bf16.msra.mxu1 %v11652_v50  ;;  %v11708_v53 = vld [vmem:[#allocation19 + $0x2a4] ss:$12 sps:$4 sm:$0xff]  }
0x15f6   :  { %8856 = vmatpush2.bf16.msra.mxu0 %v11655_v40  ;;  %8884 = vmatprep.subr.bf16.mxu1 %v11660_v31  ;;  %v11700_v31 = vld [vmem:[#allocation19 + $0x2b8] ss:$12 sps:$4 sm:$0xff]  }
0x15f7   :  { %v6877_v59 = vmax.f32 %v6516_v62, 0.0  ;;  %8857 = vmatprep.subr.bf16.mxu0 %v11663_v38  ;;  %v11711_v55 = vld [vmem:[#allocation19 + $0x364] ss:$12 sps:$4 sm:$0xff]  }
0x15f9   :  { %8885 = vmatpush1.bf16.msra.mxu1 %v11658_v2  ;;  %v13104_v54 = vpack.c.bf16 %v6877_v59, %v6865_v57  ;;  %v11709_v59 = vld [vmem:[#allocation19 + $0x360] ss:$12 sps:$4 sm:$0xff]  }
0x15fa   :  { %8858 = vmatpush2.bf16.msra.mxu0 %v11661_v3  ;;  %8886 = vmatprep.subr.bf16.mxu1 %v11666_v56  ;;  %v11706_v56 = vld [vmem:[#allocation19 + $0x2a0] ss:$12 sps:$4 sm:$0xff]  }
0x15fb   :  { %8910 = vmatprep.mubr.bf16.mxu1 %v13104_v54  ;;  %8859 = vmatprep.subr.bf16.mxu0 %v11669_v33  ;;  %v11714_v33 = vld [vmem:[#allocation19 + $0x28c] ss:$12 sps:$4 sm:$0xff]  }
0x15fd   :  { %8887 = vmatpush1.bf16.msra.mxu1 %v11664_v39  ;;  %v11717_v39 = vld [vmem:[#allocation19 + $0x34c] ss:$12 sps:$4 sm:$0xff]  }
0x15fe   :  { %8860 = vmatpush2.bf16.msra.mxu0 %v11667_v61  ;;  %8888 = vmatprep.subr.bf16.mxu1 %v11672_v4 }
0x15ff   :  { %8861 = vmatprep.subr.bf16.mxu0 %v11675_v5  ;;  %v11712_v5 = vld [vmem:[#allocation19 + $0x288] ss:$12 sps:$4 sm:$0xff]  }
0x1601   :  { %8889 = vmatpush1.bf16.msra.mxu1 %v11670_v42 }
0x1602   :  { %8862 = vmatpush2.bf16.msra.mxu0 %v11673_v6  ;;  %8890 = vmatprep.subr.bf16.mxu1 %v11678_v17  ;;  %v11715_v6 = vld [vmem:[#allocation19 + $0x348] ss:$12 sps:$4 sm:$0xff]  }
0x1603   :  { %8863 = vmatprep.subr.bf16.mxu0 %v11681_v8  ;;  %v11720_v17 = vld [vmem:[#allocation19 + $0x274] ss:$12 sps:$4 sm:$0xff]  }
0x1604   :  { %v11723_v8 = vld [vmem:[#allocation19 + $0x334] ss:$12 sps:$4 sm:$0xff]  }
0x1605   :  { %8891 = vmatpush1.bf16.msra.mxu1 %v11676_v52  ;;  %v4857_v52 = vrot.slane %v13075_v23, %v12505_v26 }
0x1606   :  { %8864 = vmatpush2.bf16.msra.mxu0 %v11679_v9  ;;  %8892 = vmatprep.subr.bf16.mxu1 %v11684_v46  ;;  %v11718_v9 = vld [vmem:[#allocation19 + $0x270] ss:$12 sps:$4 sm:$0xff]  }
0x1607   :  { %8865 = vmatprep.subr.bf16.mxu0 %v11687_v14  ;;  %v6471_v46 = vadd.f32 %v13102_v63, %v4857_v52  ;;  %v11721_v14 = vld [vmem:[#allocation19 + $0x330] ss:$12 sps:$4 sm:$0xff]  }
0x1609   :  { %8893 = vmatpush1.bf16.msra.mxu1 %v11682_v35  ;;  %v11726_v35 = vld [vmem:[#allocation19 + $0x25c] ss:$12 sps:$4 sm:$0xff]   ;;  %v6514_v30 = vadd.f32 %v13100_v48, %v6471_v46 }
0x160a   :  { %8866 = vmatpush2.bf16.msra.mxu0 %v11685_v27  ;;  %8894 = vmatprep.subr.bf16.mxu1 %v11690_v15  ;;  %v11729_v27 = vld [vmem:[#allocation19 + $0x31c] ss:$12 sps:$4 sm:$0xff]   ;;  %v6467_v15 = vadd.f32 %v13097_v49, %v4857_v52  ;;  %v11741_v49 = vld [vmem:[#allocation19 + $0x46c] ss:$12 sps:$4 sm:$0xff]  }
0x160b   :  { %8921 = vmatprep.subr.bf16.mxu0 %v11693_v11  ;;  %v11724_v11 = vld [vmem:[#allocation19 + $0x258] ss:$12 sps:$4 sm:$0xff]   ;;  %v11736_v48 = vld [vmem:[#allocation19 + $0x528] ss:$12 sps:$4 sm:$0xff]  }
0x160c   :  { %v13108_v47 = vpop.f32.mrf.mxu1  ;;  %v6510_v63 = vadd.f32 %v13092_v21, %v6467_v15  ;;  %v11747_v21 = vld [vmem:[#allocation19 + $0x454] ss:$12 sps:$4 sm:$0xff]   ;;  %v11774_v52 = vld [vmem:[#allocation19 + $0x49c] ss:$12 sps:$4 sm:$0xff]   ;;  %v11780_v15 = vld [vmem:[#allocation19 + $0x484] ss:$12 sps:$4 sm:$0xff]  }
0x160d   :  { %v13111_v12 = vpop.f32.mrf.mxu0  ;;  %8868 = vmatmul.mubr.bf16.vlgmr.msra.gmra.mxu0 %v13083_v51  ;;  %8895 = vmatpush2.bf16.msra.mxu1 %v11688_v1  ;;  %v11727_v1 = vld [vmem:[#allocation19 + $0x318] ss:$12 sps:$4 sm:$0xff]   ;;  %v11777_v46 = vld [vmem:[#allocation19 + $0x3dc] ss:$12 sps:$4 sm:$0xff]  }
0x160e   :  { %v6597_v37 = vpop.f32.mrf.mxu1  ;;  %8922 = vmatpush1.bf16.msra.mxu0 %v11691_v16  ;;  %8896 = vmatprep.subr.bf16.mxu1 %v11696_v58  ;;  %v11732_v16 = vld [vmem:[#allocation19 + $0x244] ss:$12 sps:$4 sm:$0xff]  }
0x160f   :  { %v6554_v44 = vpop.f32.mrf.mxu0  ;;  %8923 = vmatprep.subr.bf16.mxu0 %v11699_v60  ;;  %v11735_v58 = vld [vmem:[#allocation19 + $0x304] ss:$12 sps:$4 sm:$0xff]   ;;  %v11730_v60 = vld [vmem:[#allocation19 + $0x240] ss:$12 sps:$4 sm:$0xff]  }
0x1610   :  { %v6555_v50 = vadd.f32 %v6554_v44, %v4869_v22  ;;  %v13114_v0 = vpop.f32.mrf.mxu1  ;;  %v11739_v44 = vld [vmem:[#allocation19 + $0x468] ss:$12 sps:$4 sm:$0xff]  }
0x1611   :  { %v13116_v40 = vpop.f32.mrf.mxu0  ;;  %8897 = vmatpush2.bf16.msra.mxu1 %v11694_v36  ;;  %v11733_v36 = vld [vmem:[#allocation19 + $0x300] ss:$12 sps:$4 sm:$0xff]  }
0x1612   :  { %8924 = vmatpush1.bf16.msra.mxu0 %v11697_v34  ;;  %8898 = vmatprep.subr.bf16.mxu1 %v11702_v13  ;;  %v6598_v62 = vadd.f32 %v6597_v37, %v6555_v50  ;;  %v6601_v3 = vpop.f32.mrf.mxu1  ;;  %v11738_v37 = vld [vmem:[#allocation19 + $0x52c] ss:$12 sps:$4 sm:$0xff]   ;;  %v6864_v34 = vmax.f32 %v6510_v63, 0.0  ;;  %v11742_v50 = vld [vmem:[#allocation19 + $0x510] ss:$12 sps:$4 sm:$0xff]  }
0x1613   :  { %v6558_v38 = vpop.f32.mrf.mxu0  ;;  %8925 = vmatprep.subr.bf16.mxu0 %v11705_v45  ;;  %v11744_v45 = vld [vmem:[#allocation19 + $0x514] ss:$12 sps:$4 sm:$0xff]  }
0x1614   :  { %v6559_v2 = vadd.f32 %v6558_v38, %v4869_v22  ;;  %v6867_v61 = vmax.f32 %v6598_v62, 0.0  ;;  %v6876_v22 = vmax.f32 %v6514_v30, 0.0  ;;  %v11748_v38 = vld [vmem:[#allocation19 + $0x4f8] ss:$12 sps:$4 sm:$0xff]  }
0x1615   :  { %8899 = vmatpush2.bf16.msra.mxu1 %v11700_v31  ;;  %v11745_v31 = vld [vmem:[#allocation19 + $0x450] ss:$12 sps:$4 sm:$0xff]  }
0x1616   :  { %v6602_v57 = vadd.f32 %v6601_v3, %v6559_v2  ;;  %8926 = vmatpush1.bf16.msra.mxu0 %v11703_v18  ;;  %8900 = vmatprep.subr.bf16.mxu1 %v11708_v53  ;;  %v13127_v13 = vpack.c.bf16 %v6876_v22, %v6864_v34  ;;  %v11750_v18 = vld [vmem:[#allocation19 + $0x4fc] ss:$12 sps:$4 sm:$0xff]   ;;  %v11756_v62 = vld [vmem:[#allocation19 + $0x4e4] ss:$12 sps:$4 sm:$0xff]   ;;  %v11754_v3 = vld [vmem:[#allocation19 + $0x4e0] ss:$12 sps:$4 sm:$0xff]  }
0x1617   :  { %8927 = vmatprep.subr.bf16.mxu0 %v11711_v55  ;;  %v11753_v53 = vld [vmem:[#allocation19 + $0x43c] ss:$12 sps:$4 sm:$0xff]   ;;  %v11751_v55 = vld [vmem:[#allocation19 + $0x438] ss:$12 sps:$4 sm:$0xff]  }
0x1618   :  { %v6879_v4 = vmax.f32 %v6602_v57, 0.0  ;;  %v11759_v2 = vld [vmem:[#allocation19 + $0x424] ss:$12 sps:$4 sm:$0xff]   ;;  %v11762_v57 = vld [vmem:[#allocation19 + $0x4cc] ss:$12 sps:$4 sm:$0xff]  }
0x1619   :  { %8901 = vmatpush2.bf16.msra.mxu1 %v11706_v56  ;;  %v11757_v56 = vld [vmem:[#allocation19 + $0x420] ss:$12 sps:$4 sm:$0xff]   ;;  %v11783_v30 = vld [vmem:[#allocation19 + $0x3c4] ss:$12 sps:$4 sm:$0xff]  }
0x161a   :  { %8928 = vmatpush1.bf16.msra.mxu0 %v11709_v59  ;;  %8902 = vmatprep.subr.bf16.mxu1 %v11714_v33  ;;  %v13118_v42 = vpack.c.bf16 %v6879_v4, %v6867_v61  ;;  %v11765_v59 = vld [vmem:[#allocation19 + $0x40c] ss:$12 sps:$4 sm:$0xff]   ;;  %v4864_v33 = vsub.s32 4, %v12499_v24  ;;  %v11763_v61 = vld [vmem:[#allocation19 + $0x408] ss:$12 sps:$4 sm:$0xff]  }
0x161b   :  { %8929 = vmatprep.subr.bf16.mxu0 %v11717_v39  ;;  %v11760_v39 = vld [vmem:[#allocation19 + $0x4c8] ss:$12 sps:$4 sm:$0xff]  }
0x161c   :  { %8953 = vmatprep.mubr.bf16.mxu0 %v13118_v42  ;;  %v11768_v4 = vld [vmem:[#allocation19 + $0x4b4] ss:$12 sps:$4 sm:$0xff]  }
0x161d   :  { %8903 = vmatpush2.bf16.msra.mxu1 %v11712_v5  ;;  %v11771_v5 = vld [vmem:[#allocation19 + $0x3f4] ss:$12 sps:$4 sm:$0xff]  }
0x161e   :  { %8930 = vmatpush1.bf16.msra.mxu0 %v11715_v6  ;;  %8904 = vmatprep.subr.bf16.mxu1 %v11720_v17  ;;  %v4865_v6 = vrot.slane %v13075_v23, %v4864_v33  ;;  %v11766_v17 = vld [vmem:[#allocation19 + $0x4b0] ss:$12 sps:$4 sm:$0xff]  }
0x161f   :  { %8931 = vmatprep.subr.bf16.mxu0 %v11723_v8  ;;  %v11769_v8 = vld [vmem:[#allocation19 + $0x3f0] ss:$12 sps:$4 sm:$0xff]  }
0x1621   :  { %8905 = vmatpush2.bf16.msra.mxu1 %v11718_v9  ;;  %v6557_v9 = vadd.f32 %v13116_v40, %v4865_v6  ;;  %v11781_v40 = vld [vmem:[#allocation19 + $0x3c0] ss:$12 sps:$4 sm:$0xff]  }
0x1622   :  { %8932 = vmatpush1.bf16.msra.mxu0 %v11721_v14  ;;  %8906 = vmatprep.subr.bf16.mxu1 %v11726_v35  ;;  %v6553_v14 = vadd.f32 %v13111_v12, %v4865_v6  ;;  %v11772_v35 = vld [vmem:[#allocation19 + $0x498] ss:$12 sps:$4 sm:$0xff]   ;;  %v11805_v6 = vld [vmem:[#allocation19 + $0x660] ss:$12 sps:$4 sm:$0xff]  }
0x1623   :  { %8933 = vmatprep.subr.bf16.mxu0 %v11729_v27  ;;  %v11775_v27 = vld [vmem:[#allocation19 + $0x3d8] ss:$12 sps:$4 sm:$0xff]  }
0x1624   :  { %v11789_v12 = vld [vmem:[#allocation19 + $0x6ac] ss:$12 sps:$4 sm:$0xff]  }
0x1625   :  { %8907 = vmatpush2.bf16.msra.mxu1 %v11724_v11  ;;  %v6600_v11 = vadd.f32 %v13114_v0, %v6557_v9  ;;  %v11784_v0 = vld [vmem:[#allocation19 + $0x5e8] ss:$12 sps:$4 sm:$0xff]   ;;  %v11813_v9 = vld [vmem:[#allocation19 + $0x64c] ss:$12 sps:$4 sm:$0xff]  }
0x1626   :  { %8934 = vmatpush1.bf16.msra.mxu0 %v11727_v1  ;;  %8908 = vmatprep.subr.bf16.mxu1 %v11732_v16  ;;  %v6596_v1 = vadd.f32 %v13108_v47, %v6553_v14  ;;  %v11778_v16 = vld [vmem:[#allocation19 + $0x480] ss:$12 sps:$4 sm:$0xff]  }
0x1627   :  { %8935 = vmatprep.subr.bf16.mxu0 %v11735_v58  ;;  %v11786_v58 = vld [vmem:[#allocation19 + $0x5ec] ss:$12 sps:$4 sm:$0xff]   ;;  %v6878_v63 = vmax.f32 %v6600_v11, 0.0  ;;  %v11792_v47 = vld [vmem:[#allocation19 + $0x5d4] ss:$12 sps:$4 sm:$0xff]  }
0x1628   :  { %v11819_v11 = vld [vmem:[#allocation19 + $0x634] ss:$12 sps:$4 sm:$0xff]  }
0x1629   :  { %8909 = vmatpush2.bf16.msra.mxu1 %v11730_v60  ;;  %v4876_v60 = vsub.s32 7, %v12499_v24 }
0x162a   :  { %8936 = vmatpush1.bf16.msra.mxu0 %v11733_v36  ;;  %8964 = vmatprep.subr.bf16.mxu1 %v11738_v37  ;;  %v6866_v36 = vmax.f32 %v6596_v1, 0.0  ;;  %v11787_v37 = vld [vmem:[#allocation19 + $0x6a8] ss:$12 sps:$4 sm:$0xff]   ;;  %v11814_v1 = vld [vmem:[#allocation19 + $0x570] ss:$12 sps:$4 sm:$0xff]  }
0x162b   :  { %8937 = vmatprep.subr.bf16.mxu0 %v11741_v49  ;;  %v4877_v34 = vrot.slane %v13075_v23, %v4876_v60  ;;  %v11820_v60 = vld [vmem:[#allocation19 + $0x558] ss:$12 sps:$4 sm:$0xff]  }
0x162c   :  { %8911 = vmatmul.mubr.bf16.vlgmr.msra.gmra.mxu1 %v13127_v13  ;;  %v13139_v49 = vpack.c.bf16 %v6878_v63, %v6866_v36  ;;  %v11825_v63 = vld [vmem:[#allocation19 + $0x61c] ss:$12 sps:$4 sm:$0xff]  }
0x162d   :  { %8965 = vmatpush1.bf16.msra.mxu1 %v11736_v48  ;;  %v13137_v22 = vpop.f32.mrf.mxu0  ;;  %v11795_v48 = vld [vmem:[#allocation19 + $0x694] ss:$12 sps:$4 sm:$0xff]  }
0x162e   :  { %8938 = vmatpush2.bf16.msra.mxu0 %v11739_v44  ;;  %8966 = vmatprep.subr.bf16.mxu1 %v11744_v45 }
0x162f   :  { %8939 = vmatprep.subr.bf16.mxu0 %v11747_v21  ;;  %v6683_v44 = vpop.f32.mrf.mxu0  ;;  %v11790_v21 = vld [vmem:[#allocation19 + $0x5d0] ss:$12 sps:$4 sm:$0xff]  }
0x1631   :  { %8967 = vmatpush1.bf16.msra.mxu1 %v11742_v50 }
0x1632   :  { %8940 = vmatpush2.bf16.msra.mxu0 %v11745_v31  ;;  %8968 = vmatprep.subr.bf16.mxu1 %v11750_v18  ;;  %v11793_v31 = vld [vmem:[#allocation19 + $0x690] ss:$12 sps:$4 sm:$0xff]  }
0x1633   :  { %8941 = vmatprep.subr.bf16.mxu0 %v11753_v53  ;;  %v11798_v18 = vld [vmem:[#allocation19 + $0x5bc] ss:$12 sps:$4 sm:$0xff]  }
0x1635   :  { %8969 = vmatpush1.bf16.msra.mxu1 %v11748_v38  ;;  %v11801_v38 = vld [vmem:[#allocation19 + $0x67c] ss:$12 sps:$4 sm:$0xff]  }
0x1636   :  { %8942 = vmatpush2.bf16.msra.mxu0 %v11751_v55  ;;  %8970 = vmatprep.subr.bf16.mxu1 %v11756_v62  ;;  %v6685_v55 = vpop.f32.mrf.mxu0 }
0x1637   :  { %8943 = vmatprep.subr.bf16.mxu0 %v11759_v2  ;;  %v11796_v2 = vld [vmem:[#allocation19 + $0x5b8] ss:$12 sps:$4 sm:$0xff]  }
0x1639   :  { %8971 = vmatpush1.bf16.msra.mxu1 %v11754_v3 }
0x163a   :  { %8944 = vmatpush2.bf16.msra.mxu0 %v11757_v56  ;;  %8972 = vmatprep.subr.bf16.mxu1 %v11762_v57  ;;  %v11799_v56 = vld [vmem:[#allocation19 + $0x678] ss:$12 sps:$4 sm:$0xff]  }
0x163b   :  { %8945 = vmatprep.subr.bf16.mxu0 %v11765_v59  ;;  %v11804_v57 = vld [vmem:[#allocation19 + $0x5a4] ss:$12 sps:$4 sm:$0xff]  }
0x163d   :  { %8973 = vmatpush1.bf16.msra.mxu1 %v11760_v39  ;;  %v11807_v39 = vld [vmem:[#allocation19 + $0x664] ss:$12 sps:$4 sm:$0xff]  }
0x163e   :  { %8946 = vmatpush2.bf16.msra.mxu0 %v11763_v61  ;;  %8974 = vmatprep.subr.bf16.mxu1 %v11768_v4  ;;  %v6687_v61 = vpop.f32.mrf.mxu0 }
0x163f   :  { %8947 = vmatprep.subr.bf16.mxu0 %v11771_v5  ;;  %v11802_v5 = vld [vmem:[#allocation19 + $0x5a0] ss:$12 sps:$4 sm:$0xff]  }
0x1641   :  { %8975 = vmatpush1.bf16.msra.mxu1 %v11766_v17  ;;  %v11810_v17 = vld [vmem:[#allocation19 + $0x58c] ss:$12 sps:$4 sm:$0xff]  }
0x1642   :  { %8948 = vmatpush2.bf16.msra.mxu0 %v11769_v8  ;;  %8976 = vmatprep.subr.bf16.mxu1 %v11774_v52 }
0x1643   :  { %8949 = vmatprep.subr.bf16.mxu0 %v11777_v46  ;;  %v4872_v46 = vsub.s32 6, %v12499_v24 }
0x1645   :  { %8977 = vmatpush1.bf16.msra.mxu1 %v11772_v35  ;;  %v11808_v35 = vld [vmem:[#allocation19 + $0x588] ss:$12 sps:$4 sm:$0xff]  }
0x1646   :  { %8950 = vmatpush2.bf16.msra.mxu0 %v11775_v27  ;;  %8978 = vmatprep.subr.bf16.mxu1 %v11780_v15  ;;  %v11811_v27 = vld [vmem:[#allocation19 + $0x648] ss:$12 sps:$4 sm:$0xff]  }
0x1647   :  { %8951 = vmatprep.subr.bf16.mxu0 %v11783_v30  ;;  %v11816_v15 = vld [vmem:[#allocation19 + $0x574] ss:$12 sps:$4 sm:$0xff]   ;;  %v4873_v30 = vrot.slane %v13075_v23, %v4872_v46  ;;  %v11843_v46 = vld [vmem:[#allocation19 + $0x724] ss:$12 sps:$4 sm:$0xff]  }
0x1649   :  { %8979 = vmatpush1.bf16.msra.mxu1 %v11778_v16 }
0x164a   :  { %8952 = vmatpush2.bf16.msra.mxu0 %v11781_v40  ;;  %8980 = vmatprep.subr.bf16.mxu1 %v11786_v58  ;;  %v11817_v40 = vld [vmem:[#allocation19 + $0x630] ss:$12 sps:$4 sm:$0xff]  }
0x164b   :  { %9007 = vmatprep.subr.bf16.mxu0 %v11789_v12  ;;  %v11822_v58 = vld [vmem:[#allocation19 + $0x55c] ss:$12 sps:$4 sm:$0xff]  }
0x164c   :  { %v6638_v45 = vpop.f32.mrf.mxu1 }
0x164d   :  { %8954 = vmatmul.mubr.bf16.vlgmr.msra.gmra.mxu0 %v13139_v49  ;;  %8981 = vmatpush2.bf16.msra.mxu1 %v11784_v0  ;;  %v6639_v12 = vadd.f32 %v6638_v45, %v4873_v30  ;;  %v11823_v0 = vld [vmem:[#allocation19 + $0x618] ss:$12 sps:$4 sm:$0xff]  }
0x164e   :  { %v6640_v50 = vpop.f32.mrf.mxu1  ;;  %9008 = vmatpush1.bf16.msra.mxu0 %v11787_v37  ;;  %8982 = vmatprep.subr.bf16.mxu1 %v11792_v47  ;;  %v11828_v37 = vld [vmem:[#allocation19 + $0x544] ss:$12 sps:$4 sm:$0xff]   ;;  %v11834_v45 = vld [vmem:[#allocation19 + $0x76c] ss:$12 sps:$4 sm:$0xff]  }
0x164f   :  { %v6641_v53 = vadd.f32 %v6640_v50, %v4877_v34  ;;  %9009 = vmatprep.subr.bf16.mxu0 %v11795_v48  ;;  %v11831_v47 = vld [vmem:[#allocation19 + $0x604] ss:$12 sps:$4 sm:$0xff]   ;;  %v6682_v23 = vadd.f32 %v13137_v22, %v6639_v12  ;;  %v11837_v22 = vld [vmem:[#allocation19 + $0x754] ss:$12 sps:$4 sm:$0xff]  }
0x1650   :  { %v6642_v62 = vpop.f32.mrf.mxu1  ;;  %v11868_v12 = vld [vmem:[#allocation19 + $0x7c8] ss:$12 sps:$4 sm:$0xff]  }
0x1651   :  { %8983 = vmatpush2.bf16.msra.mxu1 %v11790_v21  ;;  %v6684_v59 = vadd.f32 %v6683_v44, %v6641_v53  ;;  %v6643_v16 = vadd.f32 %v6642_v62, %v4873_v30  ;;  %v11829_v44 = vld [vmem:[#allocation19 + $0x600] ss:$12 sps:$4 sm:$0xff]   ;;  %v6868_v50 = vmax.f32 %v6682_v23, 0.0  ;;  %v11832_v53 = vld [vmem:[#allocation19 + $0x768] ss:$12 sps:$4 sm:$0xff]  }
0x1652   :  { %v6644_v3 = vpop.f32.mrf.mxu1  ;;  %9010 = vmatpush1.bf16.msra.mxu0 %v11793_v31  ;;  %8984 = vmatprep.subr.bf16.mxu1 %v11798_v18  ;;  %v11846_v21 = vld [vmem:[#allocation19 + $0x82c] ss:$12 sps:$4 sm:$0xff]   ;;  %v11844_v31 = vld [vmem:[#allocation19 + $0x828] ss:$12 sps:$4 sm:$0xff]   ;;  %v11873_v23 = vld [vmem:[#allocation19 + $0x7b0] ss:$12 sps:$4 sm:$0xff]  }
0x1653   :  { %v6645_v33 = vadd.f32 %v6644_v3, %v4877_v34  ;;  %9011 = vmatprep.subr.bf16.mxu0 %v11801_v38  ;;  %v6869_v8 = vmax.f32 %v6684_v59, 0.0  ;;  %v6686_v36 = vadd.f32 %v6685_v55, %v6643_v16  ;;  %v11826_v34 = vld [vmem:[#allocation19 + $0x540] ss:$12 sps:$4 sm:$0xff]   ;;  %v13151_v55 = vld [vmem:[#allocation17 + $0x8] sm:$0xf] }
0x1654   :  { %v11852_v38 = vld [vmem:[#allocation19 + $0x814] ss:$12 sps:$4 sm:$0xff]   ;;  %v11835_v59 = vld [vmem:[#allocation19 + $0x750] ss:$12 sps:$4 sm:$0xff]   ;;  %v11870_v16 = vld [vmem:[#allocation19 + $0x7cc] ss:$12 sps:$4 sm:$0xff]  }
0x1655   :  { %v6688_v4 = vadd.f32 %v6687_v61, %v6645_v33  ;;  %8985 = vmatpush2.bf16.msra.mxu1 %v11796_v2  ;;  %v6880_v48 = vmax.f32 %v6686_v36, 0.0  ;;  %v4885_v2 = vrot.slane %v13151_v55, %v12502_v25  ;;  %v11858_v33 = vld [vmem:[#allocation19 + $0x7fc] ss:$12 sps:$4 sm:$0xff]  }
0x1656   :  { %9012 = vmatpush1.bf16.msra.mxu0 %v11799_v56  ;;  %8986 = vmatprep.subr.bf16.mxu1 %v11804_v57  ;;  %v11850_v56 = vld [vmem:[#allocation19 + $0x810] ss:$12 sps:$4 sm:$0xff]   ;;  %v11847_v36 = vld [vmem:[#allocation19 + $0x708] ss:$12 sps:$4 sm:$0xff]  }
0x1657   :  { %v6881_v52 = vmax.f32 %v6688_v4, 0.0  ;;  %9013 = vmatprep.subr.bf16.mxu0 %v11807_v39  ;;  %v13149_v18 = vpack.c.bf16 %v6880_v48, %v6868_v50  ;;  %v11840_v61 = vld [vmem:[#allocation19 + $0x73c] ss:$12 sps:$4 sm:$0xff]   ;;  %v11878_v50 = vld [vmem:[#allocation19 + $0x798] ss:$12 sps:$4 sm:$0xff]  }
0x1658   :  { %v11880_v48 = vld [vmem:[#allocation19 + $0x79c] ss:$12 sps:$4 sm:$0xff]  }
0x1659   :  { %8987 = vmatpush2.bf16.msra.mxu1 %v11802_v5  ;;  %v13144_v14 = vpack.c.bf16 %v6881_v52, %v6869_v8  ;;  %v11838_v8 = vld [vmem:[#allocation19 + $0x738] ss:$12 sps:$4 sm:$0xff]  }
0x165a   :  { %9014 = vmatpush1.bf16.msra.mxu0 %v11805_v6  ;;  %8988 = vmatprep.subr.bf16.mxu1 %v11810_v17  ;;  %v11856_v17 = vld [vmem:[#allocation19 + $0x7f8] ss:$12 sps:$4 sm:$0xff]  }
0x165b   :  { %8996 = vmatprep.mubr.bf16.mxu1 %v13144_v14  ;;  %9015 = vmatprep.subr.bf16.mxu0 %v11813_v9  ;;  %v11864_v52 = vld [vmem:[#allocation19 + $0x7e4] ss:$12 sps:$4 sm:$0xff]  }
0x165d   :  { %8989 = vmatpush2.bf16.msra.mxu1 %v11808_v35 }
0x165e   :  { %9016 = vmatpush1.bf16.msra.mxu0 %v11811_v27  ;;  %8990 = vmatprep.subr.bf16.mxu1 %v11816_v15 }
0x165f   :  { %9017 = vmatprep.subr.bf16.mxu0 %v11819_v11  ;;  %v11862_v11 = vld [vmem:[#allocation19 + $0x7e0] ss:$12 sps:$4 sm:$0xff]  }
0x1661   :  { %8991 = vmatpush2.bf16.msra.mxu1 %v11814_v1  ;;  %v11841_v1 = vld [vmem:[#allocation19 + $0x720] ss:$12 sps:$4 sm:$0xff]  }
0x1662   :  { %9018 = vmatpush1.bf16.msra.mxu0 %v11817_v40  ;;  %8992 = vmatprep.subr.bf16.mxu1 %v11822_v58  ;;  %v11849_v40 = vld [vmem:[#allocation19 + $0x70c] ss:$12 sps:$4 sm:$0xff]  }
0x1663   :  { %9019 = vmatprep.subr.bf16.mxu0 %v11825_v63 }
0x1665   :  { %8993 = vmatpush2.bf16.msra.mxu1 %v11820_v60 }
0x1666   :  { %9020 = vmatpush1.bf16.msra.mxu0 %v11823_v0  ;;  %8994 = vmatprep.subr.bf16.mxu1 %v11828_v37  ;;  %v11875_v0 = vld [vmem:[#allocation19 + $0x7b4] ss:$12 sps:$4 sm:$0xff]  }
0x1667   :  { %9021 = vmatprep.subr.bf16.mxu0 %v11831_v47  ;;  %v11855_v37 = vld [vmem:[#allocation19 + $0x6f4] ss:$12 sps:$4 sm:$0xff]   ;;  %v4881_v47 = vrot.slane %v13151_v55, %v12508_v28 }
0x1669   :  { %8995 = vmatpush2.bf16.msra.mxu1 %v11826_v34  ;;  %v11853_v34 = vld [vmem:[#allocation19 + $0x6f0] ss:$12 sps:$4 sm:$0xff]  }
0x166a   :  { %9022 = vmatpush1.bf16.msra.mxu0 %v11829_v44  ;;  %9050 = vmatprep.subr.bf16.mxu1 %v11846_v21  ;;  %v11861_v21 = vld [vmem:[#allocation19 + $0x6dc] ss:$12 sps:$4 sm:$0xff]  }
0x166b   :  { %9023 = vmatprep.subr.bf16.mxu0 %v11834_v45 }
0x166c   :  { %v13153_v62 = vpop.f32.mrf.mxu1  ;;  %8997 = vmatmul.mubr.bf16.vlgmr.msra.gmra.mxu1 %v13149_v18 }
0x166d   :  { %v6724_v3 = vpop.f32.mrf.mxu0  ;;  %9051 = vmatpush1.bf16.msra.mxu1 %v11844_v31  ;;  %v11859_v31 = vld [vmem:[#allocation19 + $0x6d8] ss:$12 sps:$4 sm:$0xff]  }
0x166e   :  { %v6769_v57 = vpop.f32.mrf.mxu1  ;;  %9024 = vmatpush2.bf16.msra.mxu0 %v11832_v53  ;;  %9052 = vmatprep.subr.bf16.mxu1 %v11852_v38  ;;  %v6725_v45 = vadd.f32 %v6724_v3, %v4881_v47  ;;  %v11885_v53 = vld [vmem:[#allocation19 + $0x784] ss:$12 sps:$4 sm:$0xff]  }
0x166f   :  { %v6726_v39 = vpop.f32.mrf.mxu0  ;;  %9025 = vmatprep.subr.bf16.mxu0 %v11837_v22  ;;  %v11867_v22 = vld [vmem:[#allocation19 + $0x6c4] ss:$12 sps:$4 sm:$0xff]  }
0x1670   :  { %v6727_v4 = vadd.f32 %v6726_v39, %v4885_v2  ;;  %v6771_v5 = vpop.f32.mrf.mxu1  ;;  %v11871_v3 = vld [vmem:[#allocation19 + $0x170] ss:$12 sps:$4 sm:$0xff]  }
0x1671   :  { %v6728_v6 = vpop.f32.mrf.mxu0  ;;  %9053 = vmatpush1.bf16.msra.mxu1 %v11850_v56  ;;  %v11883_v56 = vld [vmem:[#allocation19 + $0x780] ss:$12 sps:$4 sm:$0xff]  }
0x1672   :  { %9026 = vmatpush2.bf16.msra.mxu0 %v11835_v59  ;;  %9054 = vmatprep.subr.bf16.mxu1 %v11858_v33  ;;  %v6770_v35 = vadd.f32 %v6769_v57, %v6727_v4  ;;  %v6773_v15 = vpop.f32.mrf.mxu1  ;;  %v6729_v44 = vadd.f32 %v6728_v6, %v4881_v47  ;;  %v11865_v57 = vld [vmem:[#allocation19 + $0x6c0] ss:$12 sps:$4 sm:$0xff]   ;;  %v11872_v4 = vld [vmem:[#allocation19 + $0xb0] ss:$12 sps:$4 sm:$0xff]   ;;  %v11876_v6 = vld [vmem:[#allocation19 + $0x158] ss:$12 sps:$4 sm:$0xff]  }
0x1673   :  { %v6730_v9 = vpop.f32.mrf.mxu0  ;;  %9027 = vmatprep.subr.bf16.mxu0 %v11840_v61  ;;  %v11890_v59 = vld [vmem:[#allocation19 + $0x8ec] ss:$12 sps:$4 sm:$0xff]   ;;  %v11888_v61 = vld [vmem:[#allocation19 + $0x8e8] ss:$12 sps:$4 sm:$0xff]  }
0x1674   :  { %v6731_v27 = vadd.f32 %v6730_v9, %v4885_v2  ;;  %v6871_v58 = vmax.f32 %v6770_v35, 0.0  ;;  %v6772_v38 = vadd.f32 %v6771_v5, %v6729_v44  ;;  %v6768_v2 = vadd.f32 %v13153_v62, %v6725_v45  ;;  %v11895_v62 = vld [vmem:[#allocation19 + $0x8d4] ss:$12 sps:$4 sm:$0xff]   ;;  %v11918_v47 = vld [vmem:[#allocation19 + $0x858] ss:$12 sps:$4 sm:$0xff]  }
0x1675   :  { %9055 = vmatpush1.bf16.msra.mxu1 %v11856_v17  ;;  %v11893_v17 = vld [vmem:[#allocation19 + $0x8d0] ss:$12 sps:$4 sm:$0xff]   ;;  %v11881_v9 = vld [vmem:[#allocation19 + $0x140] ss:$12 sps:$4 sm:$0xff]  }
0x1676   :  { %v6774_v30 = vadd.f32 %v6773_v15, %v6731_v27  ;;  %9028 = vmatpush2.bf16.msra.mxu0 %v11838_v8  ;;  %9056 = vmatprep.subr.bf16.mxu1 %v11864_v52  ;;  %v6882_v33 = vmax.f32 %v6772_v38, 0.0  ;;  %v6870_v39 = vmax.f32 %v6768_v2, 0.0  ;;  %v11877_v8 = vld [vmem:[#allocation19 + $0x98] ss:$12 sps:$4 sm:$0xff]   ;;  %v11900_v52 = vld [vmem:[#allocation19 + $0x8bc] ss:$12 sps:$4 sm:$0xff]   ;;  %v4893_v38 = vrot.slane %v13151_v55, %v4860_v43 }
0x1677   :  { %9029 = vmatprep.subr.bf16.mxu0 %v11843_v46  ;;  %v11898_v46 = vld [vmem:[#allocation19 + $0x8b8] ss:$12 sps:$4 sm:$0xff]   ;;  %v11882_v35 = vld [vmem:[#allocation19 + $0x80] ss:$12 sps:$4 sm:$0xff]   ;;  %v11886_v15 = vld [vmem:[#allocation19 + $0x128] ss:$12 sps:$4 sm:$0xff]  }
0x1678   :  { %v6883_v63 = vmax.f32 %v6774_v30, 0.0  ;;  %v13164_v5 = vpack.c.bf16 %v6882_v33, %v6870_v39  ;;  %v11905_v27 = vld [vmem:[#allocation19 + $0x8a4] ss:$12 sps:$4 sm:$0xff]   ;;  %v11887_v30 = vld [vmem:[#allocation19 + $0x68] ss:$12 sps:$4 sm:$0xff]  }
0x1679   :  { %9057 = vmatpush1.bf16.msra.mxu1 %v11862_v11  ;;  %v11903_v11 = vld [vmem:[#allocation19 + $0x8a0] ss:$12 sps:$4 sm:$0xff]   ;;  %v11928_v45 = vld [vmem:[#allocation19 + $0x2f0] ss:$12 sps:$4 sm:$0xff]   ;;  %v11917_v33 = vld [vmem:[#allocation19 + $0x398] ss:$12 sps:$4 sm:$0xff]  }
0x167a   :  { %9030 = vmatpush2.bf16.msra.mxu0 %v11841_v1  ;;  %v13158_v60 = vpack.c.bf16 %v6883_v63, %v6871_v58  ;;  %9058 = vmatprep.subr.bf16.mxu1 %v11870_v16  ;;  %v11910_v1 = vld [vmem:[#allocation19 + $0x88c] ss:$12 sps:$4 sm:$0xff]   ;;  %v11908_v16 = vld [vmem:[#allocation19 + $0x888] ss:$12 sps:$4 sm:$0xff]  }
0x167b   :  { %9031 = vmatprep.subr.bf16.mxu0 %v11849_v40  ;;  %v11892_v40 = vld [vmem:[#allocation19 + $0x50] ss:$12 sps:$4 sm:$0xff]   ;;  %v11915_v58 = vld [vmem:[#allocation19 + $0x874] ss:$12 sps:$4 sm:$0xff]   ;;  %v11896_v63 = vld [vmem:[#allocation19 + $0xf8] ss:$12 sps:$4 sm:$0xff]  }
0x167c   :  { %9039 = vmatprep.mubr.bf16.mxu0 %v13158_v60  ;;  %v11923_v44 = vld [vmem:[#allocation19 + $0x840] ss:$12 sps:$4 sm:$0xff]  }
0x167d   :  { %9059 = vmatpush1.bf16.msra.mxu1 %v11868_v12  ;;  %v11913_v12 = vld [vmem:[#allocation19 + $0x870] ss:$12 sps:$4 sm:$0xff]   ;;  %v11921_v39 = vld [vmem:[#allocation19 + $0x440] ss:$12 sps:$4 sm:$0xff]  }
0x167e   :  { %9032 = vmatpush2.bf16.msra.mxu0 %v11847_v36  ;;  %9060 = vmatprep.subr.bf16.mxu1 %v11875_v0  ;;  %v11897_v36 = vld [vmem:[#allocation19 + $0x38] ss:$12 sps:$4 sm:$0xff]   ;;  %v11920_v0 = vld [vmem:[#allocation19 + $0x85c] ss:$12 sps:$4 sm:$0xff]  }
0x167f   :  { %9033 = vmatprep.subr.bf16.mxu0 %v11855_v37  ;;  %v11901_v37 = vld [vmem:[#allocation19 + $0xe0] ss:$12 sps:$4 sm:$0xff]  }
0x1681   :  { %9061 = vmatpush1.bf16.msra.mxu1 %v11873_v23  ;;  %v11902_v23 = vld [vmem:[#allocation19 + $0x20] ss:$12 sps:$4 sm:$0xff]  }
0x1682   :  { %9034 = vmatpush2.bf16.msra.mxu0 %v11853_v34  ;;  %9062 = vmatprep.subr.bf16.mxu1 %v11880_v48  ;;  %v11925_v34 = vld [vmem:[#allocation19 + $0x844] ss:$12 sps:$4 sm:$0xff]   ;;  %v11906_v48 = vld [vmem:[#allocation19 + $0xc8] ss:$12 sps:$4 sm:$0xff]  }
0x1683   :  { %9035 = vmatprep.subr.bf16.mxu0 %v11861_v21  ;;  %v11907_v21 = vld [vmem:[#allocation19 + $0x8] ss:$12 sps:$4 sm:$0xff]  }
0x1685   :  { %9063 = vmatpush1.bf16.msra.mxu1 %v11878_v50  ;;  %v11911_v50 = vld [vmem:[#allocation19 + $0x470] ss:$12 sps:$4 sm:$0xff]  }
0x1686   :  { %9036 = vmatpush2.bf16.msra.mxu0 %v11859_v31  ;;  %9064 = vmatprep.subr.bf16.mxu1 %v11885_v53  ;;  %v11912_v53 = vld [vmem:[#allocation19 + $0x3b0] ss:$12 sps:$4 sm:$0xff]  }
0x1687   :  { %9037 = vmatprep.subr.bf16.mxu0 %v11867_v22  ;;  %v11916_v22 = vld [vmem:[#allocation19 + $0x458] ss:$12 sps:$4 sm:$0xff]  }
0x1689   :  { %9065 = vmatpush1.bf16.msra.mxu1 %v11883_v56  ;;  %v4889_v56 = vrot.slane %v13151_v55, %v12505_v26 }
0x168a   :  { %9038 = vmatpush2.bf16.msra.mxu0 %v11865_v57  ;;  %9066 = vmatprep.subr.bf16.mxu1 %v11890_v59 }
0x168b   :  { %10383 = vmatprep.subr.bf16.mxu0 %v11871_v3 }
0x168d   :  { %9040 = vmatmul.mubr.bf16.vlgmr.msra.gmra.mxu0 %v13164_v5  ;;  %9067 = vmatpush2.bf16.msra.mxu1 %v11888_v61  ;;  %v6853_v31 = vpop.f32.mrf.mxu0 }
0x168e   :  { %10384 = vmatpush3.bf16.msra.mxu0 %v11872_v4  ;;  %9125 = vmatprep.mubr.bf16.mxu0 %v13087_v10  ;;  %v11891_v10 = vld [vmem:[#allocation19 + $0x110] ss:$12 sps:$4 sm:$0xff]  }
0x168f   :  { %10385 = vmatprep.subr.bf16.mxu0 %v11876_v6  ;;  %9068 = vmatprep.subr.bf16.mxu1 %v11895_v62  ;;  %v6855_v2 = vpop.f32.mrf.mxu0  ;;  %v11922_v62 = vld [vmem:[#allocation19 + $0x380] ss:$12 sps:$4 sm:$0xff]  }
0x1691   :  { %9069 = vmatpush2.bf16.msra.mxu1 %v11893_v17  ;;  %v6857_v61 = vpop.f32.mrf.mxu0 }
0x1692   :  { %10386 = vmatpush3.bf16.msra.mxu0 %v11877_v8  ;;  %9070 = vmatprep.subr.bf16.mxu1 %v11900_v52 }
0x1693   :  { %10387 = vmatprep.subr.bf16.mxu0 %v11881_v9  ;;  %v6859_v52 = vpop.f32.mrf.mxu0 }
0x1695   :  { %9071 = vmatpush2.bf16.msra.mxu1 %v11898_v46 }
0x1696   :  { %10388 = vmatpush3.bf16.msra.mxu0 %v11882_v35  ;;  %9072 = vmatprep.subr.bf16.mxu1 %v11905_v27  ;;  %v11927_v35 = vld [vmem:[#allocation19 + $0x368] ss:$12 sps:$4 sm:$0xff]  }
0x1697   :  { %10389 = vmatprep.subr.bf16.mxu0 %v11886_v15 }
0x1699   :  { %9073 = vmatpush2.bf16.msra.mxu1 %v11903_v11  ;;  %v11930_v11 = vld [vmem:[#allocation19 + $0x410] ss:$12 sps:$4 sm:$0xff]  }
0x169a   :  { %10390 = vmatpush3.bf16.msra.mxu0 %v11887_v30  ;;  %9074 = vmatprep.subr.bf16.mxu1 %v11910_v1 }
0x169b   :  { %10391 = vmatprep.subr.bf16.mxu0 %v11891_v10  ;;  %v11929_v10 = vld [vmem:[#allocation19 + $0x230] ss:$12 sps:$4 sm:$0xff]  }
0x169d   :  { %9075 = vmatpush2.bf16.msra.mxu1 %v11908_v16 }
0x169e   :  { %10392 = vmatpush3.bf16.msra.mxu0 %v11892_v40  ;;  %9076 = vmatprep.subr.bf16.mxu1 %v11915_v58  ;;  %v11931_v40 = vld [vmem:[#allocation19 + $0x350] ss:$12 sps:$4 sm:$0xff]   ;;  %v11932_v58 = vld [vmem:[#allocation19 + $0x2d8] ss:$12 sps:$4 sm:$0xff]  }
0x169f   :  { %10393 = vmatprep.subr.bf16.mxu0 %v11896_v63  ;;  %v11934_v63 = vld [vmem:[#allocation19 + $0x3f8] ss:$12 sps:$4 sm:$0xff]  }
0x16a1   :  { %9077 = vmatpush2.bf16.msra.mxu1 %v11913_v12  ;;  %v11933_v12 = vld [vmem:[#allocation19 + $0x218] ss:$12 sps:$4 sm:$0xff]  }
0x16a2   :  { %10394 = vmatpush3.bf16.msra.mxu0 %v11897_v36  ;;  %9078 = vmatprep.subr.bf16.mxu1 %v11920_v0  ;;  %v11935_v36 = vld [vmem:[#allocation19 + $0x338] ss:$12 sps:$4 sm:$0xff]   ;;  %v11936_v0 = vld [vmem:[#allocation19 + $0x2c0] ss:$12 sps:$4 sm:$0xff]  }
0x16a3   :  { %10395 = vmatprep.subr.bf16.mxu0 %v11901_v37  ;;  %v11938_v37 = vld [vmem:[#allocation19 + $0x3e0] ss:$12 sps:$4 sm:$0xff]  }
0x16a5   :  { %9079 = vmatpush2.bf16.msra.mxu1 %v11918_v47  ;;  %v11937_v47 = vld [vmem:[#allocation19 + $0x200] ss:$12 sps:$4 sm:$0xff]  }
0x16a6   :  { %10396 = vmatpush3.bf16.msra.mxu0 %v11902_v23  ;;  %9080 = vmatprep.subr.bf16.mxu1 %v11925_v34  ;;  %v11939_v23 = vld [vmem:[#allocation19 + $0x320] ss:$12 sps:$4 sm:$0xff]   ;;  %v11940_v34 = vld [vmem:[#allocation19 + $0x2a8] ss:$12 sps:$4 sm:$0xff]  }
0x16a7   :  { %10397 = vmatprep.subr.bf16.mxu0 %v11906_v48  ;;  %v11942_v48 = vld [vmem:[#allocation19 + $0x3c8] ss:$12 sps:$4 sm:$0xff]  }
0x16a9   :  { %9081 = vmatpush2.bf16.msra.mxu1 %v11923_v44  ;;  %v11941_v44 = vld [vmem:[#allocation19 + $0x1e8] ss:$12 sps:$4 sm:$0xff]  }
0x16aa   :  { %10398 = vmatpush3.bf16.msra.mxu0 %v11907_v21  ;;  %10405 = vmatprep.subr.bf16.mxu1 %v11928_v45  ;;  %v11944_v21 = vld [vmem:[#allocation19 + $0x290] ss:$12 sps:$4 sm:$0xff]  }
0x16ab   :  { %10427 = vmatprep.subr.bf16.mxu0 %v11911_v50  ;;  %v11946_v45 = vld [vmem:[#allocation19 + $0x770] ss:$12 sps:$4 sm:$0xff]  }
0x16ac   :  { %v6810_v57 = vpop.f32.mrf.mxu1  ;;  %v11945_v50 = vld [vmem:[#allocation19 + $0x1d0] ss:$12 sps:$4 sm:$0xff]  }
0x16ad   :  { %9126 = vmatmul.mubr.bf16.vlgmr.msra.gmra.mxu0 %v13083_v51  ;;  %v6811_v24 = vadd.f32 %v6810_v57, %v4889_v56  ;;  %v11926_v51 = vld [vmem:[#allocation19 + $0x428] ss:$12 sps:$4 sm:$0xff]   ;;  %v11954_v57 = vld [vmem:[#allocation19 + $0x740] ss:$12 sps:$4 sm:$0xff]  }
0x16ae   :  { %v6812_v59 = vpop.f32.mrf.mxu1  ;;  %10428 = vmatpush3.bf16.msra.mxu0 %v11912_v53  ;;  %9207 = vmatprep.mubr.bf16.mxu0 %v13118_v42  ;;  %v11948_v53 = vld [vmem:[#allocation19 + $0x278] ss:$12 sps:$4 sm:$0xff]  }
0x16af   :  { %v6813_v3 = vadd.f32 %v6812_v59, %v4893_v38  ;;  %10429 = vmatprep.subr.bf16.mxu0 %v11916_v22  ;;  %v6854_v9 = vadd.f32 %v6853_v31, %v6811_v24  ;;  %v11947_v31 = vld [vmem:[#allocation19 + $0x6b0] ss:$12 sps:$4 sm:$0xff]   ;;  %v11949_v22 = vld [vmem:[#allocation19 + $0x1b8] ss:$12 sps:$4 sm:$0xff]   ;;  %v11953_v59 = vld [vmem:[#allocation19 + $0x1a0] ss:$12 sps:$4 sm:$0xff]  }
0x16b0   :  { %v6814_v4 = vpop.f32.mrf.mxu1  ;;  %v11960_v24 = vld [vmem:[#allocation19 + $0x5f0] ss:$12 sps:$4 sm:$0xff]  }
0x16b1   :  { %v6815_v43 = vadd.f32 %v6814_v4, %v4889_v56  ;;  %v6856_v17 = vadd.f32 %v6855_v2, %v6813_v3  ;;  %v6872_v30 = vmax.f32 %v6854_v9, 0.0  ;;  %v11951_v2 = vld [vmem:[#allocation19 + $0x698] ss:$12 sps:$4 sm:$0xff]   ;;  %v11952_v56 = vld [vmem:[#allocation19 + $0x260] ss:$12 sps:$4 sm:$0xff]  }
0x16b2   :  { %v6816_v6 = vpop.f32.mrf.mxu1  ;;  %10430 = vmatpush3.bf16.msra.mxu0 %v11917_v33  ;;  %v11955_v33 = vld [vmem:[#allocation19 + $0x680] ss:$12 sps:$4 sm:$0xff]   ;;  %v11956_v3 = vld [vmem:[#allocation19 + $0x248] ss:$12 sps:$4 sm:$0xff]   ;;  %v11961_v4 = vld [vmem:[#allocation19 + $0x530] ss:$12 sps:$4 sm:$0xff]  }
0x16b3   :  { %v6858_v55 = vadd.f32 %v6857_v61, %v6815_v43  ;;  %v6817_v8 = vadd.f32 %v6816_v6, %v4893_v38  ;;  %10431 = vmatprep.subr.bf16.mxu0 %v11921_v39  ;;  %v6873_v27 = vmax.f32 %v6856_v17, 0.0  ;;  %v11950_v38 = vld [vmem:[#allocation19 + $0x758] ss:$12 sps:$4 sm:$0xff]   ;;  %v11958_v39 = vld [vmem:[#allocation19 + $0x728] ss:$12 sps:$4 sm:$0xff]  }
0x16b4   :  { %v11957_v61 = vld [vmem:[#allocation19 + $0x188] ss:$12 sps:$4 sm:$0xff]   ;;  %v11963_v43 = vld [vmem:[#allocation19 + $0x650] ss:$12 sps:$4 sm:$0xff]   ;;  %v11964_v6 = vld [vmem:[#allocation19 + $0x5d8] ss:$12 sps:$4 sm:$0xff]  }
0x16b5   :  { %v6860_v46 = vadd.f32 %v6859_v52, %v6817_v8  ;;  %v6884_v42 = vmax.f32 %v6858_v55, 0.0  ;;  %v11965_v17 = vld [vmem:[#allocation19 + $0x518] ss:$12 sps:$4 sm:$0xff]   ;;  %v11968_v8 = vld [vmem:[#allocation19 + $0x5c0] ss:$12 sps:$4 sm:$0xff]  }
0x16b6   :  { %10432 = vmatpush3.bf16.msra.mxu0 %v11922_v62  ;;  %v11966_v62 = vld [vmem:[#allocation19 + $0x6f8] ss:$12 sps:$4 sm:$0xff]   ;;  %v11969_v52 = vld [vmem:[#allocation19 + $0x500] ss:$12 sps:$4 sm:$0xff]  }
0x16b7   :  { %v6885_v15 = vmax.f32 %v6860_v46, 0.0  ;;  %10433 = vmatprep.subr.bf16.mxu0 %v11926_v51  ;;  %v13177_v16 = vpack.c.bf16 %v6884_v42, %v6872_v30  ;;  %v11967_v55 = vld [vmem:[#allocation19 + $0x638] ss:$12 sps:$4 sm:$0xff]   ;;  %v11970_v51 = vld [vmem:[#allocation19 + $0x6e0] ss:$12 sps:$4 sm:$0xff]  }
0x16b8   :  { %v11971_v9 = vld [vmem:[#allocation19 + $0x620] ss:$12 sps:$4 sm:$0xff]   ;;  %v11972_v46 = vld [vmem:[#allocation19 + $0x5a8] ss:$12 sps:$4 sm:$0xff]  }
0x16b9   :  { %v13175_v1 = vpack.c.bf16 %v6885_v15, %v6873_v27  ;;  %v11974_v42 = vld [vmem:[#allocation19 + $0x6c8] ss:$12 sps:$4 sm:$0xff]   ;;  %v11977_v27 = vld [vmem:[#allocation19 + $0x4d0] ss:$12 sps:$4 sm:$0xff]   ;;  %v11978_v15 = vld [vmem:[#allocation19 + $0x578] ss:$12 sps:$4 sm:$0xff]  }
0x16ba   :  { %10434 = vmatpush3.bf16.msra.mxu0 %v11927_v35  ;;  %v11976_v35 = vld [vmem:[#allocation19 + $0x590] ss:$12 sps:$4 sm:$0xff]   ;;  %v11980_v30 = vld [vmem:[#allocation19 + $0x560] ss:$12 sps:$4 sm:$0xff]  }
0x16bb   :  { %9082 = vmatprep.mubr.bf16.mxu1 %v13175_v1  ;;  %10435 = vmatprep.subr.bf16.mxu0 %v11930_v11  ;;  %v11979_v11 = vld [vmem:[#allocation19 + $0x4b8] ss:$12 sps:$4 sm:$0xff]  }
0x16bc   :  { %9083 = vmatmul.mubr.bf16.vlgmr.msra.gmra.mxu1 %v13177_v16 }
0x16bd   :  { %10406 = vmatpush3.bf16.msra.mxu1 %v11929_v10  ;;  %9166 = vmatprep.mubr.bf16.mxu1 %v13104_v54  ;;  %v11943_v54 = vld [vmem:[#allocation19 + $0x308] ss:$12 sps:$4 sm:$0xff]   ;;  %v11981_v10 = vld [vmem:[#allocation19 + $0x4a0] ss:$12 sps:$4 sm:$0xff]  }
0x16be   :  { %10436 = vmatpush3.bf16.msra.mxu0 %v11931_v40  ;;  %10407 = vmatprep.subr.bf16.mxu1 %v11932_v58  ;;  %v11982_v40 = vld [vmem:[#allocation19 + $0x548] ss:$12 sps:$4 sm:$0xff]  }
0x16bf   :  { %10437 = vmatprep.subr.bf16.mxu0 %v11934_v63  ;;  %v11983_v58 = vld [vmem:[#allocation19 + $0x488] ss:$12 sps:$4 sm:$0xff]   ;;  %v11984_v63 = vld [vmem:[#allocation19 + $0x8f0] ss:$12 sps:$4 sm:$0xff]  }
0x16c1   :  { %10408 = vmatpush3.bf16.msra.mxu1 %v11933_v12  ;;  %v11985_v12 = vld [vmem:[#allocation19 + $0x830] ss:$12 sps:$4 sm:$0xff]  }
0x16c2   :  { %10438 = vmatpush3.bf16.msra.mxu0 %v11935_v36  ;;  %10409 = vmatprep.subr.bf16.mxu1 %v11936_v0  ;;  %v11986_v36 = vld [vmem:[#allocation19 + $0x8d8] ss:$12 sps:$4 sm:$0xff]   ;;  %v11988_v0 = vld [vmem:[#allocation19 + $0x8c0] ss:$12 sps:$4 sm:$0xff]  }
0x16c3   :  { %10439 = vmatprep.subr.bf16.mxu0 %v11938_v37  ;;  %v11989_v37 = vld [vmem:[#allocation19 + $0x800] ss:$12 sps:$4 sm:$0xff]  }
0x16c5   :  { %10410 = vmatpush3.bf16.msra.mxu1 %v11937_v47  ;;  %v11990_v47 = vld [vmem:[#allocation19 + $0x8a8] ss:$12 sps:$4 sm:$0xff]  }
0x16c6   :  { %10440 = vmatpush3.bf16.msra.mxu0 %v11939_v23  ;;  %10411 = vmatprep.subr.bf16.mxu1 %v11940_v34  ;;  %v11991_v23 = vld [vmem:[#allocation19 + $0x7e8] ss:$12 sps:$4 sm:$0xff]   ;;  %v11992_v34 = vld [vmem:[#allocation19 + $0x890] ss:$12 sps:$4 sm:$0xff]  }
0x16c7   :  { %10441 = vmatprep.subr.bf16.mxu0 %v11942_v48  ;;  %v11993_v48 = vld [vmem:[#allocation19 + $0x7d0] ss:$12 sps:$4 sm:$0xff]  }
0x16c9   :  { %10412 = vmatpush3.bf16.msra.mxu1 %v11941_v44  ;;  %v11994_v44 = vld [vmem:[#allocation19 + $0x878] ss:$12 sps:$4 sm:$0xff]  }
0x16ca   :  { %10442 = vmatpush3.bf16.msra.mxu0 %v11943_v54  ;;  %10413 = vmatprep.subr.bf16.mxu1 %v11944_v21  ;;  %v11996_v54 = vld [vmem:[#allocation19 + $0x860] ss:$12 sps:$4 sm:$0xff]   ;;  %v11998_v21 = vld [vmem:[#allocation19 + $0x848] ss:$12 sps:$4 sm:$0xff]  }
0x16cb   :  { %10471 = vmatprep.subr.bf16.mxu0 %v11946_v45  ;;  %v11999_v45 = vld [vmem:[#allocation19 + $0x788] ss:$12 sps:$4 sm:$0xff]  }
0x16cd   :  { %10414 = vmatpush3.bf16.msra.mxu1 %v11945_v50  ;;  %9208 = vmatmul.mubr.bf16.vlgmr.msra.gmra.mxu0 %v13139_v49  ;;  %v11959_v49 = vld [vmem:[#allocation19 + $0x668] ss:$12 sps:$4 sm:$0xff]   ;;  %v8869_v50 = vpop.f32.mrf.mxu0 }
0x16ce   :  { %10472 = vmatpush3.bf16.msra.mxu0 %v11947_v31  ;;  %9289 = vmatprep.mubr.bf16.mxu0 %v13158_v60  ;;  %v11962_v60 = vld [vmem:[#allocation19 + $0x710] ss:$12 sps:$4 sm:$0xff]  }
0x16cf   :  { %10415 = vmatprep.subr.bf16.mxu1 %v11948_v53  ;;  %10473 = vmatprep.subr.bf16.mxu0 %v11950_v38  ;;  %v8871_v31 = vpop.f32.mrf.mxu0 }
0x16d1   :  { %10416 = vmatpush3.bf16.msra.mxu1 %v11949_v22  ;;  %v8873_v53 = vpop.f32.mrf.mxu0 }
0x16d2   :  { %10474 = vmatpush3.bf16.msra.mxu0 %v11951_v2  ;;  %10417 = vmatprep.subr.bf16.mxu1 %v11952_v56 }
0x16d3   :  { %10475 = vmatprep.subr.bf16.mxu0 %v11954_v57  ;;  %v8875_v22 = vpop.f32.mrf.mxu0 }
0x16d5   :  { %10418 = vmatpush3.bf16.msra.mxu1 %v11953_v59 }
0x16d6   :  { %10476 = vmatpush3.bf16.msra.mxu0 %v11955_v33  ;;  %10419 = vmatprep.subr.bf16.mxu1 %v11956_v3  ;;  %v7282_v33 = vld [vmem:[#allocation20] sm:$0x7] }
0x16d7   :  { %10477 = vmatprep.subr.bf16.mxu0 %v11958_v39 }
0x16d9   :  { %10420 = vmatpush3.bf16.msra.mxu1 %v11957_v61 }
0x16da   :  { %10478 = vmatpush3.bf16.msra.mxu0 %v11959_v49  ;;  %10449 = vmatprep.subr.bf16.mxu1 %v11960_v24  ;;  %v7287_v49 = vrot.slane %v7282_v33, %v12508_v28 }
0x16db   :  { %10479 = vmatprep.subr.bf16.mxu0 %v11962_v60  ;;  %v7291_v60 = vrot.slane %v7282_v33, %v12502_v25 }
0x16dc   :  { %9167 = vmatmul.mubr.bf16.vlgmr.msra.gmra.mxu1 %v13127_v13  ;;  %v11973_v13 = vld [vmem:[#allocation19 + $0x4e8] ss:$12 sps:$4 sm:$0xff]  }
0x16dd   :  { %10450 = vmatpush3.bf16.msra.mxu1 %v11961_v4  ;;  %9248 = vmatprep.mubr.bf16.mxu1 %v13144_v14  ;;  %v11975_v14 = vld [vmem:[#allocation19 + $0x608] ss:$12 sps:$4 sm:$0xff]  }
0x16de   :  { %10480 = vmatpush3.bf16.msra.mxu0 %v11963_v43  ;;  %10451 = vmatprep.subr.bf16.mxu1 %v11964_v6  ;;  %v8870_v43 = vadd.f32 %v8869_v50, %v7287_v49  ;;  %v8872_v6 = vadd.f32 %v8871_v31, %v7291_v60 }
0x16df   :  { %10481 = vmatprep.subr.bf16.mxu0 %v11966_v62 }
0x16e1   :  { %10452 = vmatpush3.bf16.msra.mxu1 %v11965_v17 }
0x16e2   :  { %10482 = vmatpush3.bf16.msra.mxu0 %v11967_v55  ;;  %10453 = vmatprep.subr.bf16.mxu1 %v11968_v8  ;;  %v8874_v8 = vadd.f32 %v8873_v53, %v7287_v49 }
0x16e3   :  { %10483 = vmatprep.subr.bf16.mxu0 %v11970_v51 }
0x16e5   :  { %10454 = vmatpush3.bf16.msra.mxu1 %v11969_v52 }
0x16e6   :  { %10484 = vmatpush3.bf16.msra.mxu0 %v11971_v9  ;;  %10455 = vmatprep.subr.bf16.mxu1 %v11972_v46  ;;  %v8876_v9 = vadd.f32 %v8875_v22, %v7291_v60 }
0x16e7   :  { %10485 = vmatprep.subr.bf16.mxu0 %v11974_v42 }
0x16e9   :  { %10456 = vmatpush3.bf16.msra.mxu1 %v11973_v13 }
0x16ea   :  { %10486 = vmatpush3.bf16.msra.mxu0 %v11975_v14  ;;  %10457 = vmatprep.subr.bf16.mxu1 %v11976_v35 }
0x16ec   :  { %v8912_v38 = vpop.f32.mrf.mxu1 }
0x16ed   :  { %10458 = vmatpush3.bf16.msra.mxu1 %v11977_v27  ;;  %9290 = vmatmul.mubr.bf16.vlgmr.msra.gmra.mxu0 %v13164_v5  ;;  %v11987_v5 = vld [vmem:[#allocation19 + $0x818] ss:$12 sps:$4 sm:$0xff]   ;;  %v8913_v62 = vadd.f32 %v8912_v38, %v8870_v43 }
0x16ee   :  { %10459 = vmatprep.subr.bf16.mxu1 %v11978_v15  ;;  %v8914_v2 = vpop.f32.mrf.mxu1 }
0x16ef   :  { %v8915_v51 = vadd.f32 %v8914_v2, %v8872_v6 }
0x16f0   :  { %v8916_v57 = vpop.f32.mrf.mxu1 }
0x16f1   :  { %10460 = vmatpush3.bf16.msra.mxu1 %v11979_v11  ;;  %v8917_v46 = vadd.f32 %v8916_v57, %v8874_v8 }
0x16f2   :  { %10461 = vmatprep.subr.bf16.mxu1 %v11980_v30  ;;  %v8918_v3 = vpop.f32.mrf.mxu1 }
0x16f3   :  { %v8919_v28 = vadd.f32 %v8918_v3, %v8876_v9 }
0x16f5   :  { %10462 = vmatpush3.bf16.msra.mxu1 %v11981_v10 }
0x16f6   :  { %10463 = vmatprep.subr.bf16.mxu1 %v11982_v40 }
0x16f9   :  { %10464 = vmatpush3.bf16.msra.mxu1 %v11983_v58 }
0x16fa   :  { %10493 = vmatprep.subr.bf16.mxu1 %v11984_v63 }
0x16fc   :  { %9249 = vmatmul.mubr.bf16.vlgmr.msra.gmra.mxu1 %v13149_v18  ;;  %v11995_v18 = vld [vmem:[#allocation19 + $0x7b8] ss:$12 sps:$4 sm:$0xff]  }
0x16fd   :  { %10494 = vmatpush3.bf16.msra.mxu1 %v11985_v12  ;;  %9330 = vmatprep.mubr.bf16.mxu1 %v13175_v1  ;;  %v11997_v1 = vld [vmem:[#allocation19 + $0x7a0] ss:$12 sps:$4 sm:$0xff]  }
0x16fe   :  { %10495 = vmatprep.subr.bf16.mxu1 %v11986_v36 }
0x1701   :  { %10496 = vmatpush3.bf16.msra.mxu1 %v11987_v5 }
0x1702   :  { %10497 = vmatprep.subr.bf16.mxu1 %v11988_v0 }
0x1705   :  { %10498 = vmatpush3.bf16.msra.mxu1 %v11989_v37 }
0x1706   :  { %10499 = vmatprep.subr.bf16.mxu1 %v11990_v47 }
0x1709   :  { %10500 = vmatpush3.bf16.msra.mxu1 %v11991_v23 }
0x170a   :  { %10501 = vmatprep.subr.bf16.mxu1 %v11992_v34 }
0x170d   :  { %10502 = vmatpush3.bf16.msra.mxu1 %v11993_v48  ;;  %v8955_v56 = vpop.f32.mrf.mxu0 }
0x170e   :  { %10503 = vmatprep.subr.bf16.mxu1 %v11994_v44  ;;  %v8956_v52 = vadd.f32 %v8955_v56, %v8913_v62 }
0x170f   :  { %v8957_v59 = vpop.f32.mrf.mxu0 }
0x1710   :  { %v8958_v42 = vadd.f32 %v8957_v59, %v8915_v51  ;;  %v7295_v59 = vrot.slane %v7282_v33, %v12505_v26 }
0x1711   :  { %10504 = vmatpush3.bf16.msra.mxu1 %v11995_v18  ;;  %v8959_v39 = vpop.f32.mrf.mxu0 }
0x1712   :  { %10505 = vmatprep.subr.bf16.mxu1 %v11996_v54  ;;  %v8960_v27 = vadd.f32 %v8959_v39, %v8917_v46 }
0x1713   :  { %v8961_v24 = vpop.f32.mrf.mxu0 }
0x1714   :  { %v8962_v30 = vadd.f32 %v8961_v24, %v8919_v28 }
0x1715   :  { %10506 = vmatpush3.bf16.msra.mxu1 %v11997_v1 }
0x1716   :  { %10507 = vmatprep.subr.bf16.mxu1 %v11998_v21 }
0x1719   :  { %10508 = vmatpush3.bf16.msra.mxu1 %v11999_v45 }
0x171c   :  { %9331 = vmatmul.mubr.bf16.vlgmr.msra.gmra.mxu1 %v13177_v16 }
0x172c   :  { %v8998_v61 = vpop.f32.mrf.mxu1 }
0x172d   :  { %v8999_v13 = vadd.f32 %v8998_v61, %v8956_v52 }
0x172e   :  { %v9000_v4 = vpop.f32.mrf.mxu1 }
0x172f   :  { %v9001_v15 = vadd.f32 %v9000_v4, %v8958_v42 }
0x1730   :  { %v9002_v17 = vpop.f32.mrf.mxu1 }
0x1731   :  { %v9003_v10 = vadd.f32 %v9002_v17, %v8960_v27 }
0x1732   :  { %v9004_v14 = vpop.f32.mrf.mxu1 }
0x1733   :  { %v9005_v36 = vadd.f32 %v9004_v14, %v8962_v30 }
0x174d   :  { %v9041_v16 = vpop.f32.mrf.mxu0 }
0x174e   :  { %v9042_v25 = vadd.f32 %v9041_v16, %v8999_v13 }
0x174f   :  { %v9043_v55 = vpop.f32.mrf.mxu0 }
0x1750   :  { %v9044_v40 = vadd.f32 %v9043_v55, %v9001_v15 }
0x1751   :  { %v9045_v35 = vpop.f32.mrf.mxu0 }
0x1752   :  { %v9046_v5 = vadd.f32 %v9045_v35, %v9003_v10 }
0x1753   :  { %v9047_v63 = vpop.f32.mrf.mxu0 }
0x1754   :  { %v9048_v23 = vadd.f32 %v9047_v63, %v9005_v36 }
0x176d   :  { %v10399_v21 = vpop.f32.mrf.mxu0 }
0x176f   :  { %v10400_v45 = vpop.f32.mrf.mxu0 }
0x1771   :  { %v10402_v50 = vpop.f32.mrf.mxu0 }
0x1773   :  { %v10403_v31 = vpop.f32.mrf.mxu0 }
0x1774   :  { %v10404_v24 = vadd.f32 %v10403_v31, %v10402_v50 }
0x1776   :  { %v9131_v6 = vadd.f32 %v10404_v24, %v7295_v59 }
0x177c   :  { %v9084_v11 = vpop.f32.mrf.mxu1 }
0x177d   :  { %v9085_v58 = vadd.f32 %v9084_v11, %v9042_v25 }
0x177e   :  { %v9086_v12 = vpop.f32.mrf.mxu1 }
0x177f   :  { %v9339_v0 = vadd.f32 %v9085_v58, %v12991_v20  ;;  %v9087_v37 = vadd.f32 %v9086_v12, %v9044_v40 }
0x1780   :  { %v9088_v47 = vpop.f32.mrf.mxu1 }
0x1781   :  { %9345 = vst [vmem:[#allocation22] sm:$0xff] %v9339_v0  ;;  %v9340_v34 = vadd.f32 %v9087_v37, %v12993_v29  ;;  %v9089_v48 = vadd.f32 %v9088_v47, %v9046_v5 }
0x1782   :  { %v9090_v44 = vpop.f32.mrf.mxu1 }
0x1783   :  { %9346 = vst [vmem:[#allocation22 + $0x8] sm:$0xff] %v9340_v34  ;;  %v9342_v18 = vadd.f32 %v9089_v48, %v13000_v32  ;;  %v9091_v54 = vadd.f32 %v9090_v44, %v9048_v23  ;;  %v10401_v32 = vadd.f32 %v10400_v45, %v10399_v21 }
0x1785   :  { %9348 = vst [vmem:[#allocation22 + $0x18] sm:$0xff] %v9342_v18  ;;  %v9343_v1 = vadd.f32 %v9091_v54, %v13002_v41  ;;  %v9128_v49 = vadd.f32 %v10401_v32, %v7295_v59 }
0x1787   :  { %9349 = vst [vmem:[#allocation22 + $0x20] sm:$0xff] %v9343_v1 }
0x178d   :  { %v10443_v38 = vpop.f32.mrf.mxu0 }
0x178f   :  { %v10444_v2 = vpop.f32.mrf.mxu0 }
0x1790   :  { %v10445_v62 = vadd.f32 %v10444_v2, %v10443_v38 }
0x1791   :  { %v10446_v56 = vpop.f32.mrf.mxu0 }
0x1793   :  { %v10447_v3 = vpop.f32.mrf.mxu0 }
0x1794   :  { %v10448_v9 = vadd.f32 %v10447_v3, %v10446_v56 }
0x179c   :  { %v10421_v20 = vpop.f32.mrf.mxu1 }
0x179e   :  { %v10422_v53 = vpop.f32.mrf.mxu1 }
0x179f   :  { %v10423_v61 = vadd.f32 %v10422_v53, %v10421_v20 }
0x17a0   :  { %v10424_v22 = vpop.f32.mrf.mxu1 }
0x17a1   :  { %v9169_v4 = vadd.f32 %v10423_v61, %v9128_v49 }
0x17a2   :  { %v10425_v29 = vpop.f32.mrf.mxu1 }
0x17a3   :  { %v10426_v16 = vadd.f32 %v10425_v29, %v10424_v22  ;;  %v9210_v51 = vadd.f32 %v10445_v62, %v9169_v4 }
0x17a5   :  { %v9172_v8 = vadd.f32 %v10426_v16, %v9131_v6 }
0x17a7   :  { %v9213_v13 = vadd.f32 %v10448_v9, %v9172_v8 }
0x17ad   :  { %v10487_v41 = vpop.f32.mrf.mxu0 }
0x17af   :  { %v10488_v43 = vpop.f32.mrf.mxu0 }
0x17b0   :  { %v10489_v42 = vadd.f32 %v10488_v43, %v10487_v41 }
0x17b1   :  { %v10490_v52 = vpop.f32.mrf.mxu0 }
0x17b3   :  { %v10491_v14 = vpop.f32.mrf.mxu0 }
0x17b4   :  { %v10492_v11 = vadd.f32 %v10491_v14, %v10490_v52 }
0x17bc   :  { %v10465_v57 = vpop.f32.mrf.mxu1 }
0x17be   :  { %v10466_v39 = vpop.f32.mrf.mxu1 }
0x17bf   :  { %v10467_v17 = vadd.f32 %v10466_v39, %v10465_v57 }
0x17c0   :  { %v10468_v60 = vpop.f32.mrf.mxu1 }
0x17c1   :  { %v9251_v26 = vadd.f32 %v10467_v17, %v9210_v51 }
0x17c2   :  { %v10469_v55 = vpop.f32.mrf.mxu1 }
0x17c3   :  { %v10470_v33 = vadd.f32 %v10469_v55, %v10468_v60  ;;  %v9292_v27 = vadd.f32 %v10489_v42, %v9251_v26 }
0x17c5   :  { %v9254_v28 = vadd.f32 %v10470_v33, %v9213_v13 }
0x17c7   :  { %v9295_v58 = vadd.f32 %v10492_v11, %v9254_v28 }
0x17dc   :  { %v10509_v46 = vpop.f32.mrf.mxu1 }
0x17de   :  { %v10510_v35 = vpop.f32.mrf.mxu1 }
0x17df   :  { %v10511_v15 = vadd.f32 %v10510_v35, %v10509_v46 }
0x17e0   :  { %v10512_v25 = vpop.f32.mrf.mxu1 }
0x17e1   :  { %v9333_v30 = vadd.f32 %v10511_v15, %v9292_v27 }
0x17e2   :  { %v10513_v10 = vpop.f32.mrf.mxu1 }
0x17e3   :  { %v9341_v40 = vadd.f32 %v9333_v30, %v12996_v7  ;;  %v10514_v63 = vadd.f32 %v10513_v10, %v10512_v25 }
0x17e5   :  { %9347 = vst [vmem:[#allocation22 + $0x10] sm:$0xff] %v9341_v40  ;;  %v9336_v12 = vadd.f32 %v10514_v63, %v9295_v58 }
0x17e7   :  { %v9344_v36 = vadd.f32 %v9336_v12, %v13005_v19 }
0x17e9   :  { %9350 = vst [vmem:[#allocation22 + $0x28] sm:$0xff] %v9344_v36 }
0x17ea   :  { %12313 = shalt.err (!%p12310_p8)
}
0x17eb   :  { %9362 = dma.vmem_to_hbm [thread:$0]  %s9357_s0, 768, %s13217_s12, [#allocation4], %s12346_s7, %s12346_s7, %s12347_s15  }
0x17ec   :  { %12336 = dma.done.wait [#allocation4], 768  }
0x17ed   :  { %12337 = vsyncadd [#allocation4], 4294966528 }
0x17ee   :  { %9366 = vsyncpa [#allocation3], 1 }
0x17ef   :  { %9367 = vsyncpa [#allocation6], 1 }
0x17f0   :  { %9368 = vsyncpa [#allocation9], 1 }
0x17f1   :  { %9369 = vsyncpa [#allocation12], 1 }
0x17f2   :  { %9370 = vsyncpa [#allocation15], 1 }
0x17f3   :  { %9371 = vsyncpa [#allocation18], 1 }
0x17f4   :  { %9372 = vsyncpa [#allocation21], 1 }
0x17f5   :  { %9373 = vsyncpa [#allocation4], 1 }

</bundles_post_ra>
